<compile_context>
chip_gen: v5e
topology: v5e:2x2
jax: 0.10.0
libtpu: 0.0.40
codegen_flags: <defaults>
</compile_context>

<pallas_src>
import jax
import jax.numpy as jnp
import numpy as np
from jax.experimental import pallas as pl
from jax.experimental.pallas import tpu as pltpu

HIDDEN = 128      # hardcoded in the PyTorch forward via h0 = zeros(2, B, 128)
NUM_LAYERS = 2    # hardcoded via h0 first dim
NUM_CLASSES = 8


def _pick_chunk(T, Bp, D, H, max_chunk, budget_bytes=24 << 20):
    """Largest time chunk whose pipelined x block + gx scratch fit the VMEM budget."""
    chunk = max(1, min(T, max_chunk))

    def footprint(ch):
        return 2 * ch * Bp * D * 2 + ch * Bp * 4 * H * 4   # 2x bf16 x block + f32 gx

    while chunk > 8 and footprint(chunk) > budget_bytes:
        chunk = max(8, chunk // 2)
    # keep the bf16 x block 16-sublane aligned when it is an actual sub-block
    if chunk < T and (chunk * Bp) % 16 != 0:
        chunk = max(2, chunk - (chunk % 2))
    return chunk


def _vmem_limit_bytes(chunk, Bp, D, H, C):
    x_blk = 2 * chunk * Bp * D * 2                       # double-buffered bf16 x block
    gx = chunk * Bp * 4 * H * 4                          # f32 gate scratch
    weights = 2 * (D * 4 * H * 2 + H * 8 * H * 2 + H * 4 * H * 2
                   + 2 * 4 * H * 4 + H * C * 4 + C * 4)  # (conservatively x2 buffered)
    states = (2 * 4 * H + 3 * H) * Bp * 4 + 2 * Bp * C * 4
    total = x_blk + gx + weights + states + (8 << 20)    # + headroom
    return int(min(max(total, 32 << 20), 64 << 20))      # cap: v7x physical VMEM


def _make_kernel(*, chunk, bp, t_total):
    """Build the kernel closure for static (chunk, padded batch, true T)."""
    H = HIDDEN
    ragged = (t_total % chunk) != 0

    def kernel(x_ref, wih0_ref, b0_ref, wcombo_ref, whh1_ref, b1_ref,
               wfc_ref, bfc_ref, out_ref,
               gx_ref, rec0_ref, c1_ref, h2_ref, c2_ref, rec1_ref):
        c = pl.program_id(0)
        num_chunks = pl.num_programs(0)

        @pl.when(c == 0)
        def _():
            rec0_ref[...] = jnp.zeros_like(rec0_ref)   # h1_prev @ W_hh0 (h1_0 = 0)
            c1_ref[...] = jnp.zeros_like(c1_ref)
            h2_ref[...] = jnp.zeros_like(h2_ref)
            c2_ref[...] = jnp.zeros_like(c2_ref)
            rec1_ref[...] = jnp.zeros_like(rec1_ref)   # h2_prev @ W_hh1 (h2_0 = 0)

        # ---- Phase 1: layer-0 input projection for the whole chunk (one big matmul).
        # x block is already flat (chunk*bp, D) bf16; b0 folded in here.
        gx_ref[...] = (jnp.dot(x_ref[...], wih0_ref[...],
                               preferred_element_type=jnp.float32) + b0_ref[...])

        # ---- Loop-invariant hoists (JAX does not CSE broadcast_in_dim). ----
        b1_b = jnp.broadcast_to(b1_ref[...], (bp, 4 * H))

        def sig(v):   # 1 EUP push (tanh) + cheap VPU mul/add instead of exp + recip
            return 0.5 * jnp.tanh(0.5 * v) + 0.5

        # ---- Phase 2: sequential recurrence; state carried in vregs. ----
        def step(t, carry):
            rec0, c1, h2, c2, rec1 = carry
            row = pl.multiple_of(t * bp, 8)
            g0 = gx_ref[pl.ds(row, bp), :] + rec0            # (bp, 4H); b0 already in gx
            i0 = sig(g0[:, 0 * H:1 * H])
            f0 = sig(g0[:, 1 * H:2 * H])
            u0 = jnp.tanh(g0[:, 2 * H:3 * H])
            o0 = sig(g0[:, 3 * H:4 * H])
            c1n = f0 * c1 + i0 * u0
            h1n = o0 * jnp.tanh(c1n)

            # single MXU round-trip on the critical chain: [h1n@W_hh0 | h1n@W_ih1]
            hc = jnp.dot(h1n.astype(jnp.bfloat16), wcombo_ref[...],
                         preferred_element_type=jnp.float32)  # (bp, 8H)
            g1 = hc[:, 4 * H:8 * H] + rec1 + b1_b
            i1 = sig(g1[:, 0 * H:1 * H])
            f1 = sig(g1[:, 1 * H:2 * H])
            u1 = jnp.tanh(g1[:, 2 * H:3 * H])
            o1 = sig(g1[:, 3 * H:4 * H])
            c2n = f1 * c2 + i1 * u1
            h2n = o1 * jnp.tanh(c2n)
            # h2n @ W_hh1 only feeds the NEXT step's g1 -> off the g0 critical chain.
            rec1n = jnp.dot(h2n.astype(jnp.bfloat16), whh1_ref[...],
                            preferred_element_type=jnp.float32)
            rec0n = hc[:, 0:4 * H]

            if ragged:   # trace-time branch: only emitted when T % chunk != 0
                valid = (c * chunk + t) < t_total
                rec0n = jnp.where(valid, rec0n, rec0)
                c1n = jnp.where(valid, c1n, c1)
                h2n = jnp.where(valid, h2n, h2)
                c2n = jnp.where(valid, c2n, c2)
                rec1n = jnp.where(valid, rec1n, rec1)
            return rec0n, c1n, h2n, c2n, rec1n

        carry0 = (rec0_ref[...], c1_ref[...], h2_ref[...], c2_ref[...], rec1_ref[...])
        unroll = True if chunk <= 8 else 8
        rec0, c1, h2, c2, rec1 = jax.lax.fori_loop(0, chunk, step, carry0,
                                                   unroll=unroll)

        # persist state for the next chunk
        rec0_ref[...] = rec0
        c1_ref[...] = c1
        h2_ref[...] = h2
        c2_ref[...] = c2
        rec1_ref[...] = rec1

        # ---- head: out = fc(out[:, -1, :]) -- written on the last chunk only. ----
        @pl.when(c == num_chunks - 1)
        def _():
            out_ref[...] = (jnp.dot(h2, wfc_ref[...],
                                    preferred_element_type=jnp.float32) + bfc_ref[...])

    return kernel


def lstm_classifier(x, params, *, max_chunk=256):
    """x: (B, T, D) float32, batch-first like the PyTorch module. Returns (B, 8) f32."""
    B, T, D = x.shape
    H, C = HIDDEN, NUM_CLASSES
    Bp = ((B + 7) // 8) * 8                     # pad batch to a full f32 sublane group

    chunk = _pick_chunk(T, Bp, D, H, max_chunk)
    num_chunks = -(-T // chunk)                 # ceil; ragged tail is masked in-kernel
    T_pad = num_chunks * chunk

    # bf16 cast + time-major + pad (cheap XLA ops); flatten so the kernel never reshapes
    x_tm = jnp.transpose(x.astype(jnp.bfloat16), (1, 0, 2))       # (T, B, D)
    if T_pad != T or Bp != B:
        x_tm = jnp.pad(x_tm, ((0, T_pad - T), (0, Bp - B), (0, 0)))
    x_flat = x_tm.reshape(T_pad * Bp, D)                          # (T_pad*Bp, D) bf16

    bf16 = jnp.bfloat16
    wih0 = params["wih0"].astype(bf16)                                        # (D, 4H)
    wcombo = jnp.concatenate([params["whh0"], params["wih1"]], 1).astype(bf16)  # (H, 8H)
    whh1 = params["whh1"].astype(bf16)                                        # (H, 4H)

    def const(shape):
        return pl.BlockSpec(shape, lambda c: tuple(0 for _ in shape))

    grid_spec = pltpu.PrefetchScalarGridSpec(
        num_scalar_prefetch=0,
        grid=(num_chunks,),
        in_specs=[
            pl.BlockSpec((chunk * Bp, D), lambda c: (c, 0)),  # flat bf16 x chunk
            const((D, 4 * H)),       # W_ih layer 0 (bf16, transposed vs PyTorch)
            const((1, 4 * H)),       # b_ih + b_hh layer 0 (f32)
            const((H, 8 * H)),       # fused [W_hh0 | W_ih1] (bf16)
            const((H, 4 * H)),       # W_hh layer 1 (bf16)
            const((1, 4 * H)),       # b_ih + b_hh layer 1 (f32)
            const((H, C)),           # fc weight (f32, transposed)
            const((1, C)),           # fc bias (f32)
        ],
        out_specs=pl.BlockSpec((Bp, C), lambda c: (0, 0)),
        scratch_shapes=[
            pltpu.VMEM((chunk * Bp, 4 * H), jnp.float32),  # gx: layer-0 input gates
            pltpu.VMEM((Bp, 4 * H), jnp.float32),          # rec0 = h1 @ W_hh0
            pltpu.VMEM((Bp, H), jnp.float32),              # c1
            pltpu.VMEM((Bp, H), jnp.float32),              # h2
            pltpu.VMEM((Bp, H), jnp.float32),              # c2
            pltpu.VMEM((Bp, 4 * H), jnp.float32),          # rec1 = h2 @ W_hh1
        ],
    )

    kernel = _make_kernel(chunk=chunk, bp=Bp, t_total=T)
    out = pl.pallas_call(
        kernel,
        out_shape=jax.ShapeDtypeStruct((Bp, C), jnp.float32),
        grid_spec=grid_spec,
        compiler_params=pltpu.CompilerParams(
            dimension_semantics=("arbitrary",),              # true recurrence over time
            vmem_limit_bytes=_vmem_limit_bytes(chunk, Bp, D, H, C)),
    )(x_flat, wih0, params["b0"], wcombo, whh1, params["b1"],
      params["wfc"], params["bfc"])
    return out[:B]


def make_params(key, input_size):
    """Deterministic synthetic parameters with nn.LSTM / nn.Linear shapes (transposed)."""
    H, C = HIDDEN, NUM_CLASSES
    ks = jax.random.split(key, 8)
    s = 0.05
    f32 = jnp.float32
    return {
        # PyTorch weight_ih_l0 is (4H, D); we store (D, 4H). Gate order i, f, g, o.
        "wih0": s * jax.random.normal(ks[0], (input_size, 4 * H), f32),
        "whh0": s * jax.random.normal(ks[1], (H, 4 * H), f32),
        "b0":   s * jax.random.normal(ks[2], (1, 4 * H), f32),   # b_ih + b_hh merged
        "wih1": s * jax.random.normal(ks[3], (H, 4 * H), f32),
        "whh1": s * jax.random.normal(ks[4], (H, 4 * H), f32),
        "b1":   s * jax.random.normal(ks[5], (1, 4 * H), f32),
        "wfc":  s * jax.random.normal(ks[6], (H, C), f32),
        "bfc":  s * jax.random.normal(ks[7], (1, C), f32),
    }


def reference_forward(x, params, mixed=False):
    """Pure-JAX reference mirroring nn.LSTM(batch_first, 2 layers) + nn.Linear.

    mixed=False: exact f32 math (PyTorch-equivalent).
    mixed=True : mirrors the kernel's bf16 matmul operands / f32 accumulation.
    """
    H = HIDDEN
    B = x.shape[0]
    f32 = jnp.float32

    def mm(a, b):
        if mixed:
            return jnp.dot(a.astype(jnp.bfloat16), b.astype(jnp.bfloat16),
                           preferred_element_type=f32)
        return jnp.dot(a, b, preferred_element_type=f32)

    def gates(g):
        i = jax.nn.sigmoid(g[:, 0 * H:1 * H])
        f = jax.nn.sigmoid(g[:, 1 * H:2 * H])
        u = jnp.tanh(g[:, 2 * H:3 * H])
        o = jax.nn.sigmoid(g[:, 3 * H:4 * H])
        return i, f, u, o

    def step(carry, x_t):
        h1, c1, h2, c2 = carry
        g0 = mm(x_t, params["wih0"]) + params["b0"] + mm(h1, params["whh0"])
        i, f, u, o = gates(g0)
        c1 = f * c1 + i * u
        h1 = o * jnp.tanh(c1)
        g1 = mm(h1, params["wih1"]) + mm(h2, params["whh1"]) + params["b1"]
        i, f, u, o = gates(g1)
        c2 = f * c2 + i * u
        h2 = o * jnp.tanh(c2)
        return (h1, c1, h2, c2), None

    z = jnp.zeros((B, H), f32)
    (_, _, h2, _), _ = jax.lax.scan(step, (z, z, z, z), jnp.transpose(x, (1, 0, 2)))
    return jnp.dot(h2, params["wfc"], preferred_element_type=f32) + params["bfc"]


if __name__ == "__main__":
    key = jax.random.PRNGKey(0)
    k_x, k_p = jax.random.split(key)

    # Small shapes consistent with the module: hidden=128, 2 layers, 8 classes.
    B, T, D = 2, 8, 256
    x = jax.random.normal(k_x, (B, T, D), jnp.float32)
    params = make_params(k_p, D)

    out = jax.block_until_ready(lstm_classifier(x, params))
    ref_mixed = reference_forward(x, params, mixed=True)   # mirrors kernel's bf16 matmuls
    ref_f32 = reference_forward(x, params, mixed=False)    # exact PyTorch-equivalent math
    np.testing.assert_allclose(np.asarray(out), np.asarray(ref_mixed),
                               rtol=1e-2, atol=1.5e-2)
    np.testing.assert_allclose(np.asarray(out), np.asarray(ref_f32),
                               rtol=5e-2, atol=5e-2)

    # Ragged-T / multi-chunk path: chunk=4 over T=10 -> 3 chunks with 2 masked tail steps.
    B2, T2 = 2, 10
    x2 = jax.random.normal(jax.random.PRNGKey(1), (B2, T2, D), jnp.float32)
    out2 = jax.block_until_ready(lstm_classifier(x2, params, max_chunk=4))
    ref2 = reference_forward(x2, params, mixed=True)
    np.testing.assert_allclose(np.asarray(out2), np.asarray(ref2),
                               rtol=1e-2, atol=1.5e-2)

    print("KERNEL_OK")
</pallas_src>

<mosaic_0001>
module attributes {stable_mosaic.version = 11 : i64} {
  func.func @kernel(%arg0: i32, %arg1: memref<64x256xbf16, #tpu.memory_space<vmem>>, %arg2: memref<256x512xbf16, #tpu.memory_space<vmem>>, %arg3: memref<1x512xf32, #tpu.memory_space<vmem>>, %arg4: memref<128x1024xbf16, #tpu.memory_space<vmem>>, %arg5: memref<128x512xbf16, #tpu.memory_space<vmem>>, %arg6: memref<1x512xf32, #tpu.memory_space<vmem>>, %arg7: memref<128x8xf32, #tpu.memory_space<vmem>>, %arg8: memref<1x8xf32, #tpu.memory_space<vmem>>, %arg9: memref<8x8xf32, #tpu.memory_space<vmem>>, %arg10: memref<64x512xf32, #tpu.memory_space<vmem>>, %arg11: memref<8x512xf32, #tpu.memory_space<vmem>>, %arg12: memref<8x128xf32, #tpu.memory_space<vmem>>, %arg13: memref<8x128xf32, #tpu.memory_space<vmem>>, %arg14: memref<8x128xf32, #tpu.memory_space<vmem>>, %arg15: memref<8x512xf32, #tpu.memory_space<vmem>>) attributes {dimension_semantics = [#tpu.dimension_semantics<arbitrary>], iteration_bounds = array<i64: 1>, scalar_prefetch = 0 : i64, scratch_operands = 6 : i64, tpu.core_type = #tpu.core_type<tc>, window_params = [{transform_indices = @transform_0, window_bounds = array<i64: 64, 256>}, {pipeline_mode = #tpu.pipeline_mode<synchronous>, transform_indices = @transform_1, window_bounds = array<i64: 256, 512>}, {pipeline_mode = #tpu.pipeline_mode<synchronous>, transform_indices = @transform_2, window_bounds = array<i64: 1, 512>}, {pipeline_mode = #tpu.pipeline_mode<synchronous>, transform_indices = @transform_3, window_bounds = array<i64: 128, 1024>}, {pipeline_mode = #tpu.pipeline_mode<synchronous>, transform_indices = @transform_4, window_bounds = array<i64: 128, 512>}, {pipeline_mode = #tpu.pipeline_mode<synchronous>, transform_indices = @transform_5, window_bounds = array<i64: 1, 512>}, {pipeline_mode = #tpu.pipeline_mode<synchronous>, transform_indices = @transform_6, window_bounds = array<i64: 128, 8>}, {pipeline_mode = #tpu.pipeline_mode<synchronous>, transform_indices = @transform_7, window_bounds = array<i64: 1, 8>}, {pipeline_mode = #tpu.pipeline_mode<synchronous>, transform_indices = @transform_8, window_bounds = array<i64: 8, 8>}]} {
    %c0_i32 = arith.constant 0 : i32
    %0 = arith.cmpi eq, %arg0, %c0_i32 : i32
    %1 = arith.extui %0 : i1 to i32
    %c0_i32_0 = arith.constant 0 : i32
    %2 = arith.cmpi ne, %1, %c0_i32_0 : i32
    scf.if %2 {
      %cst_241 = arith.constant 0.000000e+00 : f32
      %642 = vector.broadcast %cst_241 : f32 to vector<8x512xf32>
      %c0_242 = arith.constant 0 : index
      %c0_243 = arith.constant 0 : index
      %643 = vector.load %arg11[%c0_242, %c0_243] : memref<8x512xf32, #tpu.memory_space<vmem>>, vector<8x512xf32>
      tpu.vector_store %arg11[%c0_242, %c0_243], %642 {strides = array<i32>} : memref<8x512xf32, #tpu.memory_space<vmem>>, vector<8x512xf32>,
      %cst_244 = arith.constant 0.000000e+00 : f32
      %644 = vector.broadcast %cst_244 : f32 to vector<8x128xf32>
      %c0_245 = arith.constant 0 : index
      %c0_246 = arith.constant 0 : index
      %645 = vector.load %arg12[%c0_245, %c0_246] : memref<8x128xf32, #tpu.memory_space<vmem>>, vector<8x128xf32>
      tpu.vector_store %arg12[%c0_245, %c0_246], %644 {strides = array<i32>} : memref<8x128xf32, #tpu.memory_space<vmem>>, vector<8x128xf32>,
      %cst_247 = arith.constant 0.000000e+00 : f32
      %646 = vector.broadcast %cst_247 : f32 to vector<8x128xf32>
      %c0_248 = arith.constant 0 : index
      %c0_249 = arith.constant 0 : index
      %647 = vector.load %arg13[%c0_248, %c0_249] : memref<8x128xf32, #tpu.memory_space<vmem>>, vector<8x128xf32>
      tpu.vector_store %arg13[%c0_248, %c0_249], %646 {strides = array<i32>} : memref<8x128xf32, #tpu.memory_space<vmem>>, vector<8x128xf32>,
      %cst_250 = arith.constant 0.000000e+00 : f32
      %648 = vector.broadcast %cst_250 : f32 to vector<8x128xf32>
      %c0_251 = arith.constant 0 : index
      %c0_252 = arith.constant 0 : index
      %649 = vector.load %arg14[%c0_251, %c0_252] : memref<8x128xf32, #tpu.memory_space<vmem>>, vector<8x128xf32>
      tpu.vector_store %arg14[%c0_251, %c0_252], %648 {strides = array<i32>} : memref<8x128xf32, #tpu.memory_space<vmem>>, vector<8x128xf32>,
      %cst_253 = arith.constant 0.000000e+00 : f32
      %650 = vector.broadcast %cst_253 : f32 to vector<8x512xf32>
      %c0_254 = arith.constant 0 : index
      %c0_255 = arith.constant 0 : index
      %651 = vector.load %arg15[%c0_254, %c0_255] : memref<8x512xf32, #tpu.memory_space<vmem>>, vector<8x512xf32>
      tpu.vector_store %arg15[%c0_254, %c0_255], %650 {strides = array<i32>} : memref<8x512xf32, #tpu.memory_space<vmem>>, vector<8x512xf32>,
    } else {
    }
    %c0 = arith.constant 0 : index
    %c0_1 = arith.constant 0 : index
    %3 = vector.load %arg1[%c0, %c0_1] : memref<64x256xbf16, #tpu.memory_space<vmem>>, vector<64x256xbf16>
    %c0_2 = arith.constant 0 : index
    %c0_3 = arith.constant 0 : index
    %4 = vector.load %arg2[%c0_2, %c0_3] : memref<256x512xbf16, #tpu.memory_space<vmem>>, vector<256x512xbf16>
    %cst = arith.constant dense<0.000000e+00> : vector<64x512xf32>
    %5 = tpu.matmul %3, %4, %cst {dimension_numbers = #tpu.dot_dimension_numbers<[1], [0], [0], [1], [0, 0, 1, 1], [], []>} : vector<64x256xbf16>, vector<256x512xbf16>, vector<64x512xf32> -> vector<64x512xf32>
    %c0_4 = arith.constant 0 : index
    %c0_5 = arith.constant 0 : index
    %6 = vector.load %arg3[%c0_4, %c0_5] : memref<1x512xf32, #tpu.memory_space<vmem>>, vector<1x512xf32>
    %7 = vector.broadcast %6 : vector<1x512xf32> to vector<64x512xf32>
    %8 = arith.addf %5, %7 : vector<64x512xf32>
    %c0_6 = arith.constant 0 : index
    %c0_7 = arith.constant 0 : index
    %9 = vector.load %arg10[%c0_6, %c0_7] : memref<64x512xf32, #tpu.memory_space<vmem>>, vector<64x512xf32>
    tpu.vector_store %arg10[%c0_6, %c0_7], %8 {strides = array<i32>} : memref<64x512xf32, #tpu.memory_space<vmem>>, vector<64x512xf32>,
    %c0_8 = arith.constant 0 : index
    %c0_9 = arith.constant 0 : index
    %10 = vector.load %arg6[%c0_8, %c0_9] : memref<1x512xf32, #tpu.memory_space<vmem>>, vector<1x512xf32>
    %11 = vector.shape_cast %10 : vector<1x512xf32> to vector<1x512xf32>
    %12 = vector.broadcast %11 : vector<1x512xf32> to vector<8x512xf32>
    %c0_10 = arith.constant 0 : index
    %c0_11 = arith.constant 0 : index
    %13 = vector.load %arg11[%c0_10, %c0_11] : memref<8x512xf32, #tpu.memory_space<vmem>>, vector<8x512xf32>
    %c0_12 = arith.constant 0 : index
    %c0_13 = arith.constant 0 : index
    %14 = vector.load %arg12[%c0_12, %c0_13] : memref<8x128xf32, #tpu.memory_space<vmem>>, vector<8x128xf32>
    %c0_14 = arith.constant 0 : index
    %c0_15 = arith.constant 0 : index
    %15 = vector.load %arg13[%c0_14, %c0_15] : memref<8x128xf32, #tpu.memory_space<vmem>>, vector<8x128xf32>
    %c0_16 = arith.constant 0 : index
    %c0_17 = arith.constant 0 : index
    %16 = vector.load %arg14[%c0_16, %c0_17] : memref<8x128xf32, #tpu.memory_space<vmem>>, vector<8x128xf32>
    %c0_18 = arith.constant 0 : index
    %c0_19 = arith.constant 0 : index
    %17 = vector.load %arg15[%c0_18, %c0_19] : memref<8x512xf32, #tpu.memory_space<vmem>>, vector<8x512xf32>
    %c0_i32_20 = arith.constant 0 : i32
    %c8_i32 = arith.constant 8 : i32
    %18 = arith.muli %c0_i32_20, %c8_i32 : i32
    %19 = tpu.assume_multiple %18, 8 : i32
    %20 = arith.index_cast %19 : i32 to index
    %c0_21 = arith.constant 0 : index
    %21 = vector.load %arg10[%20, %c0_21] : memref<64x512xf32, #tpu.memory_space<vmem>>, vector<8x512xf32>
    %22 = arith.addf %21, %13 : vector<8x512xf32>
    %23 = vector.extract_strided_slice %22 {offsets = [0, 0], sizes = [8, 128], strides = [1, 1]} : vector<8x512xf32> to vector<8x128xf32>
    %cst_22 = arith.constant 5.000000e-01 : f32
    %24 = vector.broadcast %cst_22 : f32 to vector<8x128xf32>
    %25 = arith.mulf %24, %23 : vector<8x128xf32>
    %26 = math.tanh %25 : vector<8x128xf32>
    %cst_23 = arith.constant 5.000000e-01 : f32
    %27 = vector.broadcast %cst_23 : f32 to vector<8x128xf32>
    %28 = arith.mulf %27, %26 : vector<8x128xf32>
    %cst_24 = arith.constant 5.000000e-01 : f32
    %29 = vector.broadcast %cst_24 : f32 to vector<8x128xf32>
    %30 = arith.addf %28, %29 : vector<8x128xf32>
    %31 = vector.extract_strided_slice %22 {offsets = [0, 128], sizes = [8, 128], strides = [1, 1]} : vector<8x512xf32> to vector<8x128xf32>
    %cst_25 = arith.constant 5.000000e-01 : f32
    %32 = vector.broadcast %cst_25 : f32 to vector<8x128xf32>
    %33 = arith.mulf %32, %31 : vector<8x128xf32>
    %34 = math.tanh %33 : vector<8x128xf32>
    %cst_26 = arith.constant 5.000000e-01 : f32
    %35 = vector.broadcast %cst_26 : f32 to vector<8x128xf32>
    %36 = arith.mulf %35, %34 : vector<8x128xf32>
    %cst_27 = arith.constant 5.000000e-01 : f32
    %37 = vector.broadcast %cst_27 : f32 to vector<8x128xf32>
    %38 = arith.addf %36, %37 : vector<8x128xf32>
    %39 = vector.extract_strided_slice %22 {offsets = [0, 256], sizes = [8, 128], strides = [1, 1]} : vector<8x512xf32> to vector<8x128xf32>
    %40 = math.tanh %39 : vector<8x128xf32>
    %41 = vector.extract_strided_slice %22 {offsets = [0, 384], sizes = [8, 128], strides = [1, 1]} : vector<8x512xf32> to vector<8x128xf32>
    %cst_28 = arith.constant 5.000000e-01 : f32
    %42 = vector.broadcast %cst_28 : f32 to vector<8x128xf32>
    %43 = arith.mulf %42, %41 : vector<8x128xf32>
    %44 = math.tanh %43 : vector<8x128xf32>
    %cst_29 = arith.constant 5.000000e-01 : f32
    %45 = vector.broadcast %cst_29 : f32 to vector<8x128xf32>
    %46 = arith.mulf %45, %44 : vector<8x128xf32>
    %cst_30 = arith.constant 5.000000e-01 : f32
    %47 = vector.broadcast %cst_30 : f32 to vector<8x128xf32>
    %48 = arith.addf %46, %47 : vector<8x128xf32>
    %49 = arith.mulf %38, %14 : vector<8x128xf32>
    %50 = arith.mulf %30, %40 : vector<8x128xf32>
    %51 = arith.addf %49, %50 : vector<8x128xf32>
    %52 = math.tanh %51 : vector<8x128xf32>
    %53 = arith.mulf %48, %52 : vector<8x128xf32>
    %54 = arith.truncf %53 : vector<8x128xf32> to vector<8x128xbf16>
    %c0_31 = arith.constant 0 : index
    %c0_32 = arith.constant 0 : index
    %55 = vector.load %arg4[%c0_31, %c0_32] : memref<128x1024xbf16, #tpu.memory_space<vmem>>, vector<128x1024xbf16>
    %cst_33 = arith.constant dense<0.000000e+00> : vector<8x1024xf32>
    %56 = tpu.matmul %54, %55, %cst_33 {dimension_numbers = #tpu.dot_dimension_numbers<[1], [0], [0], [1], [0, 0, 1, 1], [], []>} : vector<8x128xbf16>, vector<128x1024xbf16>, vector<8x1024xf32> -> vector<8x1024xf32>
    %57 = vector.extract_strided_slice %56 {offsets = [0, 512], sizes = [8, 512], strides = [1, 1]} : vector<8x1024xf32> to vector<8x512xf32>
    %58 = arith.addf %57, %17 : vector<8x512xf32>
    %59 = arith.addf %58, %12 : vector<8x512xf32>
    %60 = vector.extract_strided_slice %59 {offsets = [0, 0], sizes = [8, 128], strides = [1, 1]} : vector<8x512xf32> to vector<8x128xf32>
    %cst_34 = arith.constant 5.000000e-01 : f32
    %61 = vector.broadcast %cst_34 : f32 to vector<8x128xf32>
    %62 = arith.mulf %61, %60 : vector<8x128xf32>
    %63 = math.tanh %62 : vector<8x128xf32>
    %cst_35 = arith.constant 5.000000e-01 : f32
    %64 = vector.broadcast %cst_35 : f32 to vector<8x128xf32>
    %65 = arith.mulf %64, %63 : vector<8x128xf32>
    %cst_36 = arith.constant 5.000000e-01 : f32
    %66 = vector.broadcast %cst_36 : f32 to vector<8x128xf32>
    %67 = arith.addf %65, %66 : vector<8x128xf32>
    %68 = vector.extract_strided_slice %59 {offsets = [0, 128], sizes = [8, 128], strides = [1, 1]} : vector<8x512xf32> to vector<8x128xf32>
    %cst_37 = arith.constant 5.000000e-01 : f32
    %69 = vector.broadcast %cst_37 : f32 to vector<8x128xf32>
    %70 = arith.mulf %69, %68 : vector<8x128xf32>
    %71 = math.tanh %70 : vector<8x128xf32>
    %cst_38 = arith.constant 5.000000e-01 : f32
    %72 = vector.broadcast %cst_38 : f32 to vector<8x128xf32>
    %73 = arith.mulf %72, %71 : vector<8x128xf32>
    %cst_39 = arith.constant 5.000000e-01 : f32
    %74 = vector.broadcast %cst_39 : f32 to vector<8x128xf32>
    %75 = arith.addf %73, %74 : vector<8x128xf32>
    %76 = vector.extract_strided_slice %59 {offsets = [0, 256], sizes = [8, 128], strides = [1, 1]} : vector<8x512xf32> to vector<8x128xf32>
    %77 = math.tanh %76 : vector<8x128xf32>
    %78 = vector.extract_strided_slice %59 {offsets = [0, 384], sizes = [8, 128], strides = [1, 1]} : vector<8x512xf32> to vector<8x128xf32>
    %cst_40 = arith.constant 5.000000e-01 : f32
    %79 = vector.broadcast %cst_40 : f32 to vector<8x128xf32>
    %80 = arith.mulf %79, %78 : vector<8x128xf32>
    %81 = math.tanh %80 : vector<8x128xf32>
    %cst_41 = arith.constant 5.000000e-01 : f32
    %82 = vector.broadcast %cst_41 : f32 to vector<8x128xf32>
    %83 = arith.mulf %82, %81 : vector<8x128xf32>
    %cst_42 = arith.constant 5.000000e-01 : f32
    %84 = vector.broadcast %cst_42 : f32 to vector<8x128xf32>
    %85 = arith.addf %83, %84 : vector<8x128xf32>
    %86 = arith.mulf %75, %16 : vector<8x128xf32>
    %87 = arith.mulf %67, %77 : vector<8x128xf32>
    %88 = arith.addf %86, %87 : vector<8x128xf32>
    %89 = math.tanh %88 : vector<8x128xf32>
    %90 = arith.mulf %85, %89 : vector<8x128xf32>
    %91 = arith.truncf %90 : vector<8x128xf32> to vector<8x128xbf16>
    %c0_43 = arith.constant 0 : index
    %c0_44 = arith.constant 0 : index
    %92 = vector.load %arg5[%c0_43, %c0_44] : memref<128x512xbf16, #tpu.memory_space<vmem>>, vector<128x512xbf16>
    %cst_45 = arith.constant dense<0.000000e+00> : vector<8x512xf32>
    %93 = tpu.matmul %91, %92, %cst_45 {dimension_numbers = #tpu.dot_dimension_numbers<[1], [0], [0], [1], [0, 0, 1, 1], [], []>} : vector<8x128xbf16>, vector<128x512xbf16>, vector<8x512xf32> -> vector<8x512xf32>
    %94 = vector.extract_strided_slice %56 {offsets = [0, 0], sizes = [8, 512], strides = [1, 1]} : vector<8x1024xf32> to vector<8x512xf32>
    %c1_i32 = arith.constant 1 : i32
    %c8_i32_46 = arith.constant 8 : i32
    %95 = arith.muli %c1_i32, %c8_i32_46 : i32
    %96 = tpu.assume_multiple %95, 8 : i32
    %97 = arith.index_cast %96 : i32 to index
    %c0_47 = arith.constant 0 : index
    %98 = vector.load %arg10[%97, %c0_47] : memref<64x512xf32, #tpu.memory_space<vmem>>, vector<8x512xf32>
    %99 = arith.addf %98, %94 : vector<8x512xf32>
    %100 = vector.extract_strided_slice %99 {offsets = [0, 0], sizes = [8, 128], strides = [1, 1]} : vector<8x512xf32> to vector<8x128xf32>
    %cst_48 = arith.constant 5.000000e-01 : f32
    %101 = vector.broadcast %cst_48 : f32 to vector<8x128xf32>
    %102 = arith.mulf %101, %100 : vector<8x128xf32>
    %103 = math.tanh %102 : vector<8x128xf32>
    %cst_49 = arith.constant 5.000000e-01 : f32
    %104 = vector.broadcast %cst_49 : f32 to vector<8x128xf32>
    %105 = arith.mulf %104, %103 : vector<8x128xf32>
    %cst_50 = arith.constant 5.000000e-01 : f32
    %106 = vector.broadcast %cst_50 : f32 to vector<8x128xf32>
    %107 = arith.addf %105, %106 : vector<8x128xf32>
    %108 = vector.extract_strided_slice %99 {offsets = [0, 128], sizes = [8, 128], strides = [1, 1]} : vector<8x512xf32> to vector<8x128xf32>
    %cst_51 = arith.constant 5.000000e-01 : f32
    %109 = vector.broadcast %cst_51 : f32 to vector<8x128xf32>
    %110 = arith.mulf %109, %108 : vector<8x128xf32>
    %111 = math.tanh %110 : vector<8x128xf32>
    %cst_52 = arith.constant 5.000000e-01 : f32
    %112 = vector.broadcast %cst_52 : f32 to vector<8x128xf32>
    %113 = arith.mulf %112, %111 : vector<8x128xf32>
    %cst_53 = arith.constant 5.000000e-01 : f32
    %114 = vector.broadcast %cst_53 : f32 to vector<8x128xf32>
    %115 = arith.addf %113, %114 : vector<8x128xf32>
    %116 = vector.extract_strided_slice %99 {offsets = [0, 256], sizes = [8, 128], strides = [1, 1]} : vector<8x512xf32> to vector<8x128xf32>
    %117 = math.tanh %116 : vector<8x128xf32>
    %118 = vector.extract_strided_slice %99 {offsets = [0, 384], sizes = [8, 128], strides = [1, 1]} : vector<8x512xf32> to vector<8x128xf32>
    %cst_54 = arith.constant 5.000000e-01 : f32
    %119 = vector.broadcast %cst_54 : f32 to vector<8x128xf32>
    %120 = arith.mulf %119, %118 : vector<8x128xf32>
    %121 = math.tanh %120 : vector<8x128xf32>
    %cst_55 = arith.constant 5.000000e-01 : f32
    %122 = vector.broadcast %cst_55 : f32 to vector<8x128xf32>
    %123 = arith.mulf %122, %121 : vector<8x128xf32>
    %cst_56 = arith.constant 5.000000e-01 : f32
    %124 = vector.broadcast %cst_56 : f32 to vector<8x128xf32>
    %125 = arith.addf %123, %124 : vector<8x128xf32>
    %126 = arith.mulf %115, %51 : vector<8x128xf32>
    %127 = arith.mulf %107, %117 : vector<8x128xf32>
    %128 = arith.addf %126, %127 : vector<8x128xf32>
    %129 = math.tanh %128 : vector<8x128xf32>
    %130 = arith.mulf %125, %129 : vector<8x128xf32>
    %131 = arith.truncf %130 : vector<8x128xf32> to vector<8x128xbf16>
    %c0_57 = arith.constant 0 : index
    %c0_58 = arith.constant 0 : index
    %132 = vector.load %arg4[%c0_57, %c0_58] : memref<128x1024xbf16, #tpu.memory_space<vmem>>, vector<128x1024xbf16>
    %cst_59 = arith.constant dense<0.000000e+00> : vector<8x1024xf32>
    %133 = tpu.matmul %131, %132, %cst_59 {dimension_numbers = #tpu.dot_dimension_numbers<[1], [0], [0], [1], [0, 0, 1, 1], [], []>} : vector<8x128xbf16>, vector<128x1024xbf16>, vector<8x1024xf32> -> vector<8x1024xf32>
    %134 = vector.extract_strided_slice %133 {offsets = [0, 512], sizes = [8, 512], strides = [1, 1]} : vector<8x1024xf32> to vector<8x512xf32>
    %135 = arith.addf %134, %93 : vector<8x512xf32>
    %136 = arith.addf %135, %12 : vector<8x512xf32>
    %137 = vector.extract_strided_slice %136 {offsets = [0, 0], sizes = [8, 128], strides = [1, 1]} : vector<8x512xf32> to vector<8x128xf32>
    %cst_60 = arith.constant 5.000000e-01 : f32
    %138 = vector.broadcast %cst_60 : f32 to vector<8x128xf32>
    %139 = arith.mulf %138, %137 : vector<8x128xf32>
    %140 = math.tanh %139 : vector<8x128xf32>
    %cst_61 = arith.constant 5.000000e-01 : f32
    %141 = vector.broadcast %cst_61 : f32 to vector<8x128xf32>
    %142 = arith.mulf %141, %140 : vector<8x128xf32>
    %cst_62 = arith.constant 5.000000e-01 : f32
    %143 = vector.broadcast %cst_62 : f32 to vector<8x128xf32>
    %144 = arith.addf %142, %143 : vector<8x128xf32>
    %145 = vector.extract_strided_slice %136 {offsets = [0, 128], sizes = [8, 128], strides = [1, 1]} : vector<8x512xf32> to vector<8x128xf32>
    %cst_63 = arith.constant 5.000000e-01 : f32
    %146 = vector.broadcast %cst_63 : f32 to vector<8x128xf32>
    %147 = arith.mulf %146, %145 : vector<8x128xf32>
    %148 = math.tanh %147 : vector<8x128xf32>
    %cst_64 = arith.constant 5.000000e-01 : f32
    %149 = vector.broadcast %cst_64 : f32 to vector<8x128xf32>
    %150 = arith.mulf %149, %148 : vector<8x128xf32>
    %cst_65 = arith.constant 5.000000e-01 : f32
    %151 = vector.broadcast %cst_65 : f32 to vector<8x128xf32>
    %152 = arith.addf %150, %151 : vector<8x128xf32>
    %153 = vector.extract_strided_slice %136 {offsets = [0, 256], sizes = [8, 128], strides = [1, 1]} : vector<8x512xf32> to vector<8x128xf32>
    %154 = math.tanh %153 : vector<8x128xf32>
    %155 = vector.extract_strided_slice %136 {offsets = [0, 384], sizes = [8, 128], strides = [1, 1]} : vector<8x512xf32> to vector<8x128xf32>
    %cst_66 = arith.constant 5.000000e-01 : f32
    %156 = vector.broadcast %cst_66 : f32 to vector<8x128xf32>
    %157 = arith.mulf %156, %155 : vector<8x128xf32>
    %158 = math.tanh %157 : vector<8x128xf32>
    %cst_67 = arith.constant 5.000000e-01 : f32
    %159 = vector.broadcast %cst_67 : f32 to vector<8x128xf32>
    %160 = arith.mulf %159, %158 : vector<8x128xf32>
    %cst_68 = arith.constant 5.000000e-01 : f32
    %161 = vector.broadcast %cst_68 : f32 to vector<8x128xf32>
    %162 = arith.addf %160, %161 : vector<8x128xf32>
    %163 = arith.mulf %152, %88 : vector<8x128xf32>
    %164 = arith.mulf %144, %154 : vector<8x128xf32>
    %165 = arith.addf %163, %164 : vector<8x128xf32>
    %166 = math.tanh %165 : vector<8x128xf32>
    %167 = arith.mulf %162, %166 : vector<8x128xf32>
    %168 = arith.truncf %167 : vector<8x128xf32> to vector<8x128xbf16>
    %c0_69 = arith.constant 0 : index
    %c0_70 = arith.constant 0 : index
    %169 = vector.load %arg5[%c0_69, %c0_70] : memref<128x512xbf16, #tpu.memory_space<vmem>>, vector<128x512xbf16>
    %cst_71 = arith.constant dense<0.000000e+00> : vector<8x512xf32>
    %170 = tpu.matmul %168, %169, %cst_71 {dimension_numbers = #tpu.dot_dimension_numbers<[1], [0], [0], [1], [0, 0, 1, 1], [], []>} : vector<8x128xbf16>, vector<128x512xbf16>, vector<8x512xf32> -> vector<8x512xf32>
    %171 = vector.extract_strided_slice %133 {offsets = [0, 0], sizes = [8, 512], strides = [1, 1]} : vector<8x1024xf32> to vector<8x512xf32>
    %c2_i32 = arith.constant 2 : i32
    %c8_i32_72 = arith.constant 8 : i32
    %172 = arith.muli %c2_i32, %c8_i32_72 : i32
    %173 = tpu.assume_multiple %172, 8 : i32
    %174 = arith.index_cast %173 : i32 to index
    %c0_73 = arith.constant 0 : index
    %175 = vector.load %arg10[%174, %c0_73] : memref<64x512xf32, #tpu.memory_space<vmem>>, vector<8x512xf32>
    %176 = arith.addf %175, %171 : vector<8x512xf32>
    %177 = vector.extract_strided_slice %176 {offsets = [0, 0], sizes = [8, 128], strides = [1, 1]} : vector<8x512xf32> to vector<8x128xf32>
    %cst_74 = arith.constant 5.000000e-01 : f32
    %178 = vector.broadcast %cst_74 : f32 to vector<8x128xf32>
    %179 = arith.mulf %178, %177 : vector<8x128xf32>
    %180 = math.tanh %179 : vector<8x128xf32>
    %cst_75 = arith.constant 5.000000e-01 : f32
    %181 = vector.broadcast %cst_75 : f32 to vector<8x128xf32>
    %182 = arith.mulf %181, %180 : vector<8x128xf32>
    %cst_76 = arith.constant 5.000000e-01 : f32
    %183 = vector.broadcast %cst_76 : f32 to vector<8x128xf32>
    %184 = arith.addf %182, %183 : vector<8x128xf32>
    %185 = vector.extract_strided_slice %176 {offsets = [0, 128], sizes = [8, 128], strides = [1, 1]} : vector<8x512xf32> to vector<8x128xf32>
    %cst_77 = arith.constant 5.000000e-01 : f32
    %186 = vector.broadcast %cst_77 : f32 to vector<8x128xf32>
    %187 = arith.mulf %186, %185 : vector<8x128xf32>
    %188 = math.tanh %187 : vector<8x128xf32>
    %cst_78 = arith.constant 5.000000e-01 : f32
    %189 = vector.broadcast %cst_78 : f32 to vector<8x128xf32>
    %190 = arith.mulf %189, %188 : vector<8x128xf32>
    %cst_79 = arith.constant 5.000000e-01 : f32
    %191 = vector.broadcast %cst_79 : f32 to vector<8x128xf32>
    %192 = arith.addf %190, %191 : vector<8x128xf32>
    %193 = vector.extract_strided_slice %176 {offsets = [0, 256], sizes = [8, 128], strides = [1, 1]} : vector<8x512xf32> to vector<8x128xf32>
    %194 = math.tanh %193 : vector<8x128xf32>
    %195 = vector.extract_strided_slice %176 {offsets = [0, 384], sizes = [8, 128], strides = [1, 1]} : vector<8x512xf32> to vector<8x128xf32>
    %cst_80 = arith.constant 5.000000e-01 : f32
    %196 = vector.broadcast %cst_80 : f32 to vector<8x128xf32>
    %197 = arith.mulf %196, %195 : vector<8x128xf32>
    %198 = math.tanh %197 : vector<8x128xf32>
    %cst_81 = arith.constant 5.000000e-01 : f32
    %199 = vector.broadcast %cst_81 : f32 to vector<8x128xf32>
    %200 = arith.mulf %199, %198 : vector<8x128xf32>
    %cst_82 = arith.constant 5.000000e-01 : f32
    %201 = vector.broadcast %cst_82 : f32 to vector<8x128xf32>
    %202 = arith.addf %200, %201 : vector<8x128xf32>
    %203 = arith.mulf %192, %128 : vector<8x128xf32>
    %204 = arith.mulf %184, %194 : vector<8x128xf32>
    %205 = arith.addf %203, %204 : vector<8x128xf32>
    %206 = math.tanh %205 : vector<8x128xf32>
    %207 = arith.mulf %202, %206 : vector<8x128xf32>
    %208 = arith.truncf %207 : vector<8x128xf32> to vector<8x128xbf16>
    %c0_83 = arith.constant 0 : index
    %c0_84 = arith.constant 0 : index
    %209 = vector.load %arg4[%c0_83, %c0_84] : memref<128x1024xbf16, #tpu.memory_space<vmem>>, vector<128x1024xbf16>
    %cst_85 = arith.constant dense<0.000000e+00> : vector<8x1024xf32>
    %210 = tpu.matmul %208, %209, %cst_85 {dimension_numbers = #tpu.dot_dimension_numbers<[1], [0], [0], [1], [0, 0, 1, 1], [], []>} : vector<8x128xbf16>, vector<128x1024xbf16>, vector<8x1024xf32> -> vector<8x1024xf32>
    %211 = vector.extract_strided_slice %210 {offsets = [0, 512], sizes = [8, 512], strides = [1, 1]} : vector<8x1024xf32> to vector<8x512xf32>
    %212 = arith.addf %211, %170 : vector<8x512xf32>
    %213 = arith.addf %212, %12 : vector<8x512xf32>
    %214 = vector.extract_strided_slice %213 {offsets = [0, 0], sizes = [8, 128], strides = [1, 1]} : vector<8x512xf32> to vector<8x128xf32>
    %cst_86 = arith.constant 5.000000e-01 : f32
    %215 = vector.broadcast %cst_86 : f32 to vector<8x128xf32>
    %216 = arith.mulf %215, %214 : vector<8x128xf32>
    %217 = math.tanh %216 : vector<8x128xf32>
    %cst_87 = arith.constant 5.000000e-01 : f32
    %218 = vector.broadcast %cst_87 : f32 to vector<8x128xf32>
    %219 = arith.mulf %218, %217 : vector<8x128xf32>
    %cst_88 = arith.constant 5.000000e-01 : f32
    %220 = vector.broadcast %cst_88 : f32 to vector<8x128xf32>
    %221 = arith.addf %219, %220 : vector<8x128xf32>
    %222 = vector.extract_strided_slice %213 {offsets = [0, 128], sizes = [8, 128], strides = [1, 1]} : vector<8x512xf32> to vector<8x128xf32>
    %cst_89 = arith.constant 5.000000e-01 : f32
    %223 = vector.broadcast %cst_89 : f32 to vector<8x128xf32>
    %224 = arith.mulf %223, %222 : vector<8x128xf32>
    %225 = math.tanh %224 : vector<8x128xf32>
    %cst_90 = arith.constant 5.000000e-01 : f32
    %226 = vector.broadcast %cst_90 : f32 to vector<8x128xf32>
    %227 = arith.mulf %226, %225 : vector<8x128xf32>
    %cst_91 = arith.constant 5.000000e-01 : f32
    %228 = vector.broadcast %cst_91 : f32 to vector<8x128xf32>
    %229 = arith.addf %227, %228 : vector<8x128xf32>
    %230 = vector.extract_strided_slice %213 {offsets = [0, 256], sizes = [8, 128], strides = [1, 1]} : vector<8x512xf32> to vector<8x128xf32>
    %231 = math.tanh %230 : vector<8x128xf32>
    %232 = vector.extract_strided_slice %213 {offsets = [0, 384], sizes = [8, 128], strides = [1, 1]} : vector<8x512xf32> to vector<8x128xf32>
    %cst_92 = arith.constant 5.000000e-01 : f32
    %233 = vector.broadcast %cst_92 : f32 to vector<8x128xf32>
    %234 = arith.mulf %233, %232 : vector<8x128xf32>
    %235 = math.tanh %234 : vector<8x128xf32>
    %cst_93 = arith.constant 5.000000e-01 : f32
    %236 = vector.broadcast %cst_93 : f32 to vector<8x128xf32>
    %237 = arith.mulf %236, %235 : vector<8x128xf32>
    %cst_94 = arith.constant 5.000000e-01 : f32
    %238 = vector.broadcast %cst_94 : f32 to vector<8x128xf32>
    %239 = arith.addf %237, %238 : vector<8x128xf32>
    %240 = arith.mulf %229, %165 : vector<8x128xf32>
    %241 = arith.mulf %221, %231 : vector<8x128xf32>
    %242 = arith.addf %240, %241 : vector<8x128xf32>
    %243 = math.tanh %242 : vector<8x128xf32>
    %244 = arith.mulf %239, %243 : vector<8x128xf32>
    %245 = arith.truncf %244 : vector<8x128xf32> to vector<8x128xbf16>
    %c0_95 = arith.constant 0 : index
    %c0_96 = arith.constant 0 : index
    %246 = vector.load %arg5[%c0_95, %c0_96] : memref<128x512xbf16, #tpu.memory_space<vmem>>, vector<128x512xbf16>
    %cst_97 = arith.constant dense<0.000000e+00> : vector<8x512xf32>
    %247 = tpu.matmul %245, %246, %cst_97 {dimension_numbers = #tpu.dot_dimension_numbers<[1], [0], [0], [1], [0, 0, 1, 1], [], []>} : vector<8x128xbf16>, vector<128x512xbf16>, vector<8x512xf32> -> vector<8x512xf32>
    %248 = vector.extract_strided_slice %210 {offsets = [0, 0], sizes = [8, 512], strides = [1, 1]} : vector<8x1024xf32> to vector<8x512xf32>
    %c3_i32 = arith.constant 3 : i32
    %c8_i32_98 = arith.constant 8 : i32
    %249 = arith.muli %c3_i32, %c8_i32_98 : i32
    %250 = tpu.assume_multiple %249, 8 : i32
    %251 = arith.index_cast %250 : i32 to index
    %c0_99 = arith.constant 0 : index
    %252 = vector.load %arg10[%251, %c0_99] : memref<64x512xf32, #tpu.memory_space<vmem>>, vector<8x512xf32>
    %253 = arith.addf %252, %248 : vector<8x512xf32>
    %254 = vector.extract_strided_slice %253 {offsets = [0, 0], sizes = [8, 128], strides = [1, 1]} : vector<8x512xf32> to vector<8x128xf32>
    %cst_100 = arith.constant 5.000000e-01 : f32
    %255 = vector.broadcast %cst_100 : f32 to vector<8x128xf32>
    %256 = arith.mulf %255, %254 : vector<8x128xf32>
    %257 = math.tanh %256 : vector<8x128xf32>
    %cst_101 = arith.constant 5.000000e-01 : f32
    %258 = vector.broadcast %cst_101 : f32 to vector<8x128xf32>
    %259 = arith.mulf %258, %257 : vector<8x128xf32>
    %cst_102 = arith.constant 5.000000e-01 : f32
    %260 = vector.broadcast %cst_102 : f32 to vector<8x128xf32>
    %261 = arith.addf %259, %260 : vector<8x128xf32>
    %262 = vector.extract_strided_slice %253 {offsets = [0, 128], sizes = [8, 128], strides = [1, 1]} : vector<8x512xf32> to vector<8x128xf32>
    %cst_103 = arith.constant 5.000000e-01 : f32
    %263 = vector.broadcast %cst_103 : f32 to vector<8x128xf32>
    %264 = arith.mulf %263, %262 : vector<8x128xf32>
    %265 = math.tanh %264 : vector<8x128xf32>
    %cst_104 = arith.constant 5.000000e-01 : f32
    %266 = vector.broadcast %cst_104 : f32 to vector<8x128xf32>
    %267 = arith.mulf %266, %265 : vector<8x128xf32>
    %cst_105 = arith.constant 5.000000e-01 : f32
    %268 = vector.broadcast %cst_105 : f32 to vector<8x128xf32>
    %269 = arith.addf %267, %268 : vector<8x128xf32>
    %270 = vector.extract_strided_slice %253 {offsets = [0, 256], sizes = [8, 128], strides = [1, 1]} : vector<8x512xf32> to vector<8x128xf32>
    %271 = math.tanh %270 : vector<8x128xf32>
    %272 = vector.extract_strided_slice %253 {offsets = [0, 384], sizes = [8, 128], strides = [1, 1]} : vector<8x512xf32> to vector<8x128xf32>
    %cst_106 = arith.constant 5.000000e-01 : f32
    %273 = vector.broadcast %cst_106 : f32 to vector<8x128xf32>
    %274 = arith.mulf %273, %272 : vector<8x128xf32>
    %275 = math.tanh %274 : vector<8x128xf32>
    %cst_107 = arith.constant 5.000000e-01 : f32
    %276 = vector.broadcast %cst_107 : f32 to vector<8x128xf32>
    %277 = arith.mulf %276, %275 : vector<8x128xf32>
    %cst_108 = arith.constant 5.000000e-01 : f32
    %278 = vector.broadcast %cst_108 : f32 to vector<8x128xf32>
    %279 = arith.addf %277, %278 : vector<8x128xf32>
    %280 = arith.mulf %269, %205 : vector<8x128xf32>
    %281 = arith.mulf %261, %271 : vector<8x128xf32>
    %282 = arith.addf %280, %281 : vector<8x128xf32>
    %283 = math.tanh %282 : vector<8x128xf32>
    %284 = arith.mulf %279, %283 : vector<8x128xf32>
    %285 = arith.truncf %284 : vector<8x128xf32> to vector<8x128xbf16>
    %c0_109 = arith.constant 0 : index
    %c0_110 = arith.constant 0 : index
    %286 = vector.load %arg4[%c0_109, %c0_110] : memref<128x1024xbf16, #tpu.memory_space<vmem>>, vector<128x1024xbf16>
    %cst_111 = arith.constant dense<0.000000e+00> : vector<8x1024xf32>
    %287 = tpu.matmul %285, %286, %cst_111 {dimension_numbers = #tpu.dot_dimension_numbers<[1], [0], [0], [1], [0, 0, 1, 1], [], []>} : vector<8x128xbf16>, vector<128x1024xbf16>, vector<8x1024xf32> -> vector<8x1024xf32>
    %288 = vector.extract_strided_slice %287 {offsets = [0, 512], sizes = [8, 512], strides = [1, 1]} : vector<8x1024xf32> to vector<8x512xf32>
    %289 = arith.addf %288, %247 : vector<8x512xf32>
    %290 = arith.addf %289, %12 : vector<8x512xf32>
    %291 = vector.extract_strided_slice %290 {offsets = [0, 0], sizes = [8, 128], strides = [1, 1]} : vector<8x512xf32> to vector<8x128xf32>
    %cst_112 = arith.constant 5.000000e-01 : f32
    %292 = vector.broadcast %cst_112 : f32 to vector<8x128xf32>
    %293 = arith.mulf %292, %291 : vector<8x128xf32>
    %294 = math.tanh %293 : vector<8x128xf32>
    %cst_113 = arith.constant 5.000000e-01 : f32
    %295 = vector.broadcast %cst_113 : f32 to vector<8x128xf32>
    %296 = arith.mulf %295, %294 : vector<8x128xf32>
    %cst_114 = arith.constant 5.000000e-01 : f32
    %297 = vector.broadcast %cst_114 : f32 to vector<8x128xf32>
    %298 = arith.addf %296, %297 : vector<8x128xf32>
    %299 = vector.extract_strided_slice %290 {offsets = [0, 128], sizes = [8, 128], strides = [1, 1]} : vector<8x512xf32> to vector<8x128xf32>
    %cst_115 = arith.constant 5.000000e-01 : f32
    %300 = vector.broadcast %cst_115 : f32 to vector<8x128xf32>
    %301 = arith.mulf %300, %299 : vector<8x128xf32>
    %302 = math.tanh %301 : vector<8x128xf32>
    %cst_116 = arith.constant 5.000000e-01 : f32
    %303 = vector.broadcast %cst_116 : f32 to vector<8x128xf32>
    %304 = arith.mulf %303, %302 : vector<8x128xf32>
    %cst_117 = arith.constant 5.000000e-01 : f32
    %305 = vector.broadcast %cst_117 : f32 to vector<8x128xf32>
    %306 = arith.addf %304, %305 : vector<8x128xf32>
    %307 = vector.extract_strided_slice %290 {offsets = [0, 256], sizes = [8, 128], strides = [1, 1]} : vector<8x512xf32> to vector<8x128xf32>
    %308 = math.tanh %307 : vector<8x128xf32>
    %309 = vector.extract_strided_slice %290 {offsets = [0, 384], sizes = [8, 128], strides = [1, 1]} : vector<8x512xf32> to vector<8x128xf32>
    %cst_118 = arith.constant 5.000000e-01 : f32
    %310 = vector.broadcast %cst_118 : f32 to vector<8x128xf32>
    %311 = arith.mulf %310, %309 : vector<8x128xf32>
    %312 = math.tanh %311 : vector<8x128xf32>
    %cst_119 = arith.constant 5.000000e-01 : f32
    %313 = vector.broadcast %cst_119 : f32 to vector<8x128xf32>
    %314 = arith.mulf %313, %312 : vector<8x128xf32>
    %cst_120 = arith.constant 5.000000e-01 : f32
    %315 = vector.broadcast %cst_120 : f32 to vector<8x128xf32>
    %316 = arith.addf %314, %315 : vector<8x128xf32>
    %317 = arith.mulf %306, %242 : vector<8x128xf32>
    %318 = arith.mulf %298, %308 : vector<8x128xf32>
    %319 = arith.addf %317, %318 : vector<8x128xf32>
    %320 = math.tanh %319 : vector<8x128xf32>
    %321 = arith.mulf %316, %320 : vector<8x128xf32>
    %322 = arith.truncf %321 : vector<8x128xf32> to vector<8x128xbf16>
    %c0_121 = arith.constant 0 : index
    %c0_122 = arith.constant 0 : index
    %323 = vector.load %arg5[%c0_121, %c0_122] : memref<128x512xbf16, #tpu.memory_space<vmem>>, vector<128x512xbf16>
    %cst_123 = arith.constant dense<0.000000e+00> : vector<8x512xf32>
    %324 = tpu.matmul %322, %323, %cst_123 {dimension_numbers = #tpu.dot_dimension_numbers<[1], [0], [0], [1], [0, 0, 1, 1], [], []>} : vector<8x128xbf16>, vector<128x512xbf16>, vector<8x512xf32> -> vector<8x512xf32>
    %325 = vector.extract_strided_slice %287 {offsets = [0, 0], sizes = [8, 512], strides = [1, 1]} : vector<8x1024xf32> to vector<8x512xf32>
    %c4_i32 = arith.constant 4 : i32
    %c8_i32_124 = arith.constant 8 : i32
    %326 = arith.muli %c4_i32, %c8_i32_124 : i32
    %327 = tpu.assume_multiple %326, 8 : i32
    %328 = arith.index_cast %327 : i32 to index
    %c0_125 = arith.constant 0 : index
    %329 = vector.load %arg10[%328, %c0_125] : memref<64x512xf32, #tpu.memory_space<vmem>>, vector<8x512xf32>
    %330 = arith.addf %329, %325 : vector<8x512xf32>
    %331 = vector.extract_strided_slice %330 {offsets = [0, 0], sizes = [8, 128], strides = [1, 1]} : vector<8x512xf32> to vector<8x128xf32>
    %cst_126 = arith.constant 5.000000e-01 : f32
    %332 = vector.broadcast %cst_126 : f32 to vector<8x128xf32>
    %333 = arith.mulf %332, %331 : vector<8x128xf32>
    %334 = math.tanh %333 : vector<8x128xf32>
    %cst_127 = arith.constant 5.000000e-01 : f32
    %335 = vector.broadcast %cst_127 : f32 to vector<8x128xf32>
    %336 = arith.mulf %335, %334 : vector<8x128xf32>
    %cst_128 = arith.constant 5.000000e-01 : f32
    %337 = vector.broadcast %cst_128 : f32 to vector<8x128xf32>
    %338 = arith.addf %336, %337 : vector<8x128xf32>
    %339 = vector.extract_strided_slice %330 {offsets = [0, 128], sizes = [8, 128], strides = [1, 1]} : vector<8x512xf32> to vector<8x128xf32>
    %cst_129 = arith.constant 5.000000e-01 : f32
    %340 = vector.broadcast %cst_129 : f32 to vector<8x128xf32>
    %341 = arith.mulf %340, %339 : vector<8x128xf32>
    %342 = math.tanh %341 : vector<8x128xf32>
    %cst_130 = arith.constant 5.000000e-01 : f32
    %343 = vector.broadcast %cst_130 : f32 to vector<8x128xf32>
    %344 = arith.mulf %343, %342 : vector<8x128xf32>
    %cst_131 = arith.constant 5.000000e-01 : f32
    %345 = vector.broadcast %cst_131 : f32 to vector<8x128xf32>
    %346 = arith.addf %344, %345 : vector<8x128xf32>
    %347 = vector.extract_strided_slice %330 {offsets = [0, 256], sizes = [8, 128], strides = [1, 1]} : vector<8x512xf32> to vector<8x128xf32>
    %348 = math.tanh %347 : vector<8x128xf32>
    %349 = vector.extract_strided_slice %330 {offsets = [0, 384], sizes = [8, 128], strides = [1, 1]} : vector<8x512xf32> to vector<8x128xf32>
    %cst_132 = arith.constant 5.000000e-01 : f32
    %350 = vector.broadcast %cst_132 : f32 to vector<8x128xf32>
    %351 = arith.mulf %350, %349 : vector<8x128xf32>
    %352 = math.tanh %351 : vector<8x128xf32>
    %cst_133 = arith.constant 5.000000e-01 : f32
    %353 = vector.broadcast %cst_133 : f32 to vector<8x128xf32>
    %354 = arith.mulf %353, %352 : vector<8x128xf32>
    %cst_134 = arith.constant 5.000000e-01 : f32
    %355 = vector.broadcast %cst_134 : f32 to vector<8x128xf32>
    %356 = arith.addf %354, %355 : vector<8x128xf32>
    %357 = arith.mulf %346, %282 : vector<8x128xf32>
    %358 = arith.mulf %338, %348 : vector<8x128xf32>
    %359 = arith.addf %357, %358 : vector<8x128xf32>
    %360 = math.tanh %359 : vector<8x128xf32>
    %361 = arith.mulf %356, %360 : vector<8x128xf32>
    %362 = arith.truncf %361 : vector<8x128xf32> to vector<8x128xbf16>
    %c0_135 = arith.constant 0 : index
    %c0_136 = arith.constant 0 : index
    %363 = vector.load %arg4[%c0_135, %c0_136] : memref<128x1024xbf16, #tpu.memory_space<vmem>>, vector<128x1024xbf16>
    %cst_137 = arith.constant dense<0.000000e+00> : vector<8x1024xf32>
    %364 = tpu.matmul %362, %363, %cst_137 {dimension_numbers = #tpu.dot_dimension_numbers<[1], [0], [0], [1], [0, 0, 1, 1], [], []>} : vector<8x128xbf16>, vector<128x1024xbf16>, vector<8x1024xf32> -> vector<8x1024xf32>
    %365 = vector.extract_strided_slice %364 {offsets = [0, 512], sizes = [8, 512], strides = [1, 1]} : vector<8x1024xf32> to vector<8x512xf32>
    %366 = arith.addf %365, %324 : vector<8x512xf32>
    %367 = arith.addf %366, %12 : vector<8x512xf32>
    %368 = vector.extract_strided_slice %367 {offsets = [0, 0], sizes = [8, 128], strides = [1, 1]} : vector<8x512xf32> to vector<8x128xf32>
    %cst_138 = arith.constant 5.000000e-01 : f32
    %369 = vector.broadcast %cst_138 : f32 to vector<8x128xf32>
    %370 = arith.mulf %369, %368 : vector<8x128xf32>
    %371 = math.tanh %370 : vector<8x128xf32>
    %cst_139 = arith.constant 5.000000e-01 : f32
    %372 = vector.broadcast %cst_139 : f32 to vector<8x128xf32>
    %373 = arith.mulf %372, %371 : vector<8x128xf32>
    %cst_140 = arith.constant 5.000000e-01 : f32
    %374 = vector.broadcast %cst_140 : f32 to vector<8x128xf32>
    %375 = arith.addf %373, %374 : vector<8x128xf32>
    %376 = vector.extract_strided_slice %367 {offsets = [0, 128], sizes = [8, 128], strides = [1, 1]} : vector<8x512xf32> to vector<8x128xf32>
    %cst_141 = arith.constant 5.000000e-01 : f32
    %377 = vector.broadcast %cst_141 : f32 to vector<8x128xf32>
    %378 = arith.mulf %377, %376 : vector<8x128xf32>
    %379 = math.tanh %378 : vector<8x128xf32>
    %cst_142 = arith.constant 5.000000e-01 : f32
    %380 = vector.broadcast %cst_142 : f32 to vector<8x128xf32>
    %381 = arith.mulf %380, %379 : vector<8x128xf32>
    %cst_143 = arith.constant 5.000000e-01 : f32
    %382 = vector.broadcast %cst_143 : f32 to vector<8x128xf32>
    %383 = arith.addf %381, %382 : vector<8x128xf32>
    %384 = vector.extract_strided_slice %367 {offsets = [0, 256], sizes = [8, 128], strides = [1, 1]} : vector<8x512xf32> to vector<8x128xf32>
    %385 = math.tanh %384 : vector<8x128xf32>
    %386 = vector.extract_strided_slice %367 {offsets = [0, 384], sizes = [8, 128], strides = [1, 1]} : vector<8x512xf32> to vector<8x128xf32>
    %cst_144 = arith.constant 5.000000e-01 : f32
    %387 = vector.broadcast %cst_144 : f32 to vector<8x128xf32>
    %388 = arith.mulf %387, %386 : vector<8x128xf32>
    %389 = math.tanh %388 : vector<8x128xf32>
    %cst_145 = arith.constant 5.000000e-01 : f32
    %390 = vector.broadcast %cst_145 : f32 to vector<8x128xf32>
    %391 = arith.mulf %390, %389 : vector<8x128xf32>
    %cst_146 = arith.constant 5.000000e-01 : f32
    %392 = vector.broadcast %cst_146 : f32 to vector<8x128xf32>
    %393 = arith.addf %391, %392 : vector<8x128xf32>
    %394 = arith.mulf %383, %319 : vector<8x128xf32>
    %395 = arith.mulf %375, %385 : vector<8x128xf32>
    %396 = arith.addf %394, %395 : vector<8x128xf32>
    %397 = math.tanh %396 : vector<8x128xf32>
    %398 = arith.mulf %393, %397 : vector<8x128xf32>
    %399 = arith.truncf %398 : vector<8x128xf32> to vector<8x128xbf16>
    %c0_147 = arith.constant 0 : index
    %c0_148 = arith.constant 0 : index
    %400 = vector.load %arg5[%c0_147, %c0_148] : memref<128x512xbf16, #tpu.memory_space<vmem>>, vector<128x512xbf16>
    %cst_149 = arith.constant dense<0.000000e+00> : vector<8x512xf32>
    %401 = tpu.matmul %399, %400, %cst_149 {dimension_numbers = #tpu.dot_dimension_numbers<[1], [0], [0], [1], [0, 0, 1, 1], [], []>} : vector<8x128xbf16>, vector<128x512xbf16>, vector<8x512xf32> -> vector<8x512xf32>
    %402 = vector.extract_strided_slice %364 {offsets = [0, 0], sizes = [8, 512], strides = [1, 1]} : vector<8x1024xf32> to vector<8x512xf32>
    %c5_i32 = arith.constant 5 : i32
    %c8_i32_150 = arith.constant 8 : i32
    %403 = arith.muli %c5_i32, %c8_i32_150 : i32
    %404 = tpu.assume_multiple %403, 8 : i32
    %405 = arith.index_cast %404 : i32 to index
    %c0_151 = arith.constant 0 : index
    %406 = vector.load %arg10[%405, %c0_151] : memref<64x512xf32, #tpu.memory_space<vmem>>, vector<8x512xf32>
    %407 = arith.addf %406, %402 : vector<8x512xf32>
    %408 = vector.extract_strided_slice %407 {offsets = [0, 0], sizes = [8, 128], strides = [1, 1]} : vector<8x512xf32> to vector<8x128xf32>
    %cst_152 = arith.constant 5.000000e-01 : f32
    %409 = vector.broadcast %cst_152 : f32 to vector<8x128xf32>
    %410 = arith.mulf %409, %408 : vector<8x128xf32>
    %411 = math.tanh %410 : vector<8x128xf32>
    %cst_153 = arith.constant 5.000000e-01 : f32
    %412 = vector.broadcast %cst_153 : f32 to vector<8x128xf32>
    %413 = arith.mulf %412, %411 : vector<8x128xf32>
    %cst_154 = arith.constant 5.000000e-01 : f32
    %414 = vector.broadcast %cst_154 : f32 to vector<8x128xf32>
    %415 = arith.addf %413, %414 : vector<8x128xf32>
    %416 = vector.extract_strided_slice %407 {offsets = [0, 128], sizes = [8, 128], strides = [1, 1]} : vector<8x512xf32> to vector<8x128xf32>
    %cst_155 = arith.constant 5.000000e-01 : f32
    %417 = vector.broadcast %cst_155 : f32 to vector<8x128xf32>
    %418 = arith.mulf %417, %416 : vector<8x128xf32>
    %419 = math.tanh %418 : vector<8x128xf32>
    %cst_156 = arith.constant 5.000000e-01 : f32
    %420 = vector.broadcast %cst_156 : f32 to vector<8x128xf32>
    %421 = arith.mulf %420, %419 : vector<8x128xf32>
    %cst_157 = arith.constant 5.000000e-01 : f32
    %422 = vector.broadcast %cst_157 : f32 to vector<8x128xf32>
    %423 = arith.addf %421, %422 : vector<8x128xf32>
    %424 = vector.extract_strided_slice %407 {offsets = [0, 256], sizes = [8, 128], strides = [1, 1]} : vector<8x512xf32> to vector<8x128xf32>
    %425 = math.tanh %424 : vector<8x128xf32>
    %426 = vector.extract_strided_slice %407 {offsets = [0, 384], sizes = [8, 128], strides = [1, 1]} : vector<8x512xf32> to vector<8x128xf32>
    %cst_158 = arith.constant 5.000000e-01 : f32
    %427 = vector.broadcast %cst_158 : f32 to vector<8x128xf32>
    %428 = arith.mulf %427, %426 : vector<8x128xf32>
    %429 = math.tanh %428 : vector<8x128xf32>
    %cst_159 = arith.constant 5.000000e-01 : f32
    %430 = vector.broadcast %cst_159 : f32 to vector<8x128xf32>
    %431 = arith.mulf %430, %429 : vector<8x128xf32>
    %cst_160 = arith.constant 5.000000e-01 : f32
    %432 = vector.broadcast %cst_160 : f32 to vector<8x128xf32>
    %433 = arith.addf %431, %432 : vector<8x128xf32>
    %434 = arith.mulf %423, %359 : vector<8x128xf32>
    %435 = arith.mulf %415, %425 : vector<8x128xf32>
    %436 = arith.addf %434, %435 : vector<8x128xf32>
    %437 = math.tanh %436 : vector<8x128xf32>
    %438 = arith.mulf %433, %437 : vector<8x128xf32>
    %439 = arith.truncf %438 : vector<8x128xf32> to vector<8x128xbf16>
    %c0_161 = arith.constant 0 : index
    %c0_162 = arith.constant 0 : index
    %440 = vector.load %arg4[%c0_161, %c0_162] : memref<128x1024xbf16, #tpu.memory_space<vmem>>, vector<128x1024xbf16>
    %cst_163 = arith.constant dense<0.000000e+00> : vector<8x1024xf32>
    %441 = tpu.matmul %439, %440, %cst_163 {dimension_numbers = #tpu.dot_dimension_numbers<[1], [0], [0], [1], [0, 0, 1, 1], [], []>} : vector<8x128xbf16>, vector<128x1024xbf16>, vector<8x1024xf32> -> vector<8x1024xf32>
    %442 = vector.extract_strided_slice %441 {offsets = [0, 512], sizes = [8, 512], strides = [1, 1]} : vector<8x1024xf32> to vector<8x512xf32>
    %443 = arith.addf %442, %401 : vector<8x512xf32>
    %444 = arith.addf %443, %12 : vector<8x512xf32>
    %445 = vector.extract_strided_slice %444 {offsets = [0, 0], sizes = [8, 128], strides = [1, 1]} : vector<8x512xf32> to vector<8x128xf32>
    %cst_164 = arith.constant 5.000000e-01 : f32
    %446 = vector.broadcast %cst_164 : f32 to vector<8x128xf32>
    %447 = arith.mulf %446, %445 : vector<8x128xf32>
    %448 = math.tanh %447 : vector<8x128xf32>
    %cst_165 = arith.constant 5.000000e-01 : f32
    %449 = vector.broadcast %cst_165 : f32 to vector<8x128xf32>
    %450 = arith.mulf %449, %448 : vector<8x128xf32>
    %cst_166 = arith.constant 5.000000e-01 : f32
    %451 = vector.broadcast %cst_166 : f32 to vector<8x128xf32>
    %452 = arith.addf %450, %451 : vector<8x128xf32>
    %453 = vector.extract_strided_slice %444 {offsets = [0, 128], sizes = [8, 128], strides = [1, 1]} : vector<8x512xf32> to vector<8x128xf32>
    %cst_167 = arith.constant 5.000000e-01 : f32
    %454 = vector.broadcast %cst_167 : f32 to vector<8x128xf32>
    %455 = arith.mulf %454, %453 : vector<8x128xf32>
    %456 = math.tanh %455 : vector<8x128xf32>
    %cst_168 = arith.constant 5.000000e-01 : f32
    %457 = vector.broadcast %cst_168 : f32 to vector<8x128xf32>
    %458 = arith.mulf %457, %456 : vector<8x128xf32>
    %cst_169 = arith.constant 5.000000e-01 : f32
    %459 = vector.broadcast %cst_169 : f32 to vector<8x128xf32>
    %460 = arith.addf %458, %459 : vector<8x128xf32>
    %461 = vector.extract_strided_slice %444 {offsets = [0, 256], sizes = [8, 128], strides = [1, 1]} : vector<8x512xf32> to vector<8x128xf32>
    %462 = math.tanh %461 : vector<8x128xf32>
    %463 = vector.extract_strided_slice %444 {offsets = [0, 384], sizes = [8, 128], strides = [1, 1]} : vector<8x512xf32> to vector<8x128xf32>
    %cst_170 = arith.constant 5.000000e-01 : f32
    %464 = vector.broadcast %cst_170 : f32 to vector<8x128xf32>
    %465 = arith.mulf %464, %463 : vector<8x128xf32>
    %466 = math.tanh %465 : vector<8x128xf32>
    %cst_171 = arith.constant 5.000000e-01 : f32
    %467 = vector.broadcast %cst_171 : f32 to vector<8x128xf32>
    %468 = arith.mulf %467, %466 : vector<8x128xf32>
    %cst_172 = arith.constant 5.000000e-01 : f32
    %469 = vector.broadcast %cst_172 : f32 to vector<8x128xf32>
    %470 = arith.addf %468, %469 : vector<8x128xf32>
    %471 = arith.mulf %460, %396 : vector<8x128xf32>
    %472 = arith.mulf %452, %462 : vector<8x128xf32>
    %473 = arith.addf %471, %472 : vector<8x128xf32>
    %474 = math.tanh %473 : vector<8x128xf32>
    %475 = arith.mulf %470, %474 : vector<8x128xf32>
    %476 = arith.truncf %475 : vector<8x128xf32> to vector<8x128xbf16>
    %c0_173 = arith.constant 0 : index
    %c0_174 = arith.constant 0 : index
    %477 = vector.load %arg5[%c0_173, %c0_174] : memref<128x512xbf16, #tpu.memory_space<vmem>>, vector<128x512xbf16>
    %cst_175 = arith.constant dense<0.000000e+00> : vector<8x512xf32>
    %478 = tpu.matmul %476, %477, %cst_175 {dimension_numbers = #tpu.dot_dimension_numbers<[1], [0], [0], [1], [0, 0, 1, 1], [], []>} : vector<8x128xbf16>, vector<128x512xbf16>, vector<8x512xf32> -> vector<8x512xf32>
    %479 = vector.extract_strided_slice %441 {offsets = [0, 0], sizes = [8, 512], strides = [1, 1]} : vector<8x1024xf32> to vector<8x512xf32>
    %c6_i32 = arith.constant 6 : i32
    %c8_i32_176 = arith.constant 8 : i32
    %480 = arith.muli %c6_i32, %c8_i32_176 : i32
    %481 = tpu.assume_multiple %480, 8 : i32
    %482 = arith.index_cast %481 : i32 to index
    %c0_177 = arith.constant 0 : index
    %483 = vector.load %arg10[%482, %c0_177] : memref<64x512xf32, #tpu.memory_space<vmem>>, vector<8x512xf32>
    %484 = arith.addf %483, %479 : vector<8x512xf32>
    %485 = vector.extract_strided_slice %484 {offsets = [0, 0], sizes = [8, 128], strides = [1, 1]} : vector<8x512xf32> to vector<8x128xf32>
    %cst_178 = arith.constant 5.000000e-01 : f32
    %486 = vector.broadcast %cst_178 : f32 to vector<8x128xf32>
    %487 = arith.mulf %486, %485 : vector<8x128xf32>
    %488 = math.tanh %487 : vector<8x128xf32>
    %cst_179 = arith.constant 5.000000e-01 : f32
    %489 = vector.broadcast %cst_179 : f32 to vector<8x128xf32>
    %490 = arith.mulf %489, %488 : vector<8x128xf32>
    %cst_180 = arith.constant 5.000000e-01 : f32
    %491 = vector.broadcast %cst_180 : f32 to vector<8x128xf32>
    %492 = arith.addf %490, %491 : vector<8x128xf32>
    %493 = vector.extract_strided_slice %484 {offsets = [0, 128], sizes = [8, 128], strides = [1, 1]} : vector<8x512xf32> to vector<8x128xf32>
    %cst_181 = arith.constant 5.000000e-01 : f32
    %494 = vector.broadcast %cst_181 : f32 to vector<8x128xf32>
    %495 = arith.mulf %494, %493 : vector<8x128xf32>
    %496 = math.tanh %495 : vector<8x128xf32>
    %cst_182 = arith.constant 5.000000e-01 : f32
    %497 = vector.broadcast %cst_182 : f32 to vector<8x128xf32>
    %498 = arith.mulf %497, %496 : vector<8x128xf32>
    %cst_183 = arith.constant 5.000000e-01 : f32
    %499 = vector.broadcast %cst_183 : f32 to vector<8x128xf32>
    %500 = arith.addf %498, %499 : vector<8x128xf32>
    %501 = vector.extract_strided_slice %484 {offsets = [0, 256], sizes = [8, 128], strides = [1, 1]} : vector<8x512xf32> to vector<8x128xf32>
    %502 = math.tanh %501 : vector<8x128xf32>
    %503 = vector.extract_strided_slice %484 {offsets = [0, 384], sizes = [8, 128], strides = [1, 1]} : vector<8x512xf32> to vector<8x128xf32>
    %cst_184 = arith.constant 5.000000e-01 : f32
    %504 = vector.broadcast %cst_184 : f32 to vector<8x128xf32>
    %505 = arith.mulf %504, %503 : vector<8x128xf32>
    %506 = math.tanh %505 : vector<8x128xf32>
    %cst_185 = arith.constant 5.000000e-01 : f32
    %507 = vector.broadcast %cst_185 : f32 to vector<8x128xf32>
    %508 = arith.mulf %507, %506 : vector<8x128xf32>
    %cst_186 = arith.constant 5.000000e-01 : f32
    %509 = vector.broadcast %cst_186 : f32 to vector<8x128xf32>
    %510 = arith.addf %508, %509 : vector<8x128xf32>
    %511 = arith.mulf %500, %436 : vector<8x128xf32>
    %512 = arith.mulf %492, %502 : vector<8x128xf32>
    %513 = arith.addf %511, %512 : vector<8x128xf32>
    %514 = math.tanh %513 : vector<8x128xf32>
    %515 = arith.mulf %510, %514 : vector<8x128xf32>
    %516 = arith.truncf %515 : vector<8x128xf32> to vector<8x128xbf16>
    %c0_187 = arith.constant 0 : index
    %c0_188 = arith.constant 0 : index
    %517 = vector.load %arg4[%c0_187, %c0_188] : memref<128x1024xbf16, #tpu.memory_space<vmem>>, vector<128x1024xbf16>
    %cst_189 = arith.constant dense<0.000000e+00> : vector<8x1024xf32>
    %518 = tpu.matmul %516, %517, %cst_189 {dimension_numbers = #tpu.dot_dimension_numbers<[1], [0], [0], [1], [0, 0, 1, 1], [], []>} : vector<8x128xbf16>, vector<128x1024xbf16>, vector<8x1024xf32> -> vector<8x1024xf32>
    %519 = vector.extract_strided_slice %518 {offsets = [0, 512], sizes = [8, 512], strides = [1, 1]} : vector<8x1024xf32> to vector<8x512xf32>
    %520 = arith.addf %519, %478 : vector<8x512xf32>
    %521 = arith.addf %520, %12 : vector<8x512xf32>
    %522 = vector.extract_strided_slice %521 {offsets = [0, 0], sizes = [8, 128], strides = [1, 1]} : vector<8x512xf32> to vector<8x128xf32>
    %cst_190 = arith.constant 5.000000e-01 : f32
    %523 = vector.broadcast %cst_190 : f32 to vector<8x128xf32>
    %524 = arith.mulf %523, %522 : vector<8x128xf32>
    %525 = math.tanh %524 : vector<8x128xf32>
    %cst_191 = arith.constant 5.000000e-01 : f32
    %526 = vector.broadcast %cst_191 : f32 to vector<8x128xf32>
    %527 = arith.mulf %526, %525 : vector<8x128xf32>
    %cst_192 = arith.constant 5.000000e-01 : f32
    %528 = vector.broadcast %cst_192 : f32 to vector<8x128xf32>
    %529 = arith.addf %527, %528 : vector<8x128xf32>
    %530 = vector.extract_strided_slice %521 {offsets = [0, 128], sizes = [8, 128], strides = [1, 1]} : vector<8x512xf32> to vector<8x128xf32>
    %cst_193 = arith.constant 5.000000e-01 : f32
    %531 = vector.broadcast %cst_193 : f32 to vector<8x128xf32>
    %532 = arith.mulf %531, %530 : vector<8x128xf32>
    %533 = math.tanh %532 : vector<8x128xf32>
    %cst_194 = arith.constant 5.000000e-01 : f32
    %534 = vector.broadcast %cst_194 : f32 to vector<8x128xf32>
    %535 = arith.mulf %534, %533 : vector<8x128xf32>
    %cst_195 = arith.constant 5.000000e-01 : f32
    %536 = vector.broadcast %cst_195 : f32 to vector<8x128xf32>
    %537 = arith.addf %535, %536 : vector<8x128xf32>
    %538 = vector.extract_strided_slice %521 {offsets = [0, 256], sizes = [8, 128], strides = [1, 1]} : vector<8x512xf32> to vector<8x128xf32>
    %539 = math.tanh %538 : vector<8x128xf32>
    %540 = vector.extract_strided_slice %521 {offsets = [0, 384], sizes = [8, 128], strides = [1, 1]} : vector<8x512xf32> to vector<8x128xf32>
    %cst_196 = arith.constant 5.000000e-01 : f32
    %541 = vector.broadcast %cst_196 : f32 to vector<8x128xf32>
    %542 = arith.mulf %541, %540 : vector<8x128xf32>
    %543 = math.tanh %542 : vector<8x128xf32>
    %cst_197 = arith.constant 5.000000e-01 : f32
    %544 = vector.broadcast %cst_197 : f32 to vector<8x128xf32>
    %545 = arith.mulf %544, %543 : vector<8x128xf32>
    %cst_198 = arith.constant 5.000000e-01 : f32
    %546 = vector.broadcast %cst_198 : f32 to vector<8x128xf32>
    %547 = arith.addf %545, %546 : vector<8x128xf32>
    %548 = arith.mulf %537, %473 : vector<8x128xf32>
    %549 = arith.mulf %529, %539 : vector<8x128xf32>
    %550 = arith.addf %548, %549 : vector<8x128xf32>
    %551 = math.tanh %550 : vector<8x128xf32>
    %552 = arith.mulf %547, %551 : vector<8x128xf32>
    %553 = arith.truncf %552 : vector<8x128xf32> to vector<8x128xbf16>
    %c0_199 = arith.constant 0 : index
    %c0_200 = arith.constant 0 : index
    %554 = vector.load %arg5[%c0_199, %c0_200] : memref<128x512xbf16, #tpu.memory_space<vmem>>, vector<128x512xbf16>
    %cst_201 = arith.constant dense<0.000000e+00> : vector<8x512xf32>
    %555 = tpu.matmul %553, %554, %cst_201 {dimension_numbers = #tpu.dot_dimension_numbers<[1], [0], [0], [1], [0, 0, 1, 1], [], []>} : vector<8x128xbf16>, vector<128x512xbf16>, vector<8x512xf32> -> vector<8x512xf32>
    %556 = vector.extract_strided_slice %518 {offsets = [0, 0], sizes = [8, 512], strides = [1, 1]} : vector<8x1024xf32> to vector<8x512xf32>
    %c7_i32 = arith.constant 7 : i32
    %c8_i32_202 = arith.constant 8 : i32
    %557 = arith.muli %c7_i32, %c8_i32_202 : i32
    %558 = tpu.assume_multiple %557, 8 : i32
    %559 = arith.index_cast %558 : i32 to index
    %c0_203 = arith.constant 0 : index
    %560 = vector.load %arg10[%559, %c0_203] : memref<64x512xf32, #tpu.memory_space<vmem>>, vector<8x512xf32>
    %561 = arith.addf %560, %556 : vector<8x512xf32>
    %562 = vector.extract_strided_slice %561 {offsets = [0, 0], sizes = [8, 128], strides = [1, 1]} : vector<8x512xf32> to vector<8x128xf32>
    %cst_204 = arith.constant 5.000000e-01 : f32
    %563 = vector.broadcast %cst_204 : f32 to vector<8x128xf32>
    %564 = arith.mulf %563, %562 : vector<8x128xf32>
    %565 = math.tanh %564 : vector<8x128xf32>
    %cst_205 = arith.constant 5.000000e-01 : f32
    %566 = vector.broadcast %cst_205 : f32 to vector<8x128xf32>
    %567 = arith.mulf %566, %565 : vector<8x128xf32>
    %cst_206 = arith.constant 5.000000e-01 : f32
    %568 = vector.broadcast %cst_206 : f32 to vector<8x128xf32>
    %569 = arith.addf %567, %568 : vector<8x128xf32>
    %570 = vector.extract_strided_slice %561 {offsets = [0, 128], sizes = [8, 128], strides = [1, 1]} : vector<8x512xf32> to vector<8x128xf32>
    %cst_207 = arith.constant 5.000000e-01 : f32
    %571 = vector.broadcast %cst_207 : f32 to vector<8x128xf32>
    %572 = arith.mulf %571, %570 : vector<8x128xf32>
    %573 = math.tanh %572 : vector<8x128xf32>
    %cst_208 = arith.constant 5.000000e-01 : f32
    %574 = vector.broadcast %cst_208 : f32 to vector<8x128xf32>
    %575 = arith.mulf %574, %573 : vector<8x128xf32>
    %cst_209 = arith.constant 5.000000e-01 : f32
    %576 = vector.broadcast %cst_209 : f32 to vector<8x128xf32>
    %577 = arith.addf %575, %576 : vector<8x128xf32>
    %578 = vector.extract_strided_slice %561 {offsets = [0, 256], sizes = [8, 128], strides = [1, 1]} : vector<8x512xf32> to vector<8x128xf32>
    %579 = math.tanh %578 : vector<8x128xf32>
    %580 = vector.extract_strided_slice %561 {offsets = [0, 384], sizes = [8, 128], strides = [1, 1]} : vector<8x512xf32> to vector<8x128xf32>
    %cst_210 = arith.constant 5.000000e-01 : f32
    %581 = vector.broadcast %cst_210 : f32 to vector<8x128xf32>
    %582 = arith.mulf %581, %580 : vector<8x128xf32>
    %583 = math.tanh %582 : vector<8x128xf32>
    %cst_211 = arith.constant 5.000000e-01 : f32
    %584 = vector.broadcast %cst_211 : f32 to vector<8x128xf32>
    %585 = arith.mulf %584, %583 : vector<8x128xf32>
    %cst_212 = arith.constant 5.000000e-01 : f32
    %586 = vector.broadcast %cst_212 : f32 to vector<8x128xf32>
    %587 = arith.addf %585, %586 : vector<8x128xf32>
    %588 = arith.mulf %577, %513 : vector<8x128xf32>
    %589 = arith.mulf %569, %579 : vector<8x128xf32>
    %590 = arith.addf %588, %589 : vector<8x128xf32>
    %591 = math.tanh %590 : vector<8x128xf32>
    %592 = arith.mulf %587, %591 : vector<8x128xf32>
    %593 = arith.truncf %592 : vector<8x128xf32> to vector<8x128xbf16>
    %c0_213 = arith.constant 0 : index
    %c0_214 = arith.constant 0 : index
    %594 = vector.load %arg4[%c0_213, %c0_214] : memref<128x1024xbf16, #tpu.memory_space<vmem>>, vector<128x1024xbf16>
    %cst_215 = arith.constant dense<0.000000e+00> : vector<8x1024xf32>
    %595 = tpu.matmul %593, %594, %cst_215 {dimension_numbers = #tpu.dot_dimension_numbers<[1], [0], [0], [1], [0, 0, 1, 1], [], []>} : vector<8x128xbf16>, vector<128x1024xbf16>, vector<8x1024xf32> -> vector<8x1024xf32>
    %596 = vector.extract_strided_slice %595 {offsets = [0, 512], sizes = [8, 512], strides = [1, 1]} : vector<8x1024xf32> to vector<8x512xf32>
    %597 = arith.addf %596, %555 : vector<8x512xf32>
    %598 = arith.addf %597, %12 : vector<8x512xf32>
    %599 = vector.extract_strided_slice %598 {offsets = [0, 0], sizes = [8, 128], strides = [1, 1]} : vector<8x512xf32> to vector<8x128xf32>
    %cst_216 = arith.constant 5.000000e-01 : f32
    %600 = vector.broadcast %cst_216 : f32 to vector<8x128xf32>
    %601 = arith.mulf %600, %599 : vector<8x128xf32>
    %602 = math.tanh %601 : vector<8x128xf32>
    %cst_217 = arith.constant 5.000000e-01 : f32
    %603 = vector.broadcast %cst_217 : f32 to vector<8x128xf32>
    %604 = arith.mulf %603, %602 : vector<8x128xf32>
    %cst_218 = arith.constant 5.000000e-01 : f32
    %605 = vector.broadcast %cst_218 : f32 to vector<8x128xf32>
    %606 = arith.addf %604, %605 : vector<8x128xf32>
    %607 = vector.extract_strided_slice %598 {offsets = [0, 128], sizes = [8, 128], strides = [1, 1]} : vector<8x512xf32> to vector<8x128xf32>
    %cst_219 = arith.constant 5.000000e-01 : f32
    %608 = vector.broadcast %cst_219 : f32 to vector<8x128xf32>
    %609 = arith.mulf %608, %607 : vector<8x128xf32>
    %610 = math.tanh %609 : vector<8x128xf32>
    %cst_220 = arith.constant 5.000000e-01 : f32
    %611 = vector.broadcast %cst_220 : f32 to vector<8x128xf32>
    %612 = arith.mulf %611, %610 : vector<8x128xf32>
    %cst_221 = arith.constant 5.000000e-01 : f32
    %613 = vector.broadcast %cst_221 : f32 to vector<8x128xf32>
    %614 = arith.addf %612, %613 : vector<8x128xf32>
    %615 = vector.extract_strided_slice %598 {offsets = [0, 256], sizes = [8, 128], strides = [1, 1]} : vector<8x512xf32> to vector<8x128xf32>
    %616 = math.tanh %615 : vector<8x128xf32>
    %617 = vector.extract_strided_slice %598 {offsets = [0, 384], sizes = [8, 128], strides = [1, 1]} : vector<8x512xf32> to vector<8x128xf32>
    %cst_222 = arith.constant 5.000000e-01 : f32
    %618 = vector.broadcast %cst_222 : f32 to vector<8x128xf32>
    %619 = arith.mulf %618, %617 : vector<8x128xf32>
    %620 = math.tanh %619 : vector<8x128xf32>
    %cst_223 = arith.constant 5.000000e-01 : f32
    %621 = vector.broadcast %cst_223 : f32 to vector<8x128xf32>
    %622 = arith.mulf %621, %620 : vector<8x128xf32>
    %cst_224 = arith.constant 5.000000e-01 : f32
    %623 = vector.broadcast %cst_224 : f32 to vector<8x128xf32>
    %624 = arith.addf %622, %623 : vector<8x128xf32>
    %625 = arith.mulf %614, %550 : vector<8x128xf32>
    %626 = arith.mulf %606, %616 : vector<8x128xf32>
    %627 = arith.addf %625, %626 : vector<8x128xf32>
    %628 = math.tanh %627 : vector<8x128xf32>
    %629 = arith.mulf %624, %628 : vector<8x128xf32>
    %630 = arith.truncf %629 : vector<8x128xf32> to vector<8x128xbf16>
    %c0_225 = arith.constant 0 : index
    %c0_226 = arith.constant 0 : index
    %631 = vector.load %arg5[%c0_225, %c0_226] : memref<128x512xbf16, #tpu.memory_space<vmem>>, vector<128x512xbf16>
    %cst_227 = arith.constant dense<0.000000e+00> : vector<8x512xf32>
    %632 = tpu.matmul %630, %631, %cst_227 {dimension_numbers = #tpu.dot_dimension_numbers<[1], [0], [0], [1], [0, 0, 1, 1], [], []>} : vector<8x128xbf16>, vector<128x512xbf16>, vector<8x512xf32> -> vector<8x512xf32>
    %633 = vector.extract_strided_slice %595 {offsets = [0, 0], sizes = [8, 512], strides = [1, 1]} : vector<8x1024xf32> to vector<8x512xf32>
    %c8_i32_228 = arith.constant 8 : i32
    %c0_229 = arith.constant 0 : index
    %c0_230 = arith.constant 0 : index
    %634 = vector.load %arg11[%c0_229, %c0_230] : memref<8x512xf32, #tpu.memory_space<vmem>>, vector<8x512xf32>
    tpu.vector_store %arg11[%c0_229, %c0_230], %633 {strides = array<i32>} : memref<8x512xf32, #tpu.memory_space<vmem>>, vector<8x512xf32>,
    %c0_231 = arith.constant 0 : index
    %c0_232 = arith.constant 0 : index
    %635 = vector.load %arg12[%c0_231, %c0_232] : memref<8x128xf32, #tpu.memory_space<vmem>>, vector<8x128xf32>
    tpu.vector_store %arg12[%c0_231, %c0_232], %590 {strides = array<i32>} : memref<8x128xf32, #tpu.memory_space<vmem>>, vector<8x128xf32>,
    %c0_233 = arith.constant 0 : index
    %c0_234 = arith.constant 0 : index
    %636 = vector.load %arg13[%c0_233, %c0_234] : memref<8x128xf32, #tpu.memory_space<vmem>>, vector<8x128xf32>
    tpu.vector_store %arg13[%c0_233, %c0_234], %629 {strides = array<i32>} : memref<8x128xf32, #tpu.memory_space<vmem>>, vector<8x128xf32>,
    %c0_235 = arith.constant 0 : index
    %c0_236 = arith.constant 0 : index
    %637 = vector.load %arg14[%c0_235, %c0_236] : memref<8x128xf32, #tpu.memory_space<vmem>>, vector<8x128xf32>
    tpu.vector_store %arg14[%c0_235, %c0_236], %627 {strides = array<i32>} : memref<8x128xf32, #tpu.memory_space<vmem>>, vector<8x128xf32>,
    %c0_237 = arith.constant 0 : index
    %c0_238 = arith.constant 0 : index
    %638 = vector.load %arg15[%c0_237, %c0_238] : memref<8x512xf32, #tpu.memory_space<vmem>>, vector<8x512xf32>
    tpu.vector_store %arg15[%c0_237, %c0_238], %632 {strides = array<i32>} : memref<8x512xf32, #tpu.memory_space<vmem>>, vector<8x512xf32>,
    %c0_i32_239 = arith.constant 0 : i32
    %639 = arith.cmpi eq, %arg0, %c0_i32_239 : i32
    %640 = arith.extui %639 : i1 to i32
    %c0_i32_240 = arith.constant 0 : i32
    %641 = arith.cmpi ne, %640, %c0_i32_240 : i32
    scf.if %641 {
      %c0_241 = arith.constant 0 : index
      %c0_242 = arith.constant 0 : index
      %642 = vector.load %arg7[%c0_241, %c0_242] : memref<128x8xf32, #tpu.memory_space<vmem>>, vector<128x8xf32>
      %cst_243 = arith.constant dense<0.000000e+00> : vector<8x8xf32>
      %643 = tpu.matmul %629, %642, %cst_243 {dimension_numbers = #tpu.dot_dimension_numbers<[1], [0], [0], [1], [0, 0, 1, 1], [], []>} : vector<8x128xf32>, vector<128x8xf32>, vector<8x8xf32> -> vector<8x8xf32>
      %c0_244 = arith.constant 0 : index
      %c0_245 = arith.constant 0 : index
      %644 = vector.load %arg8[%c0_244, %c0_245] : memref<1x8xf32, #tpu.memory_space<vmem>>, vector<1x8xf32>
      %645 = vector.broadcast %644 : vector<1x8xf32> to vector<8x8xf32>
      %646 = arith.addf %643, %645 : vector<8x8xf32>
      %c0_246 = arith.constant 0 : index
      %c0_247 = arith.constant 0 : index
      %647 = vector.load %arg9[%c0_246, %c0_247] : memref<8x8xf32, #tpu.memory_space<vmem>>, vector<8x8xf32>
      tpu.vector_store %arg9[%c0_246, %c0_247], %646 {strides = array<i32>} : memref<8x8xf32, #tpu.memory_space<vmem>>, vector<8x8xf32>,
    } else {
    }
    return
  }
  func.func @transform_0(%arg0: i32) -> (i32, i32) {
    %c0_i32 = arith.constant 0 : i32
    %c0_i32_0 = arith.constant 0 : i32
    return %arg0, %c0_i32 : i32, i32
  }
  func.func @transform_1(%arg0: i32) -> (i32, i32) {
    %c0_i32 = arith.constant 0 : i32
    %c0_i32_0 = arith.constant 0 : i32
    %c0_i32_1 = arith.constant 0 : i32
    return %c0_i32, %c0_i32_0 : i32, i32
  }
  func.func @transform_2(%arg0: i32) -> (i32, i32) {
    %c0_i32 = arith.constant 0 : i32
    %c0_i32_0 = arith.constant 0 : i32
    %c0_i32_1 = arith.constant 0 : i32
    return %c0_i32, %c0_i32_0 : i32, i32
  }
  func.func @transform_3(%arg0: i32) -> (i32, i32) {
    %c0_i32 = arith.constant 0 : i32
    %c0_i32_0 = arith.constant 0 : i32
    %c0_i32_1 = arith.constant 0 : i32
    return %c0_i32, %c0_i32_0 : i32, i32
  }
  func.func @transform_4(%arg0: i32) -> (i32, i32) {
    %c0_i32 = arith.constant 0 : i32
    %c0_i32_0 = arith.constant 0 : i32
    %c0_i32_1 = arith.constant 0 : i32
    return %c0_i32, %c0_i32_0 : i32, i32
  }
  func.func @transform_5(%arg0: i32) -> (i32, i32) {
    %c0_i32 = arith.constant 0 : i32
    %c0_i32_0 = arith.constant 0 : i32
    %c0_i32_1 = arith.constant 0 : i32
    return %c0_i32, %c0_i32_0 : i32, i32
  }
  func.func @transform_6(%arg0: i32) -> (i32, i32) {
    %c0_i32 = arith.constant 0 : i32
    %c0_i32_0 = arith.constant 0 : i32
    %c0_i32_1 = arith.constant 0 : i32
    return %c0_i32, %c0_i32_0 : i32, i32
  }
  func.func @transform_7(%arg0: i32) -> (i32, i32) {
    %c0_i32 = arith.constant 0 : i32
    %c0_i32_0 = arith.constant 0 : i32
    %c0_i32_1 = arith.constant 0 : i32
    return %c0_i32, %c0_i32_0 : i32, i32
  }
  func.func @transform_8(%arg0: i32) -> (i32, i32) {
    %c0_i32 = arith.constant 0 : i32
    %c0_i32_0 = arith.constant 0 : i32
    %c0_i32_1 = arith.constant 0 : i32
    return %c0_i32, %c0_i32_0 : i32, i32
  }
}

</mosaic_0001>

<bundles_post_ra>
// kernel: tpu_custom_call.1
= control target key start
LH: loop header
LB: loop body
LE: loop exit
PB: predicated region body
PF: predicated region fallthrough
CT: control target
= control target key end

     0   :  { %13 = vsyncpa [#allocation9], 0  ;;  %s5743_s0 = inlined_call_operand.vmem [shape: bf16[64,256], index: 0, kind: input, shape index: {}]   ;;  %s5744_s1 = inlined_call_operand.hbm [shape: bf16[256,512], index: 1, kind: input, shape index: {}]   ;;  %s5745_s2 = inlined_call_operand.vmem [shape: f32[1,512], index: 2, kind: input, shape index: {}]   ;;  %s5746_s3 = inlined_call_operand.hbm [shape: bf16[128,1024], index: 3, kind: input, shape index: {}]   ;;  %s5747_s4 = inlined_call_operand.hbm [shape: bf16[128,512], index: 4, kind: input, shape index: {}]   ;;  %s5748_s5 = inlined_call_operand.vmem [shape: f32[1,512], index: 5, kind: input, shape index: {}]   ;;  %s5749_s6 = inlined_call_operand.vmem [shape: f32[128,8], index: 6, kind: input, shape index: {}]   ;;  %s5750_s7 = inlined_call_operand.vmem [shape: f32[1,8], index: 7, kind: input, shape index: {}]   ;;  %s5751_s8 = inlined_call_operand.hbm [shape: f32[8,8], index: 8, kind: output, shape index: {}]  }
   0x1   :  { %14 = vsyncpa [#allocation12], 0  ;;  %s37_s29 = sshll.u32 %s5746_s3, 4  ;;  %s38_s29 = int_to_ptr.hbm [resolvable:$true] %s37_s29 }
   0x2   :  { %15 = vsyncpa [#allocation10], 0  ;;  %s4290_s30 = smov [#allocation11]   ;;  %s22_s12 = sshll.u32 %s5744_s1, 4  ;;  %s23_s12 = int_to_ptr.hbm [resolvable:$true] %s22_s12 }
   0x3   :  { %s39_s9 = sshll.u32 %s4290_s30, 4  ;;  %s4291_s13 = smov 512   ;;  %s40_s9 = int_to_ptr.vmem [resolvable:$true] %s39_s9 }
   0x4   :  { %s4292_s14 = smov 32   ;;  %s4293_s15 = smov [#allocation8]  }
   0x5   :  { %45 = dma.hbm_to_vmem [thread:$0]  %s38_s29, 8192, %s40_s9, [#allocation12], %s4291_s13, %s4291_s13, %s4292_s14  }
   0x6   :  { %s24_s16 = sshll.u32 %s4293_s15, 4  ;;  %s4294_s17 = smov 256   ;;  %s25_s16 = int_to_ptr.vmem [resolvable:$true] %s24_s16 }
   0x7   :  { %s4295_s18 = smov 16   ;;  %s50_s20 = sshll.u32 %s5747_s4, 4  ;;  %s51_s20 = int_to_ptr.hbm [resolvable:$true] %s50_s20 }
   0x8   :  { %30 = dma.hbm_to_vmem [thread:$0]  %s23_s12, 8192, %s25_s16, [#allocation9], %s4294_s17, %s4294_s17, %s4295_s18  }
   0x9   :  { %s4296_s21 = smov [#allocation13]  }
   0xa   :  { %s52_s22 = sshll.u32 %s4296_s21, 4  ;;  %s53_s22 = int_to_ptr.vmem [resolvable:$true] %s52_s22 }
   0xb   :  { %58 = dma.hbm_to_vmem [thread:$0]  %s51_s20, 4096, %s53_s22, [#allocation12], %s4294_s17, %s4294_s17, %s4295_s18  }
   0xc   :  { %4284 = dma.done.wait [#allocation9], 8192  }
   0xd   :  { %4285 = vsyncadd [#allocation9], 4294959104 }
   0xe   :  { %4286 = dma.done.wait [#allocation12], 12288  }
   0xf   :  { %4287 = vsyncadd [#allocation12], 4294955008  ;;  %v3325_v0 = vld [vmem:[#allocation8 + $0xe0] sm:$0xf]  ;;  %v3889_v1 = vld [vmem:[#allocation8 + $0xec] sm:$0xf0] }
  0x10   :  { %v3453_v2 = vld [vmem:[#allocation8 + $0x1e0] sm:$0xf]  ;;  %v3326_v3 = vor.u32 %v3889_v1, %v3325_v0  ;;  %v3921_v4 = vld [vmem:[#allocation8 + $0x1ec] sm:$0xf0]  ;;  %v3887_v5 = vld [vmem:[#allocation8 + $0xe4] sm:$0xf] }
  0x11   :  { %v3327_v6 = vld [vmem:[#allocation8 + $0xf0] sm:$0xf0]  ;;  %v3454_v7 = vor.u32 %v3921_v4, %v3453_v2  ;;  %v3919_v9 = vld [vmem:[#allocation8 + $0x1e4] sm:$0xf]  ;;  %v3309_v11 = vld [vmem:[#allocation8 + $0xc0] sm:$0xf] }
  0x12   :  { %v3330_v8 = vor.u32 %v3887_v5, %v3327_v6  ;;  %v3455_v10 = vld [vmem:[#allocation8 + $0x1f0] sm:$0xf0]  ;;  %534 = vmatpush.bf16.msra.mxu0 %v3326_v3  ;;  %v3885_v13 = vld [vmem:[#allocation8 + $0xcc] sm:$0xf0]  ;;  %v3437_v14 = vld [vmem:[#allocation8 + $0x1c0] sm:$0xf] }
  0x13   :  { %v3458_v12 = vor.u32 %v3919_v9, %v3455_v10  ;;  %v3917_v15 = vld [vmem:[#allocation8 + $0x1cc] sm:$0xf0]  ;;  %563 = vmatpush.bf16.msra.mxu1 %v3454_v7  ;;  %v3310_v16 = vor.u32 %v3885_v13, %v3309_v11  ;;  %v3883_v18 = vld [vmem:[#allocation8 + $0xc4] sm:$0xf]  ;;  %v3311_v19 = vld [vmem:[#allocation8 + $0xd0] sm:$0xf0] }
  0x14   :  { %592 = vmatpush.bf16.msra.mxu2 %v3330_v8  ;;  %v3438_v17 = vor.u32 %v3917_v15, %v3437_v14  ;;  %v3915_v20 = vld [vmem:[#allocation8 + $0x1c4] sm:$0xf]  ;;  %v3314_v21 = vor.u32 %v3883_v18, %v3311_v19  ;;  %v3439_v22 = vld [vmem:[#allocation8 + $0x1d0] sm:$0xf0]  ;;  %v3293_v23 = vld [vmem:[#allocation8 + $0xa0] sm:$0xf] }
  0x15   :  { %621 = vmatpush.bf16.msra.mxu3 %v3458_v12  ;;  %v3881_v24 = vld [vmem:[#allocation8 + $0xac] sm:$0xf0]  ;;  %v3442_v25 = vor.u32 %v3915_v20, %v3439_v22  ;;  %v3421_v26 = vld [vmem:[#allocation8 + $0x1a0] sm:$0xf]  ;;  %v3879_v28 = vld [vmem:[#allocation8 + $0xa4] sm:$0xf] }
  0x16   :  { %v3913_v27 = vld [vmem:[#allocation8 + $0x1ac] sm:$0xf0]  ;;  %535 = vmatpush.bf16.msra.mxu0 %v3310_v16  ;;  %v3294_v29 = vor.u32 %v3881_v24, %v3293_v23  ;;  %v3295_v30 = vld [vmem:[#allocation8 + $0xb0] sm:$0xf0]  ;;  %v3911_v31 = vld [vmem:[#allocation8 + $0x1a4] sm:$0xf] }
  0x17   :  { %v3423_v32 = vld [vmem:[#allocation8 + $0x1b0] sm:$0xf0]  ;;  %564 = vmatpush.bf16.msra.mxu1 %v3438_v17  ;;  %v3422_v33 = vor.u32 %v3913_v27, %v3421_v26  ;;  %v3298_v34 = vor.u32 %v3879_v28, %v3295_v30  ;;  %v3277_v35 = vld [vmem:[#allocation8 + $0x80] sm:$0xf]  ;;  %v3877_v36 = vld [vmem:[#allocation8 + $0x8c] sm:$0xf0] }
  0x18   :  { %593 = vmatpush.bf16.msra.mxu2 %v3314_v21  ;;  %v3405_v37 = vld [vmem:[#allocation8 + $0x180] sm:$0xf]  ;;  %v3426_v38 = vor.u32 %v3911_v31, %v3423_v32  ;;  %v3909_v39 = vld [vmem:[#allocation8 + $0x18c] sm:$0xf0]  ;;  %v3875_v40 = vld [vmem:[#allocation8 + $0x84] sm:$0xf]  ;;  %v3278_v44 = vor.u32 %v3877_v36, %v3277_v35 }
  0x19   :  { %622 = vmatpush.bf16.msra.mxu3 %v3442_v25  ;;  %v3279_v41 = vld [vmem:[#allocation8 + $0x90] sm:$0xf0]  ;;  %v3907_v42 = vld [vmem:[#allocation8 + $0x184] sm:$0xf]  ;;  %v3406_v45 = vor.u32 %v3909_v39, %v3405_v37  ;;  %v3261_v47 = vld [vmem:[#allocation8 + $0x60] sm:$0xf] }
  0x1a   :  { %v3407_v43 = vld [vmem:[#allocation8 + $0x190] sm:$0xf0]  ;;  %536 = vmatpush.bf16.msra.mxu0 %v3294_v29  ;;  %v3282_v46 = vor.u32 %v3875_v40, %v3279_v41  ;;  %v3873_v48 = vld [vmem:[#allocation8 + $0x6c] sm:$0xf0]  ;;  %v3389_v49 = vld [vmem:[#allocation8 + $0x160] sm:$0xf] }
  0x1b   :  { %565 = vmatpush.bf16.msra.mxu1 %v3422_v33  ;;  %v3410_v50 = vor.u32 %v3907_v42, %v3407_v43  ;;  %v3905_v51 = vld [vmem:[#allocation8 + $0x16c] sm:$0xf0]  ;;  %v3871_v52 = vld [vmem:[#allocation8 + $0x64] sm:$0xf]  ;;  %v3263_v53 = vld [vmem:[#allocation8 + $0x70] sm:$0xf0]  ;;  %v3262_v56 = vor.u32 %v3873_v48, %v3261_v47 }
  0x1c   :  { %594 = vmatpush.bf16.msra.mxu2 %v3298_v34  ;;  %v3903_v54 = vld [vmem:[#allocation8 + $0x164] sm:$0xf]  ;;  %v3391_v55 = vld [vmem:[#allocation8 + $0x170] sm:$0xf0]  ;;  %v3390_v57 = vor.u32 %v3905_v51, %v3389_v49  ;;  %v3266_v58 = vor.u32 %v3871_v52, %v3263_v53  ;;  %v3245_v59 = vld [vmem:[#allocation8 + $0x40] sm:$0xf] }
  0x1d   :  { %623 = vmatpush.bf16.msra.mxu3 %v3426_v38  ;;  %v3869_v60 = vld [vmem:[#allocation8 + $0x4c] sm:$0xf0]  ;;  %v3373_v61 = vld [vmem:[#allocation8 + $0x140] sm:$0xf]  ;;  %v3394_v62 = vor.u32 %v3903_v54, %v3391_v55  ;;  %v3867_v0 = vld [vmem:[#allocation8 + $0x44] sm:$0xf] }
  0x1e   :  { %537 = vmatpush.bf16.msra.mxu0 %v3278_v44  ;;  %v3901_v63 = vld [vmem:[#allocation8 + $0x14c] sm:$0xf0]  ;;  %v3247_v1 = vld [vmem:[#allocation8 + $0x50] sm:$0xf0]  ;;  %v3899_v2 = vld [vmem:[#allocation8 + $0x144] sm:$0xf]  ;;  %v3246_v4 = vor.u32 %v3869_v60, %v3245_v59 }
  0x1f   :  { %566 = vmatpush.bf16.msra.mxu1 %v3406_v45  ;;  %v3375_v3 = vld [vmem:[#allocation8 + $0x150] sm:$0xf0]  ;;  %v3374_v5 = vor.u32 %v3901_v63, %v3373_v61  ;;  %v3250_v6 = vor.u32 %v3867_v0, %v3247_v1  ;;  %v3229_v7 = vld [vmem:[#allocation8 + $0x20] sm:$0xf]  ;;  %v3865_v8 = vld [vmem:[#allocation8 + $0x2c] sm:$0xf0] }
  0x20   :  { %595 = vmatpush.bf16.msra.mxu2 %v3282_v46  ;;  %v3357_v9 = vld [vmem:[#allocation8 + $0x120] sm:$0xf]  ;;  %v3378_v10 = vor.u32 %v3899_v2, %v3375_v3  ;;  %v3897_v11 = vld [vmem:[#allocation8 + $0x12c] sm:$0xf0]  ;;  %v3863_v12 = vld [vmem:[#allocation8 + $0x24] sm:$0xf]  ;;  %v3230_v16 = vor.u32 %v3865_v8, %v3229_v7 }
  0x21   :  { %624 = vmatpush.bf16.msra.mxu3 %v3410_v50  ;;  %v3231_v13 = vld [vmem:[#allocation8 + $0x30] sm:$0xf0]  ;;  %v3895_v14 = vld [vmem:[#allocation8 + $0x124] sm:$0xf]  ;;  %v3213_v17 = vld [vmem:[#allocation8] sm:$0xf]  ;;  %v3358_v19 = vor.u32 %v3897_v11, %v3357_v9 }
  0x22   :  { %538 = vmatpush.bf16.msra.mxu0 %v3262_v56  ;;  %v3359_v15 = vld [vmem:[#allocation8 + $0x130] sm:$0xf0]  ;;  %v3861_v18 = vld [vmem:[#allocation8 + $0xc] sm:$0xf0]  ;;  %v3234_v20 = vor.u32 %v3863_v12, %v3231_v13  ;;  %v3341_v21 = vld [vmem:[#allocation8 + $0x100] sm:$0xf] }
  0x23   :  { %567 = vmatpush.bf16.msra.mxu1 %v3390_v57  ;;  %v3893_v22 = vld [vmem:[#allocation8 + $0x10c] sm:$0xf0]  ;;  %v3859_v23 = vld [vmem:[#allocation8 + $0x4] sm:$0xf]  ;;  %v3362_v24 = vor.u32 %v3895_v14, %v3359_v15  ;;  %v3215_v25 = vld [vmem:[#allocation8 + $0x10] sm:$0xf0]  ;;  %v3214_v31 = vor.u32 %v3861_v18, %v3213_v17 }
  0x24   :  { %596 = vmatpush.bf16.msra.mxu2 %v3266_v58  ;;  %v3891_v26 = vld [vmem:[#allocation8 + $0x104] sm:$0xf]  ;;  %v3343_v27 = vld [vmem:[#allocation8 + $0x110] sm:$0xf0]  ;;  %v3181_v28 = vld [vmem:[%s5743_s0] sm:$0xf]  ;;  %v3342_v35 = vor.u32 %v3893_v22, %v3341_v21  ;;  %v3218_v36 = vor.u32 %v3859_v23, %v3215_v25 }
  0x25   :  { %625 = vmatpush.bf16.msra.mxu3 %v3394_v62  ;;  %v3888_v29 = vld [vmem:[#allocation8 + $0xec] sm:$0xf]  ;;  %v3335_v30 = vld [vmem:[#allocation8 + $0xf8] sm:$0xf0]  ;;  %v3852_v32 = vld [vmem:[%s5743_s0 + $0x4] sm:$0xf0]  ;;  %v3346_v39 = vor.u32 %v3891_v26, %v3343_v27 }
  0x26   :  { %539 = vmatpush.bf16.msra.mxu0 %v3246_v4  ;;  %v3920_v33 = vld [vmem:[#allocation8 + $0x1ec] sm:$0xf]  ;;  %v3463_v34 = vld [vmem:[#allocation8 + $0x1f8] sm:$0xf0]  ;;  %v3851_v37 = vld [vmem:[%s5743_s0 + $0x4] sm:$0xf]  ;;  %v3338_v40 = vor.u32 %v3888_v29, %v3335_v30  ;;  %v4364_v44 = vor.u32 %v3852_v32, %v3181_v28 }
  0x27   :  { %568 = vmatpush.bf16.msra.mxu1 %v3374_v5  ;;  %v3183_v38 = vld [vmem:[%s5743_s0 + $0x8] sm:$0xf0]  ;;  %v3333_v41 = vld [vmem:[#allocation8 + $0xe8] sm:$0xf]  ;;  %v3890_v42 = vld [vmem:[#allocation8 + $0xf4] sm:$0xf0]  ;;  %v3466_v45 = vor.u32 %v3920_v33, %v3463_v34 }
  0x28   :  { %597 = vmatpush.bf16.msra.mxu2 %v3250_v6  ;;  %v3461_v43 = vld [vmem:[#allocation8 + $0x1e8] sm:$0xf]  ;;  %v3922_v46 = vld [vmem:[#allocation8 + $0x1f4] sm:$0xf0]  ;;  %v3884_v47 = vld [vmem:[#allocation8 + $0xcc] sm:$0xf]  ;;  %v4366_v49 = vor.u32 %v3851_v37, %v3183_v38  ;;  %v3334_v52 = vor.u32 %v3890_v42, %v3333_v41 }
  0x29   :  { %626 = vmatpush.bf16.msra.mxu3 %v3378_v10  ;;  %v3319_v48 = vld [vmem:[#allocation8 + $0xd8] sm:$0xf0]  ;;  %v3916_v50 = vld [vmem:[#allocation8 + $0x1cc] sm:$0xf]  ;;  %v3462_v53 = vor.u32 %v3922_v46, %v3461_v43  ;;  %v3317_v55 = vld [vmem:[#allocation8 + $0xc8] sm:$0xf] }
  0x2a   :  { %540 = vmatpush.bf16.msra.mxu0 %v3230_v16  ;;  %v3447_v51 = vld [vmem:[#allocation8 + $0x1d8] sm:$0xf0]  ;;  %v3322_v54 = vor.u32 %v3884_v47, %v3319_v48  ;;  %v3886_v56 = vld [vmem:[#allocation8 + $0xd4] sm:$0xf0]  ;;  %v3445_v57 = vld [vmem:[#allocation8 + $0x1c8] sm:$0xf] }
  0x2b   :  { %569 = vmatpush.bf16.msra.mxu1 %v3358_v19  ;;  %v3450_v58 = vor.u32 %v3916_v50, %v3447_v51  ;;  %v3918_v59 = vld [vmem:[#allocation8 + $0x1d4] sm:$0xf0]  ;;  %v3880_v60 = vld [vmem:[#allocation8 + $0xac] sm:$0xf]  ;;  %v3303_v61 = vld [vmem:[#allocation8 + $0xb8] sm:$0xf0]  ;;  %v3318_v0 = vor.u32 %v3886_v56, %v3317_v55 }
  0x2c   :  { %598 = vmatpush.bf16.msra.mxu2 %v3234_v20  ;;  %v3912_v62 = vld [vmem:[#allocation8 + $0x1ac] sm:$0xf]  ;;  %v3431_v63 = vld [vmem:[#allocation8 + $0x1b8] sm:$0xf0]  ;;  %v3446_v1 = vor.u32 %v3918_v59, %v3445_v57  ;;  %v3306_v2 = vor.u32 %v3880_v60, %v3303_v61  ;;  %v3301_v3 = vld [vmem:[#allocation8 + $0xa8] sm:$0xf] }
  0x2d   :  { %627 = vmatpush.bf16.msra.mxu3 %v3362_v24  ;;  %v3882_v4 = vld [vmem:[#allocation8 + $0xb4] sm:$0xf0]  ;;  %v3429_v5 = vld [vmem:[#allocation8 + $0x1a8] sm:$0xf]  ;;  %v3434_v6 = vor.u32 %v3912_v62, %v3431_v63  ;;  %v3876_v8 = vld [vmem:[#allocation8 + $0x8c] sm:$0xf] }
  0x2e   :  { %541 = vmatpush.bf16.msra.mxu0 %v3214_v31  ;;  %v3914_v7 = vld [vmem:[#allocation8 + $0x1b4] sm:$0xf0]  ;;  %v3287_v9 = vld [vmem:[#allocation8 + $0x98] sm:$0xf0]  ;;  %v3908_v10 = vld [vmem:[#allocation8 + $0x18c] sm:$0xf]  ;;  %v3302_v12 = vor.u32 %v3882_v4, %v3301_v3 }
  0x2f   :  { %570 = vmatpush.bf16.msra.mxu1 %v3342_v35  ;;  %v3415_v11 = vld [vmem:[#allocation8 + $0x198] sm:$0xf0]  ;;  %v3285_v13 = vld [vmem:[#allocation8 + $0x88] sm:$0xf]  ;;  %v3189_v14 = vld [vmem:[%s5743_s0 + $0x10] sm:$0xf]  ;;  %v3430_v15 = vor.u32 %v3914_v7, %v3429_v5  ;;  %v3290_v16 = vor.u32 %v3876_v8, %v3287_v9 }
  0x30   :  { %599 = vmatpush.bf16.msra.mxu2 %v3218_v36  ;;  %v3878_v17 = vld [vmem:[#allocation8 + $0x94] sm:$0xf0]  ;;  %v3413_v18 = vld [vmem:[#allocation8 + $0x188] sm:$0xf]  ;;  %v3418_v20 = vor.u32 %v3908_v10, %v3415_v11  ;;  %v3872_v21 = vld [vmem:[#allocation8 + $0x6c] sm:$0xf] }
  0x31   :  { %628 = vmatpush.bf16.msra.mxu3 %v3346_v39  ;;  %542 = vmatmul.bf16.vlgmr.msra.gmra.mxu0 %v4364_v44  ;;  %v3910_v19 = vld [vmem:[#allocation8 + $0x194] sm:$0xf0]  ;;  %v3271_v22 = vld [vmem:[#allocation8 + $0x78] sm:$0xf0]  ;;  %v3904_v24 = vld [vmem:[#allocation8 + $0x16c] sm:$0xf]  ;;  %v3286_v28 = vor.u32 %v3878_v17, %v3285_v13 }
  0x32   :  { %571 = vmatmul.bf16.vlgmr.msra.gmra.mxu1 %v4366_v49  ;;  %650 = vmatpush.bf16.msrb.mxu0 %v3334_v52  ;;  %v3854_v23 = vld [vmem:[%s5743_s0 + $0x14] sm:$0xf0]  ;;  %v3399_v25 = vld [vmem:[#allocation8 + $0x178] sm:$0xf0]  ;;  %v3853_v26 = vld [vmem:[%s5743_s0 + $0x14] sm:$0xf]  ;;  %v3414_v29 = vor.u32 %v3910_v19, %v3413_v18  ;;  %v3274_v30 = vor.u32 %v3872_v21, %v3271_v22 }
  0x33   :  { %600 = vmatmul.bf16.vlgmr.msra.gmra.mxu2 %v4364_v44  ;;  %679 = vmatpush.bf16.msrb.mxu1 %v3462_v53  ;;  %v3191_v27 = vld [vmem:[%s5743_s0 + $0x18] sm:$0xf0]  ;;  %v3269_v31 = vld [vmem:[#allocation8 + $0x68] sm:$0xf]  ;;  %v3874_v32 = vld [vmem:[#allocation8 + $0x74] sm:$0xf0]  ;;  %v4384_v34 = vor.u32 %v3854_v23, %v3189_v14  ;;  %v3402_v35 = vor.u32 %v3904_v24, %v3399_v25 }
  0x34   :  { %708 = vmatpush.bf16.msrb.mxu2 %v3338_v40  ;;  %629 = vmatmul.bf16.vlgmr.msra.gmra.mxu3 %v4366_v49  ;;  %v3397_v33 = vld [vmem:[#allocation8 + $0x168] sm:$0xf]  ;;  %v3906_v36 = vld [vmem:[#allocation8 + $0x174] sm:$0xf0]  ;;  %v3868_v37 = vld [vmem:[#allocation8 + $0x4c] sm:$0xf]  ;;  %v4386_v39 = vor.u32 %v3853_v26, %v3191_v27  ;;  %v3270_v42 = vor.u32 %v3874_v32, %v3269_v31 }
  0x35   :  { %737 = vmatpush.bf16.msrb.mxu3 %v3466_v45  ;;  %v3255_v38 = vld [vmem:[#allocation8 + $0x58] sm:$0xf0]  ;;  %v3900_v40 = vld [vmem:[#allocation8 + $0x14c] sm:$0xf]  ;;  %v3398_v43 = vor.u32 %v3906_v36, %v3397_v33  ;;  %v3253_v46 = vld [vmem:[#allocation8 + $0x48] sm:$0xf] }
  0x36   :  { %651 = vmatpush.bf16.msrb.mxu0 %v3318_v0  ;;  %v3383_v41 = vld [vmem:[#allocation8 + $0x158] sm:$0xf0]  ;;  %v3258_v45 = vor.u32 %v3868_v37, %v3255_v38  ;;  %v3870_v47 = vld [vmem:[#allocation8 + $0x54] sm:$0xf0]  ;;  %v3381_v50 = vld [vmem:[#allocation8 + $0x148] sm:$0xf] }
  0x37   :  { %680 = vmatpush.bf16.msrb.mxu1 %v3446_v1  ;;  %v3386_v48 = vor.u32 %v3900_v40, %v3383_v41  ;;  %v3902_v51 = vld [vmem:[#allocation8 + $0x154] sm:$0xf0]  ;;  %v3254_v52 = vor.u32 %v3870_v47, %v3253_v46  ;;  %v3864_v53 = vld [vmem:[#allocation8 + $0x2c] sm:$0xf]  ;;  %v3237_v55 = vld [vmem:[#allocation8 + $0x28] sm:$0xf] }
  0x38   :  { %709 = vmatpush.bf16.msrb.mxu2 %v3322_v54  ;;  %v3239_v54 = vld [vmem:[#allocation8 + $0x38] sm:$0xf0]  ;;  %v3382_v56 = vor.u32 %v3902_v51, %v3381_v50  ;;  %v3896_v59 = vld [vmem:[#allocation8 + $0x12c] sm:$0xf]  ;;  %v3365_v62 = vld [vmem:[#allocation8 + $0x128] sm:$0xf] }
  0x39   :  { %738 = vmatpush.bf16.msrb.mxu3 %v3450_v58  ;;  %v3242_v57 = vor.u32 %v3864_v53, %v3239_v54  ;;  %v3866_v58 = vld [vmem:[#allocation8 + $0x34] sm:$0xf0]  ;;  %v3367_v60 = vld [vmem:[#allocation8 + $0x138] sm:$0xf0]  ;;  %v3860_v0 = vld [vmem:[#allocation8 + $0xc] sm:$0xf] }
  0x3a   :  { %652 = vmatpush.bf16.msrb.mxu0 %v3302_v12  ;;  %v3370_v61 = vor.u32 %v3896_v59, %v3367_v60  ;;  %v3898_v63 = vld [vmem:[#allocation8 + $0x134] sm:$0xf0]  ;;  %v3223_v1 = vld [vmem:[#allocation8 + $0x18] sm:$0xf0]  ;;  %v3892_v3 = vld [vmem:[#allocation8 + $0x10c] sm:$0xf] }
  0x3b   :  { %681 = vmatpush.bf16.msrb.mxu1 %v3430_v15  ;;  %v3351_v4 = vld [vmem:[#allocation8 + $0x118] sm:$0xf0]  ;;  %v3366_v5 = vor.u32 %v3898_v63, %v3365_v62  ;;  %v3221_v7 = vld [vmem:[#allocation8 + $0x8] sm:$0xf]  ;;  %v3862_v8 = vld [vmem:[#allocation8 + $0x14] sm:$0xf0] }
  0x3c   :  { %710 = vmatpush.bf16.msrb.mxu2 %v3306_v2  ;;  %v3238_v2 = vor.u32 %v3866_v58, %v3237_v55  ;;  %v3354_v9 = vor.u32 %v3892_v3, %v3351_v4  ;;  %v3349_v10 = vld [vmem:[#allocation8 + $0x108] sm:$0xf]  ;;  %v3894_v11 = vld [vmem:[#allocation8 + $0x114] sm:$0xf0]  ;;  %v3197_v12 = vld [vmem:[%s5743_s0 + $0x20] sm:$0xf] }
  0x3d   :  { %739 = vmatpush.bf16.msrb.mxu3 %v3434_v6  ;;  %v3226_v6 = vor.u32 %v3860_v0, %v3223_v1  ;;  %v3856_v13 = vld [vmem:[%s5743_s0 + $0x24] sm:$0xf0]  ;;  %v3855_v14 = vld [vmem:[%s5743_s0 + $0x24] sm:$0xf]  ;;  %v3199_v15 = vld [vmem:[%s5743_s0 + $0x28] sm:$0xf0]  ;;  %v3350_v17 = vor.u32 %v3894_v11, %v3349_v10 }
  0x3e   :  { %653 = vmatpush.bf16.msrb.mxu0 %v3286_v28  ;;  %v3198_v18 = vor.u32 %v3856_v13, %v3197_v12  ;;  %v3202_v19 = vor.u32 %v3855_v14, %v3199_v15  ;;  %v3858_v21 = vld [vmem:[%s5743_s0 + $0x34] sm:$0xf0]  ;;  %v3857_v22 = vld [vmem:[%s5743_s0 + $0x34] sm:$0xf]  ;;  %v3207_v23 = vld [vmem:[%s5743_s0 + $0x38] sm:$0xf0] }
  0x3f   :  { %682 = vmatpush.bf16.msrb.mxu1 %v3414_v29  ;;  %v3210_v25 = vor.u32 %v3857_v22, %v3207_v23  ;;  %v3693_v26 = vld [vmem:[#allocation11 + $0x1c0] sm:$0xf]  ;;  %v3979_v27 = vld [vmem:[#allocation11 + $0x1c4] sm:$0xf]  ;;  %v3701_v29 = vld [vmem:[#allocation11 + $0x1c8] sm:$0xf] }
  0x40   :  { %711 = vmatpush.bf16.msrb.mxu2 %v3290_v16  ;;  %v3222_v16 = vor.u32 %v3862_v8, %v3221_v7  ;;  %v3695_v28 = vld [vmem:[#allocation11 + $0x1e0] sm:$0xf0]  ;;  %v3703_v36 = vld [vmem:[#allocation11 + $0x1e8] sm:$0xf0]  ;;  %v3661_v37 = vld [vmem:[#allocation11 + $0x180] sm:$0xf] }
  0x41   :  { %740 = vmatpush.bf16.msrb.mxu3 %v3418_v20  ;;  %547 = vmatmul.bf16.gmra.mxu0 %v4384_v34  ;;  %v3205_v20 = vld [vmem:[%s5743_s0 + $0x30] sm:$0xf]  ;;  %v4426_v31 = vor.u32 %v3979_v27, %v3695_v28  ;;  %v3971_v40 = vld [vmem:[#allocation11 + $0x184] sm:$0xf]  ;;  %v3976_v46 = vld [vmem:[#allocation11 + $0x1a4] sm:$0xf0] }
  0x42   :  { %576 = vmatmul.bf16.gmra.mxu1 %v4386_v39  ;;  %654 = vmatpush.bf16.msrb.mxu0 %v3270_v42  ;;  %v3206_v24 = vor.u32 %v3858_v21, %v3205_v20  ;;  %v3663_v41 = vld [vmem:[#allocation11 + $0x1a0] sm:$0xf0]  ;;  %v3972_v53 = vld [vmem:[#allocation11 + $0x18c] sm:$0xf]  ;;  %v3629_v55 = vld [vmem:[#allocation11 + $0x140] sm:$0xf] }
  0x43   :  { %605 = vmatmul.bf16.gmra.mxu2 %v4384_v34  ;;  %683 = vmatpush.bf16.msrb.mxu1 %v3398_v43  ;;  %5977 = vst [vmem:[#allocation19_spill] sm:$0xff] %v4426_v31  ;;  %v4441_v43 = vor.u32 %v3971_v40, %v3663_v41  ;;  %v3671_v54 = vld [vmem:[#allocation11 + $0x1a8] sm:$0xf0]  ;;  %v3967_v58 = vld [vmem:[#allocation11 + $0x15c] sm:$0xf0]  ;;  %s4297_s12 = smov [#allocation14]  }
  0x44   :  { %712 = vmatpush.bf16.msrb.mxu2 %v3274_v30  ;;  %634 = vmatmul.bf16.gmra.mxu3 %v4386_v39  ;;  %v3984_v30 = vld [vmem:[#allocation11 + $0x1e4] sm:$0xf0]  ;;  %v3963_v59 = vld [vmem:[#allocation11 + $0x144] sm:$0xf]  ;;  %v4464_v60 = vor.u32 %v3967_v58, %v3629_v55  ;;  %v3639_v10 = vld [vmem:[#allocation11 + $0x168] sm:$0xf0] }
  0x45   :  { %741 = vmatpush.bf16.msrb.mxu3 %v3402_v35  ;;  %v4428_v32 = vor.u32 %v3984_v30, %v3701_v29  ;;  %v3980_v35 = vld [vmem:[#allocation11 + $0x1cc] sm:$0xf]  ;;  %5981 = vst [vmem:[#allocation23_spill] sm:$0xff] %v4441_v43  ;;  %v3637_v62 = vld [vmem:[#allocation11 + $0x148] sm:$0xf]  ;;  %s3159_s13 = sshll.u32 %s4297_s12, 4  ;;  %s3160_s13 = int_to_ptr.vmem [resolvable:$true] %s3159_s13 }
  0x46   :  { %655 = vmatpush.bf16.msrb.mxu0 %v3254_v52  ;;  %v4437_v38 = vor.u32 %v3980_v35, %v3703_v36  ;;  %5984 = vst [vmem:[#allocation26_spill] sm:$0xff] %v4464_v60  ;;  %v3968_v63 = vld [vmem:[#allocation11 + $0x164] sm:$0xf0]  ;;  %v3597_v11 = vld [vmem:[#allocation11 + $0x100] sm:$0xf]  ;;  %s3161_s16 = sshll.u32 %s5751_s8, 4  ;;  %s3162_s16 = int_to_ptr.hbm [resolvable:$true] %s3161_s16 }
  0x47   :  { %684 = vmatpush.bf16.msrb.mxu1 %v3382_v56  ;;  %5978 = vst [vmem:[#allocation20_spill] sm:$0xff] %v4428_v32  ;;  %v4460_v56 = vld [vmem:[%s5745_s2] sm:$0xf]  ;;  %v4469_v1 = vor.u32 %v3968_v63, %v3637_v62  ;;  %v3955_v14 = vld [vmem:[#allocation11 + $0x104] sm:$0xf]  ;;  %vm3152_vm0 = vcmask 64512  }
  0x48   :  { %713 = vmatpush.bf16.msrb.mxu2 %v3258_v45  ;;  %5979 = vst [vmem:[#allocation21_spill] sm:$0xff] %v4437_v38  ;;  %v3669_v45 = vld [vmem:[#allocation11 + $0x188] sm:$0xf]  ;;  %v3959_v13 = vld [vmem:[#allocation11 + $0x11c] sm:$0xf0]  ;;  %v4491_v20 = vperm.slane %v4460_v56, 1 }
  0x49   :  { %742 = vmatpush.bf16.msrb.mxu3 %v3386_v48  ;;  %v4444_v47 = vor.u32 %v3976_v46, %v3669_v45  ;;  %5986 = vst [vmem:[#allocation28_spill] sm:$0xff] %v4469_v1  ;;  %v3599_v15 = vld [vmem:[#allocation11 + $0x120] sm:$0xf0]  ;;  %v3956_v27 = vld [vmem:[#allocation11 + $0x10c] sm:$0xf] }
  0x4a   :  { %656 = vmatpush.bf16.msrb.mxu0 %v3238_v2  ;;  %v4472_v2 = vperm.slane %v4460_v56, 0  ;;  %5992 = vst [vmem:[#allocation34_spill] sm:$0xff] %v4491_v20  ;;  %v3607_v28 = vld [vmem:[#allocation11 + $0x128] sm:$0xf0]  ;;  %v3565_v29 = vld [vmem:[#allocation11 + $0xc0] sm:$0xf] }
  0x4b   :  { %685 = vmatpush.bf16.msrb.mxu1 %v3366_v5  ;;  %5982 = vst [vmem:[#allocation24_spill] sm:$0xff] %v4444_v47  ;;  %v4506_v30 = vor.u32 %v3956_v27, %v3607_v28  ;;  %v3951_v35 = vld [vmem:[#allocation11 + $0xdc] sm:$0xf0]  ;;  %v3947_v36 = vld [vmem:[#allocation11 + $0xc4] sm:$0xf] }
  0x4c   :  { %714 = vmatpush.bf16.msrb.mxu2 %v3242_v57  ;;  %v4462_v57 = vor.u32 %v3972_v53, %v3671_v54  ;;  %5987 = vst [vmem:[#allocation29_spill] sm:$0xff] %v4472_v2  ;;  %v3573_v41 = vld [vmem:[#allocation11 + $0xc8] sm:$0xf]  ;;  %v3948_v54 = vld [vmem:[#allocation11 + $0xcc] sm:$0xf] }
  0x4d   :  { %743 = vmatpush.bf16.msrb.mxu3 %v3370_v61  ;;  %v3631_v61 = vld [vmem:[#allocation11 + $0x160] sm:$0xf0]  ;;  %5997 = vst [vmem:[#allocation39_spill] sm:$0xff] %v4506_v30  ;;  %v3952_v45 = vld [vmem:[#allocation11 + $0xe4] sm:$0xf0] }
  0x4e   :  { %657 = vmatpush.bf16.msrb.mxu0 %v3222_v16  ;;  %5983 = vst [vmem:[#allocation25_spill] sm:$0xff] %v4462_v57  ;;  %v4467_v0 = vor.u32 %v3963_v59, %v3631_v61  ;;  %v4486_v16 = vor.u32 %v3959_v13, %v3597_v11  ;;  %v4513_v46 = vor.u32 %v3952_v45, %v3573_v41  ;;  %v3575_v55 = vld [vmem:[#allocation11 + $0xe8] sm:$0xf0]  ;;  %v3535_v11 = vld [vmem:[#allocation11 + $0xa0] sm:$0xf0] }
  0x4f   :  { %686 = vmatpush.bf16.msrb.mxu1 %v3350_v17  ;;  %v4488_v17 = vor.u32 %v3955_v14, %v3599_v15  ;;  %v4522_v61 = vor.u32 %v3948_v54, %v3575_v55  ;;  %v3541_v13 = vld [vmem:[#allocation11 + $0x88] sm:$0xf]  ;;  %v3501_v27 = vld [vmem:[#allocation11 + $0x40] sm:$0xf]  ;;  %v3931_v41 = vld [vmem:[#allocation11 + $0x44] sm:$0xf] }
  0x50   :  { %715 = vmatpush.bf16.msrb.mxu2 %v3226_v6  ;;  %5985 = vst [vmem:[#allocation27_spill] sm:$0xff] %v4467_v0  ;;  %v3944_v14 = vld [vmem:[#allocation11 + $0xa4] sm:$0xf0]  ;;  %v3935_v28 = vld [vmem:[#allocation11 + $0x5c] sm:$0xf0] }
  0x51   :  { %744 = vmatpush.bf16.msrb.mxu3 %v3354_v9  ;;  %552 = vmatmul.bf16.gmra.mxu0 %v3198_v18  ;;  %v3964_v9 = vld [vmem:[#allocation11 + $0x14c] sm:$0xf]  ;;  %5990 = vst [vmem:[#allocation32_spill] sm:$0xff] %v4486_v16  ;;  %v3503_v45 = vld [vmem:[#allocation11 + $0x60] sm:$0xf0] }
  0x52   :  { %581 = vmatmul.bf16.gmra.mxu1 %v3202_v19  ;;  %v4484_v12 = vor.u32 %v3964_v9, %v3639_v10  ;;  %5991 = vst [vmem:[#allocation33_spill] sm:$0xff] %v4488_v17  ;;  %v3939_v9 = vld [vmem:[#allocation11 + $0x84] sm:$0xf]  ;;  %v3509_v54 = vld [vmem:[#allocation11 + $0x48] sm:$0xf] }
  0x53   :  { %610 = vmatmul.bf16.gmra.mxu2 %v3198_v18  ;;  %1245 = vmatpush.bf16.msra.mxu1 %v4426_v31  ;;  %6000 = vst [vmem:[#allocation42_spill] sm:$0xff] %v4513_v46  ;;  %v4530_v15 = vor.u32 %v3939_v9, %v3535_v11 }
  0x54   :  { %639 = vmatmul.bf16.gmra.mxu3 %v3202_v19  ;;  %1258 = vmatpush.bf16.msra.mxu2 %v4428_v32  ;;  %5989 = vst [vmem:[#allocation31_spill] sm:$0xff] %v4484_v12 }
  0x55   :  { %1271 = vmatpush.bf16.msra.mxu3 %v4437_v38  ;;  %6003 = vst [vmem:[#allocation45_spill] sm:$0xff] %v4522_v61 }
  0x56   :  { %6006 = vst [vmem:[#allocation48_spill] sm:$0xff] %v4530_v15 }
  0x57   :  { %1246 = vmatpush.bf16.msra.mxu1 %v4441_v43 }
  0x58   :  { %1259 = vmatpush.bf16.msra.mxu2 %v4444_v47 }
  0x59   :  { %1272 = vmatpush.bf16.msra.mxu3 %v4462_v57 }
  0x5b   :  { %1247 = vmatpush.bf16.msra.mxu1 %v4467_v0 }
  0x5c   :  { %1260 = vmatpush.bf16.msra.mxu2 %v4469_v1 }
  0x5d   :  { %1273 = vmatpush.bf16.msra.mxu3 %v4484_v12 }
  0x5f   :  { %1248 = vmatpush.bf16.msra.mxu1 %v4488_v17 }
  0x61   :  { %557 = vmatmul.bf16.gmra.mxu0 %v3206_v24  ;;  %1274 = vmatpush.bf16.msra.mxu3 %v4506_v30 }
  0x62   :  { %586 = vmatmul.bf16.gmra.mxu1 %v3210_v25 }
  0x63   :  { %615 = vmatmul.bf16.gmra.mxu2 %v3206_v24 }
  0x64   :  { %644 = vmatmul.bf16.gmra.mxu3 %v3210_v25 }
  0x65   :  { %1275 = vmatpush.bf16.msra.mxu3 %v4522_v61 }
  0x71   :  { %658 = vmatmul.bf16.vlgmr.msrb.gmra.mxu0 %v4364_v44 }
  0x72   :  { %687 = vmatmul.bf16.vlgmr.msrb.gmra.mxu1 %v4366_v49 }
  0x73   :  { %716 = vmatmul.bf16.vlgmr.msrb.gmra.mxu2 %v4364_v44  ;;  %v3983_v44 = vld [vmem:[#allocation11 + $0x1dc] sm:$0xf0] }
  0x74   :  { %745 = vmatmul.bf16.vlgmr.msrb.gmra.mxu3 %v4366_v49  ;;  %v4424_v49 = vor.u32 %v3983_v44, %v3693_v26 }
  0x76   :  { %5976 = vst [vmem:[#allocation18_spill] sm:$0xff] %v4424_v49  ;;  %1232 = vmatpush.bf16.msra.mxu0 %v4424_v49 }
  0x81   :  { %663 = vmatmul.bf16.gmra.mxu0 %v4384_v34 }
  0x82   :  { %692 = vmatmul.bf16.gmra.mxu1 %v4386_v39 }
  0x83   :  { %721 = vmatmul.bf16.gmra.mxu2 %v4384_v34 }
  0x84   :  { %750 = vmatmul.bf16.gmra.mxu3 %v4386_v39  ;;  %v3975_v39 = vld [vmem:[#allocation11 + $0x19c] sm:$0xf0] }
  0x85   :  { %v4439_v42 = vor.u32 %v3975_v39, %v3661_v37  ;;  %v3567_v37 = vld [vmem:[#allocation11 + $0xe0] sm:$0xf0]  ;;  %v4508_v39 = vor.u32 %v3951_v35, %v3565_v29 }
  0x86   :  { %v4510_v40 = vor.u32 %v3947_v36, %v3567_v37  ;;  %v4543_v37 = vor.u32 %v3935_v28, %v3501_v27  ;;  %v3477_v27 = vld [vmem:[#allocation11 + $0x8] sm:$0xf] }
  0x87   :  { %5980 = vst [vmem:[#allocation22_spill] sm:$0xff] %v4439_v42  ;;  %1233 = vmatpush.bf16.msra.mxu0 %v4439_v42  ;;  %v3928_v28 = vld [vmem:[#allocation11 + $0x24] sm:$0xf0] }
  0x88   :  { %5998 = vst [vmem:[#allocation40_spill] sm:$0xff] %v4508_v39  ;;  %1249 = vmatpush.bf16.msra.mxu1 %v4510_v40 }
  0x89   :  { %5999 = vst [vmem:[#allocation41_spill] sm:$0xff] %v4510_v40 }
  0x8a   :  { %6010 = vst [vmem:[#allocation52_spill] sm:$0xff] %v4543_v37 }
  0x8b   :  { %1234 = vmatpush.bf16.msra.mxu0 %v4464_v60 }
  0x8c   :  { %1250 = vmatpush.bf16.msra.mxu1 %v4530_v15 }
  0x8f   :  { %1235 = vmatpush.bf16.msra.mxu0 %v4486_v16 }
  0x91   :  { %668 = vmatmul.bf16.gmra.mxu0 %v3198_v18 }
  0x92   :  { %697 = vmatmul.bf16.gmra.mxu1 %v3202_v19 }
  0x93   :  { %726 = vmatmul.bf16.gmra.mxu2 %v3198_v18  ;;  %v3605_v18 = vld [vmem:[#allocation11 + $0x108] sm:$0xf]  ;;  %1236 = vmatpush.bf16.msra.mxu0 %v4508_v39 }
  0x94   :  { %755 = vmatmul.bf16.gmra.mxu3 %v3202_v19  ;;  %v3960_v19 = vld [vmem:[#allocation11 + $0x124] sm:$0xf0] }
  0x95   :  { %v4494_v21 = vor.u32 %v3960_v19, %v3605_v18  ;;  %v4532_v18 = vor.u32 %v3944_v14, %v3541_v13  ;;  %v3940_v19 = vld [vmem:[#allocation11 + $0x8c] sm:$0xf]  ;;  %v3469_v13 = vld [vmem:[#allocation11] sm:$0xf] }
  0x96   :  { %v3927_v14 = vld [vmem:[#allocation11 + $0x1c] sm:$0xf0] }
  0x97   :  { %5993 = vst [vmem:[#allocation35_spill] sm:$0xff] %v4494_v21  ;;  %1261 = vmatpush.bf16.msra.mxu2 %v4494_v21 }
  0x98   :  { %6007 = vst [vmem:[#allocation49_spill] sm:$0xff] %v4532_v18 }
  0x9b   :  { %1262 = vmatpush.bf16.msra.mxu2 %v4513_v46 }
  0x9f   :  { %1263 = vmatpush.bf16.msra.mxu2 %v4532_v18 }
  0xa1   :  { %673 = vmatmul.bf16.gmra.mxu0 %v3206_v24 }
  0xa2   :  { %702 = vmatmul.bf16.gmra.mxu1 %v3210_v25 }
  0xa3   :  { %731 = vmatmul.bf16.gmra.mxu2 %v3206_v24 }
  0xa4   :  { %760 = vmatmul.bf16.gmra.mxu3 %v3210_v25 }
  0xae   :  { %v4433_v33 = vpop.f32.mrf.mxu0 }
  0xaf   :  { %v4435_v34 = vpop.f32.mrf.mxu1 }
  0xb6   :  { %v4446_v48 = vpop.f32.mrf.mxu2  ;;  %v4452_v51 = vpop.f32.mrf.mxu0 }
  0xb7   :  { %v4450_v50 = vpop.f32.mrf.mxu3  ;;  %v4455_v52 = vpop.f32.mrf.mxu1 }
  0xbe   :  { %v4474_v3 = vpop.f32.mrf.mxu2  ;;  %v548_v5 = vpop.f32.mrf.mxu0 }
  0xbf   :  { %v4477_v4 = vpop.f32.mrf.mxu3  ;;  %v549_v6 = vadd.f32 %v548_v5, %v4472_v2  ;;  %v577_v7 = vpop.f32.mrf.mxu1 }
  0xc1   :  { %v4482_v8 = vadd.f32 %v577_v7, %v549_v6  ;;  %v3533_v6 = vld [vmem:[#allocation11 + $0x80] sm:$0xf] }
  0xc2   :  { %v3943_v7 = vld [vmem:[#allocation11 + $0x9c] sm:$0xf0] }
  0xc3   :  { %5988 = vst [vmem:[#allocation30_spill] sm:$0xff] %v4482_v8  ;;  %v4528_v10 = vor.u32 %v3943_v7, %v3533_v6  ;;  %v3511_v6 = vld [vmem:[#allocation11 + $0x68] sm:$0xf0] }
  0xc5   :  { %6005 = vst [vmem:[#allocation47_spill] sm:$0xff] %v4528_v10  ;;  %1237 = vmatpush.bf16.msra.mxu0 %v4528_v10 }
  0xc6   :  { %v606_v22 = vpop.f32.mrf.mxu2  ;;  %v4499_v25 = vpop.f32.mrf.mxu0 }
  0xc7   :  { %v607_v23 = vadd.f32 %v606_v22, %v4491_v20  ;;  %v635_v24 = vpop.f32.mrf.mxu3  ;;  %5994 = vst [vmem:[#allocation36_spill] sm:$0xff] %v4499_v25  ;;  %v4502_v26 = vpop.f32.mrf.mxu1  ;;  %v3543_v22 = vld [vmem:[#allocation11 + $0xa8] sm:$0xf0]  ;;  %v3687_v25 = vld [vmem:[#allocation11 + $0x1b8] sm:$0xf0] }
  0xc8   :  { %5995 = vst [vmem:[#allocation37_spill] sm:$0xff] %v4502_v26  ;;  %v3685_v26 = vld [vmem:[#allocation11 + $0x198] sm:$0xf] }
  0xc9   :  { %v4504_v44 = vadd.f32 %v635_v24, %v607_v23  ;;  %v4535_v23 = vor.u32 %v3940_v19, %v3543_v22  ;;  %1238 = vmatpush.bf16.msra.mxu0 %v4543_v37  ;;  %v3923_v19 = vld [vmem:[#allocation11 + $0x4] sm:$0xf]  ;;  %v4559_v22 = vor.u32 %v3927_v14, %v3469_v13  ;;  %v3981_v13 = vld [vmem:[#allocation11 + $0x1d4] sm:$0xf] }
  0xca   :  { %v3711_v14 = vld [vmem:[#allocation11 + $0x1f0] sm:$0xf0] }
  0xcb   :  { %5996 = vst [vmem:[#allocation38_spill] sm:$0xff] %v4504_v44  ;;  %1276 = vmatpush.bf16.msra.mxu3 %v4535_v23 }
  0xcc   :  { %6008 = vst [vmem:[#allocation50_spill] sm:$0xff] %v4535_v23 }
  0xcd   :  { %6016 = vst [vmem:[#allocation58_spill] sm:$0xff] %v4559_v22  ;;  %1239 = vmatpush.bf16.msra.mxu0 %v4559_v22 }
  0xce   :  { %v4515_v53 = vpop.f32.mrf.mxu2  ;;  %v553_v59 = vpop.f32.mrf.mxu0 }
  0xcf   :  { %6001 = vst [vmem:[#allocation43_spill] sm:$0xff] %v4515_v53  ;;  %v4519_v58 = vpop.f32.mrf.mxu3  ;;  %v554_v62 = vadd.f32 %v553_v59, %v4472_v2  ;;  %v582_v63 = vpop.f32.mrf.mxu1  ;;  %v4547_v59 = vor.u32 %v3931_v41, %v3503_v45  ;;  %v3924_v41 = vld [vmem:[#allocation11 + $0xc] sm:$0xf]  ;;  %v3978_v53 = vld [vmem:[#allocation11 + $0x1b4] sm:$0xf0] }
  0xd0   :  { %6002 = vst [vmem:[#allocation44_spill] sm:$0xff] %v4519_v58  ;;  %v3479_v45 = vld [vmem:[#allocation11 + $0x28] sm:$0xf0]  ;;  %v3679_v58 = vld [vmem:[#allocation11 + $0x1b0] sm:$0xf0] }
  0xd1   :  { %v4526_v5 = vadd.f32 %v582_v63, %v554_v62  ;;  %6012 = vst [vmem:[#allocation54_spill] sm:$0xff] %v4547_v59  ;;  %v3936_v62 = vld [vmem:[#allocation11 + $0x64] sm:$0xf0]  ;;  %v3932_v63 = vld [vmem:[#allocation11 + $0x4c] sm:$0xf]  ;;  %1251 = vmatpush.bf16.msra.mxu1 %v4547_v59 }
  0xd2   :  { %v4552_v9 = vor.u32 %v3936_v62, %v3509_v54  ;;  %v4554_v11 = vor.u32 %v3932_v63, %v3511_v6  ;;  %v3709_v54 = vld [vmem:[#allocation11 + $0x1d0] sm:$0xf]  ;;  %v544_v62 = vadd.f32 %v4433_v33, %v4472_v2  ;;  %v4568_v63 = vor.u32 %v3924_v41, %v3479_v45  ;;  %v3986_v33 = vld [vmem:[#allocation11 + $0x1f4] sm:$0xf0] }
  0xd3   :  { %6004 = vst [vmem:[#allocation46_spill] sm:$0xff] %v4526_v5  ;;  %v3985_v6 = vld [vmem:[#allocation11 + $0x1ec] sm:$0xf0] }
  0xd4   :  { %6014 = vst [vmem:[#allocation56_spill] sm:$0xff] %v4552_v9  ;;  %1264 = vmatpush.bf16.msra.mxu2 %v4552_v9  ;;  %1277 = vmatpush.bf16.msra.mxu3 %v4554_v11  ;;  %v3977_v5 = vld [vmem:[#allocation11 + $0x1ac] sm:$0xf0] }
  0xd5   :  { %6015 = vst [vmem:[#allocation57_spill] sm:$0xff] %v4554_v11 }
  0xd6   :  { %v611_v24 = vpop.f32.mrf.mxu2  ;;  %v4540_v36 = vpop.f32.mrf.mxu0  ;;  %6019 = vst [vmem:[#allocation61_spill] sm:$0xff] %v4568_v63 }
  0xd7   :  { %v612_v29 = vadd.f32 %v611_v24, %v4491_v20  ;;  %v640_v35 = vpop.f32.mrf.mxu3  ;;  %6009 = vst [vmem:[#allocation51_spill] sm:$0xff] %v4540_v36  ;;  %v4545_v55 = vpop.f32.mrf.mxu1  ;;  %v3471_v24 = vld [vmem:[#allocation11 + $0x20] sm:$0xf0]  ;;  %v3982_v36 = vld [vmem:[#allocation11 + $0x1dc] sm:$0xf] }
  0xd8   :  { %6011 = vst [vmem:[#allocation53_spill] sm:$0xff] %v4545_v55  ;;  %v602_v55 = vadd.f32 %v4446_v48, %v4491_v20  ;;  %1278 = vmatpush.bf16.msra.mxu3 %v4568_v63  ;;  %v3719_v48 = vld [vmem:[#allocation11 + $0x1f8] sm:$0xf0] }
  0xd9   :  { %v4549_v7 = vadd.f32 %v640_v35, %v612_v29  ;;  %v4561_v29 = vor.u32 %v3923_v19, %v3471_v24  ;;  %v4563_v35 = vor.u32 %v3928_v28, %v3477_v27  ;;  %v4575_v24 = vor.u32 %v3985_v6, %v3709_v54  ;;  %v3717_v28 = vld [vmem:[#allocation11 + $0x1d8] sm:$0xf]  ;;  %v3527_v63 = vld [vmem:[#allocation11 + $0x78] sm:$0xf0] }
  0xda   :  { %v4577_v27 = vor.u32 %v3981_v13, %v3711_v14  ;;  %v4583_v45 = vor.u32 %v3986_v33, %v3717_v28  ;;  %v4588_v13 = vor.u32 %v3982_v36, %v3719_v48  ;;  %v573_v28 = vadd.f32 %v4435_v34, %v544_v62  ;;  %v3969_v48 = vld [vmem:[#allocation11 + $0x16c] sm:$0xf0]  ;;  %v3965_v34 = vld [vmem:[#allocation11 + $0x154] sm:$0xf]  ;;  %v3653_v62 = vld [vmem:[#allocation11 + $0x158] sm:$0xf] }
  0xdb   :  { %6013 = vst [vmem:[#allocation55_spill] sm:$0xff] %v4549_v7  ;;  %1252 = vmatpush.bf16.msra.mxu1 %v4561_v29  ;;  %1265 = vmatpush.bf16.msra.mxu2 %v4563_v35  ;;  %v631_v44 = vadd.f32 %v4450_v50, %v602_v55  ;;  %v3970_v50 = vld [vmem:[#allocation11 + $0x174] sm:$0xf0] }
  0xdc   :  { %6017 = vst [vmem:[#allocation59_spill] sm:$0xff] %v4561_v29  ;;  %1284 = vmatpush.bf16.msrb.mxu0 %v4575_v24  ;;  %1323 = vmatpush.bf16.msrb.mxu3 %v4588_v13 }
  0xdd   :  { %6018 = vst [vmem:[#allocation60_spill] sm:$0xff] %v4563_v35 }
  0xde   :  { %v4572_v19 = vpop.f32.mrf.mxu2  ;;  %6021 = vst [vmem:[#allocation63_spill] sm:$0xff] %v4575_v24  ;;  %v558_v41 = vpop.f32.mrf.mxu0  ;;  %v3519_v24 = vld [vmem:[#allocation11 + $0x70] sm:$0xf0] }
  0xdf   :  { %6020 = vst [vmem:[#allocation62_spill] sm:$0xff] %v4572_v19  ;;  %v4579_v7 = vpop.f32.mrf.mxu3  ;;  %v3677_v19 = vld [vmem:[#allocation11 + $0x190] sm:$0xf]  ;;  %v559_v54 = vadd.f32 %v558_v41, %v4472_v2  ;;  %v587_v6 = vpop.f32.mrf.mxu1  ;;  %1297 = vmatpush.bf16.msrb.mxu1 %v4577_v27  ;;  %1310 = vmatpush.bf16.msrb.mxu2 %v4583_v45  ;;  %v3974_v41 = vld [vmem:[#allocation11 + $0x19c] sm:$0xf] }
  0xe0   :  { %6022 = vst [vmem:[#allocation64_spill] sm:$0xff] %v4577_v27  ;;  %v4590_v14 = vor.u32 %v3977_v5, %v3677_v19  ;;  %v4600_v5 = vor.u32 %v3978_v53, %v3685_v26  ;;  %v4602_v36 = vor.u32 %v3974_v41, %v3687_v25  ;;  %v3645_v19 = vld [vmem:[#allocation11 + $0x150] sm:$0xf]  ;;  %v4611_v26 = vor.u32 %v3970_v50, %v3653_v62  ;;  %v3966_v25 = vld [vmem:[#allocation11 + $0x15c] sm:$0xf] }
  0xe1   :  { %6023 = vst [vmem:[#allocation65_spill] sm:$0xff] %v4579_v7  ;;  %v3973_v7 = vld [vmem:[#allocation11 + $0x194] sm:$0xf]  ;;  %v4597_v8 = vadd.f32 %v587_v6, %v559_v54  ;;  %v3655_v53 = vld [vmem:[#allocation11 + $0x178] sm:$0xf0]  ;;  %v829_v54 = vmul.f32 0.5, %v573_v28 }
  0xe2   :  { %6024 = vst [vmem:[#allocation66_spill] sm:$0xff] %v4583_v45  ;;  %v4594_v33 = vor.u32 %v3973_v7, %v3679_v58  ;;  %1285 = vmatpush.bf16.msrb.mxu0 %v4590_v14  ;;  %v4606_v58 = vor.u32 %v3969_v48, %v3645_v19  ;;  %v3647_v7 = vld [vmem:[#allocation11 + $0x170] sm:$0xf0]  ;;  %v833_v6 = vmul.f32 0.5, %v631_v44  ;;  %1324 = vmatpush.bf16.msrb.mxu3 %v4602_v36  ;;  %v3621_v62 = vld [vmem:[#allocation11 + $0x118] sm:$0xf] }
  0xe3   :  { %6025 = vst [vmem:[#allocation67_spill] sm:$0xff] %v4588_v13  ;;  %1311 = vmatpush.bf16.msrb.mxu2 %v4600_v5  ;;  %v4609_v55 = vor.u32 %v3965_v34, %v3647_v7  ;;  %v3957_v34 = vld [vmem:[#allocation11 + $0x114] sm:$0xf]  ;;  %v3962_v50 = vld [vmem:[#allocation11 + $0x134] sm:$0xf0] }
  0xe4   :  { %6026 = vst [vmem:[#allocation68_spill] sm:$0xff] %v4590_v14  ;;  %1298 = vmatpush.bf16.msrb.mxu1 %v4594_v33  ;;  %v3613_v14 = vld [vmem:[#allocation11 + $0x110] sm:$0xf]  ;;  %v3615_v28 = vld [vmem:[#allocation11 + $0x130] sm:$0xf0]  ;;  %4028 = vtanh.f32 %v833_v6 }
  0xe5   :  { %6027 = vst [vmem:[#allocation69_spill] sm:$0xff] %v4594_v33  ;;  %4030 = vtanh.f32 %v829_v54  ;;  %v3954_v6 = vld [vmem:[#allocation11 + $0xf4] sm:$0xf0]  ;;  %v3549_v54 = vld [vmem:[#allocation11 + $0x90] sm:$0xf] }
  0xe6   :  { %6028 = vst [vmem:[#allocation70_spill] sm:$0xff] %v4597_v8  ;;  %v616_v41 = vpop.f32.mrf.mxu2  ;;  %v4614_v8 = vor.u32 %v3966_v25, %v3655_v53  ;;  %v4617_v33 = vpop.f32.mrf.mxu0  ;;  %1286 = vmatpush.bf16.msrb.mxu0 %v4606_v58  ;;  %v4628_v53 = vor.u32 %v3957_v34, %v3615_v28  ;;  %v3583_v28 = vld [vmem:[#allocation11 + $0xf0] sm:$0xf0]  ;;  %v3937_v45 = vld [vmem:[#allocation11 + $0x6c] sm:$0xf0] }
  0xe7   :  { %6029 = vst [vmem:[#allocation71_spill] sm:$0xff] %v4600_v5  ;;  %v617_v19 = vadd.f32 %v616_v41, %v4491_v20  ;;  %v645_v48 = vpop.f32.mrf.mxu3  ;;  %v3961_v5 = vld [vmem:[#allocation11 + $0x12c] sm:$0xf0]  ;;  %v4619_v7 = vpop.f32.mrf.mxu1  ;;  %1312 = vmatpush.bf16.msrb.mxu2 %v4611_v26  ;;  %v4630_v41 = vor.u32 %v3962_v50, %v3621_v62  ;;  %v3589_v62 = vld [vmem:[#allocation11 + $0xd8] sm:$0xf] }
  0xe8   :  { %6030 = vst [vmem:[#allocation72_spill] sm:$0xff] %v4602_v36  ;;  %1299 = vmatpush.bf16.msrb.mxu1 %v4609_v55  ;;  %v4623_v44 = vor.u32 %v3961_v5, %v3613_v14  ;;  %v3623_v36 = vld [vmem:[#allocation11 + $0x138] sm:$0xf0]  ;;  %1325 = vmatpush.bf16.msrb.mxu3 %v4614_v8  ;;  %v3581_v5 = vld [vmem:[#allocation11 + $0xd0] sm:$0xf] }
  0xe9   :  { %6031 = vst [vmem:[#allocation73_spill] sm:$0xff] %v4606_v58  ;;  %v4625_v25 = vadd.f32 %v645_v48, %v617_v19  ;;  %v3953_v19 = vld [vmem:[#allocation11 + $0xec] sm:$0xf0]  ;;  %v3949_v48 = vld [vmem:[#allocation11 + $0xd4] sm:$0xf] }
  0xea   :  { %6032 = vst [vmem:[#allocation74_spill] sm:$0xff] %v4609_v55  ;;  %1287 = vmatpush.bf16.msrb.mxu0 %v4623_v44  ;;  %v4640_v34 = vor.u32 %v3953_v19, %v3581_v5  ;;  %v4643_v50 = vor.u32 %v3949_v48, %v3583_v28  ;;  %v3945_v5 = vld [vmem:[#allocation11 + $0xac] sm:$0xf0]  ;;  %v3941_v19 = vld [vmem:[#allocation11 + $0x94] sm:$0xf] }
  0xeb   :  { %6033 = vst [vmem:[#allocation75_spill] sm:$0xff] %v4611_v26  ;;  %1313 = vmatpush.bf16.msrb.mxu2 %v4630_v41  ;;  %v3946_v48 = vld [vmem:[#allocation11 + $0xb4] sm:$0xf0]  ;;  %v3942_v28 = vld [vmem:[#allocation11 + $0x9c] sm:$0xf] }
  0xec   :  { %6034 = vst [vmem:[#allocation76_spill] sm:$0xff] %v4614_v8  ;;  %1300 = vmatpush.bf16.msrb.mxu1 %v4628_v53  ;;  %v3933_v27 = vld [vmem:[#allocation11 + $0x54] sm:$0xf] }
  0xed   :  { %6035 = vst [vmem:[#allocation77_spill] sm:$0xff] %v4617_v33  ;;  %v3958_v33 = vld [vmem:[#allocation11 + $0x11c] sm:$0xf] }
  0xee   :  { %6036 = vst [vmem:[#allocation78_spill] sm:$0xff] %v4619_v7  ;;  %v4633_v7 = vperm.slane %v4460_v56, 2  ;;  %v4636_v14 = vor.u32 %v3958_v33, %v3623_v36  ;;  %v3950_v33 = vld [vmem:[#allocation11 + $0xdc] sm:$0xf]  ;;  %v4647_v8 = vpop.f32.mrf.mxu2  ;;  %v659_v55 = vpop.f32.mrf.mxu0  ;;  %1288 = vmatpush.bf16.msrb.mxu0 %v4640_v34 }
  0xef   :  { %6037 = vst [vmem:[#allocation79_spill] sm:$0xff] %v4623_v44  ;;  %v3591_v36 = vld [vmem:[#allocation11 + $0xf8] sm:$0xf0]  ;;  %v4652_v26 = vpop.f32.mrf.mxu3  ;;  %v688_v58 = vpop.f32.mrf.mxu1 }
  0xf0   :  { %6038 = vst [vmem:[#allocation80_spill] sm:$0xff] %v4625_v25  ;;  %v4645_v25 = vor.u32 %v3954_v6, %v3589_v62  ;;  %1326 = vmatpush.bf16.msrb.mxu3 %v4636_v14  ;;  %v4650_v44 = vor.u32 %v3950_v33, %v3591_v36  ;;  %v4029_v62 = vpop.eup %4028  ;;  %v660_v6 = vadd.f32 %v659_v55, %v4633_v7  ;;  %v3559_v36 = vld [vmem:[#allocation11 + $0xb8] sm:$0xf0] }
  0xf1   :  { %6039 = vst [vmem:[#allocation81_spill] sm:$0xff] %v4628_v53  ;;  %v3551_v53 = vld [vmem:[#allocation11 + $0xb0] sm:$0xf0]  ;;  %1301 = vmatpush.bf16.msrb.mxu1 %v4643_v50  ;;  %v4031_v13 = vpop.eup %4030 }
  0xf2   :  { %6040 = vst [vmem:[#allocation82_spill] sm:$0xff] %v4630_v41  ;;  %v3557_v41 = vld [vmem:[#allocation11 + $0x98] sm:$0xf]  ;;  %v4659_v33 = vor.u32 %v3941_v19, %v3551_v53  ;;  %1314 = vmatpush.bf16.msrb.mxu2 %v4645_v25  ;;  %v689_v55 = vadd.f32 %v688_v58, %v660_v6  ;;  %v4668_v53 = vperm.slane %v4460_v56, 3  ;;  %v3934_v19 = vld [vmem:[#allocation11 + $0x5c] sm:$0xf]  ;;  %v4674_v58 = vor.u32 %v3933_v27, %v3519_v24 }
  0xf3   :  { %6041 = vst [vmem:[#allocation83_spill] sm:$0xff] %v4633_v7  ;;  %v831_v35 = vmul.f32 0.5, %v4031_v13  ;;  %v3925_v56 = vld [vmem:[#allocation11 + $0x14] sm:$0xf]  ;;  %v4680_v13 = vor.u32 %v3934_v19, %v3527_v63 }
  0xf4   :  { %6042 = vst [vmem:[#allocation84_spill] sm:$0xff] %v4636_v14  ;;  %v3517_v14 = vld [vmem:[#allocation11 + $0x50] sm:$0xf]  ;;  %1327 = vmatpush.bf16.msrb.mxu3 %v4650_v44  ;;  %4032 = vtanh.f32 %v689_v55  ;;  %v3487_v6 = vld [vmem:[#allocation11 + $0x30] sm:$0xf0] }
  0xf5   :  { %6043 = vst [vmem:[#allocation85_spill] sm:$0xff] %v4640_v34  ;;  %v4665_v34 = vor.u32 %v3942_v28, %v3559_v36  ;;  %1302 = vmatpush.bf16.msrb.mxu1 %v4659_v33  ;;  %v3493_v55 = vld [vmem:[#allocation11 + $0x18] sm:$0xf]  ;;  %v4691_v63 = vor.u32 %v3925_v56, %v3487_v6  ;;  %v832_v19 = vadd.f32 0.5, %v831_v35 }
  0xf6   :  { %6044 = vst [vmem:[#allocation86_spill] sm:$0xff] %v4643_v50  ;;  %v3525_v50 = vld [vmem:[#allocation11 + $0x58] sm:$0xf]  ;;  %v717_v36 = vpop.f32.mrf.mxu2  ;;  %v4683_v27 = vpop.f32.mrf.mxu0 }
  0xf7   :  { %6045 = vst [vmem:[#allocation87_spill] sm:$0xff] %v4645_v25  ;;  %v746_v24 = vpop.f32.mrf.mxu3 }
  0xf8   :  { %6046 = vst [vmem:[#allocation88_spill] sm:$0xff] %v4647_v8  ;;  %v4657_v8 = vor.u32 %v3945_v5, %v3549_v54  ;;  %v3938_v54 = vld [vmem:[#allocation11 + $0x74] sm:$0xf0]  ;;  %v835_v5 = vmul.f32 0.5, %v4029_v62  ;;  %v3929_v62 = vld [vmem:[#allocation11 + $0x2c] sm:$0xf0]  ;;  %1328 = vmatpush.bf16.msrb.mxu3 %v4665_v34 }
  0xf9   :  { %6047 = vst [vmem:[#allocation89_spill] sm:$0xff] %v4650_v44  ;;  %v4677_v28 = vor.u32 %v3938_v54, %v3525_v50  ;;  %v4685_v50 = vpop.f32.mrf.mxu1  ;;  %1303 = vmatpush.bf16.msrb.mxu1 %v4674_v58 }
  0xfa   :  { %6048 = vst [vmem:[#allocation90_spill] sm:$0xff] %v4652_v26  ;;  %v4662_v26 = vor.u32 %v3946_v48, %v3557_v41  ;;  %1289 = vmatpush.bf16.msrb.mxu0 %v4657_v8  ;;  %v4672_v41 = vor.u32 %v3937_v45, %v3517_v14  ;;  %v3485_v48 = vld [vmem:[#allocation11 + $0x10] sm:$0xf]  ;;  %v718_v45 = vadd.f32 %v717_v36, %v4668_v53  ;;  %v3926_v14 = vld [vmem:[#allocation11 + $0x1c] sm:$0xf]  ;;  %v4033_v36 = vpop.eup %4032 }
  0xfb   :  { %6049 = vst [vmem:[#allocation91_spill] sm:$0xff] %v4657_v8  ;;  %v3930_v8 = vld [vmem:[#allocation11 + $0x34] sm:$0xf0]  ;;  %v4689_v54 = vor.u32 %v3929_v62, %v3485_v48  ;;  %v843_v29 = vmul.f32 %v4033_v36, %v832_v19 }
  0xfc   :  { %6050 = vst [vmem:[#allocation92_spill] sm:$0xff] %v4659_v33  ;;  %1315 = vmatpush.bf16.msrb.mxu2 %v4662_v26  ;;  %v836_v33 = vadd.f32 0.5, %v835_v5  ;;  %v4694_v5 = vor.u32 %v3930_v8, %v3493_v55  ;;  %1329 = vmatpush.bf16.msrb.mxu3 %v4680_v13 }
  0xfd   :  { %6051 = vst [vmem:[#allocation93_spill] sm:$0xff] %v4662_v26  ;;  %v3495_v26 = vld [vmem:[#allocation11 + $0x38] sm:$0xf0]  ;;  %1304 = vmatpush.bf16.msrb.mxu1 %v4691_v63 }
  0xfe   :  { %6052 = vst [vmem:[#allocation94_spill] sm:$0xff] %v4665_v34  ;;  %1290 = vmatpush.bf16.msrb.mxu0 %v4672_v41  ;;  %v747_v34 = vadd.f32 %v746_v24, %v718_v45  ;;  %v4697_v44 = vor.u32 %v3926_v14, %v3495_v26  ;;  %v842_v25 = vmul.f32 0.0, %v836_v33  ;;  %v4704_v35 = vpop.f32.mrf.mxu2  ;;  %v664_v26 = vpop.f32.mrf.mxu0 }
  0xff   :  { %6053 = vst [vmem:[#allocation95_spill] sm:$0xff] %v4668_v53  ;;  %v4708_v8 = vpop.f32.mrf.mxu3 }
 0x100   :  { %6054 = vst [vmem:[#allocation96_spill] sm:$0xff] %v4672_v41  ;;  %1316 = vmatpush.bf16.msrb.mxu2 %v4677_v28  ;;  %v838_v41 = vmul.f32 0.5, %v747_v34  ;;  %v4701_v48 = vadd.f32 %v843_v29, %v842_v25  ;;  %1330 = vmatpush.bf16.msrb.mxu3 %v4697_v44  ;;  %v665_v34 = vadd.f32 %v664_v26, %v4633_v7 }
 0x101   :  { %6055 = vst [vmem:[#allocation97_spill] sm:$0xff] %v4674_v58  ;;  %v693_v33 = vpop.f32.mrf.mxu1 }
 0x102   :  { %6056 = vst [vmem:[#allocation98_spill] sm:$0xff] %v4677_v28  ;;  %1291 = vmatpush.bf16.msrb.mxu0 %v4689_v54  ;;  %4034 = vtanh.f32 %v838_v41  ;;  %v4711_v62 = vadd.f32 %v693_v33, %v665_v34 }
 0x103   :  { %6057 = vst [vmem:[#allocation99_spill] sm:$0xff] %v4680_v13  ;;  %4036 = vtanh.f32 %v4701_v48  ;;  %v3813_v13 = vld [vmem:[#allocation13 + $0xa8] sm:$0xf] }
 0x104   :  { %6058 = vst [vmem:[#allocation100_spill] sm:$0xff] %v4689_v54  ;;  %1317 = vmatpush.bf16.msrb.mxu2 %v4694_v5  ;;  %v4011_v54 = vld [vmem:[#allocation13 + $0xc4] sm:$0xf] }
 0x105   :  { %6059 = vst [vmem:[#allocation101_spill] sm:$0xff] %v4691_v63 }
 0x106   :  { %6060 = vst [vmem:[#allocation102_spill] sm:$0xff] %v4694_v5  ;;  %v722_v6 = vpop.f32.mrf.mxu2  ;;  %v4713_v55 = vpop.f32.mrf.mxu0  ;;  %v3821_v5 = vld [vmem:[#allocation13 + $0xc0] sm:$0xf] }
 0x107   :  { %6061 = vst [vmem:[#allocation103_spill] sm:$0xff] %v4697_v44  ;;  %v723_v45 = vadd.f32 %v722_v6, %v4668_v53  ;;  %v751_v24 = vpop.f32.mrf.mxu3 }
 0x108   :  { %6062 = vst [vmem:[#allocation104_spill] sm:$0xff] %v4711_v62  ;;  %v4035_v56 = vpop.eup %4034  ;;  %v4016_v62 = vld [vmem:[#allocation13 + $0xec] sm:$0xf] }
 0x109   :  { %v840_v29 = vmul.f32 0.5, %v4035_v56  ;;  %v4037_v25 = vpop.eup %4036  ;;  %6063 = vst [vmem:[#allocation105_spill] sm:$0xff] %v4713_v55  ;;  %v4716_v19 = vpop.f32.mrf.mxu1  ;;  %v4718_v36 = vadd.f32 %v751_v24, %v723_v45  ;;  %v3837_v56 = vld [vmem:[#allocation13 + $0xe0] sm:$0xf]  ;;  %v3839_v24 = vld [vmem:[#allocation13 + $0xf0] sm:$0xf0] }
 0x10a   :  { %6064 = vst [vmem:[#allocation106_spill] sm:$0xff] %v4716_v19  ;;  %v4018_v19 = vld [vmem:[#allocation13 + $0xf4] sm:$0xf0] }
 0x10b   :  { %v841_v41 = vadd.f32 0.5, %v840_v29  ;;  %6065 = vst [vmem:[#allocation107_spill] sm:$0xff] %v4718_v36  ;;  %v4017_v29 = vld [vmem:[#allocation13 + $0xec] sm:$0xf0] }
 0x10c   :  { %v4731_v45 = vor.u32 %v4017_v29, %v3837_v56  ;;  %v3823_v56 = vld [vmem:[#allocation13 + $0xd0] sm:$0xf0] }
 0x10d   :  { %v846_v14 = vmul.f32 %v4037_v25, %v841_v41  ;;  %v4015_v25 = vld [vmem:[#allocation13 + $0xe4] sm:$0xf] }
 0x10e   :  { %v4726_v26 = vpop.f32.mrf.mxu2  ;;  %v669_v34 = vpop.f32.mrf.mxu0  ;;  %6068 = vst [vmem:[#allocation110_spill] sm:$0xff] %v4731_v45  ;;  %v4733_v55 = vor.u32 %v4015_v25, %v3839_v24  ;;  %v3829_v25 = vld [vmem:[#allocation13 + $0xc8] sm:$0xf]  ;;  %v4014_v24 = vld [vmem:[#allocation13 + $0xd4] sm:$0xf0] }
 0x10f   :  { %v4720_v44 = vpack.c.bf16 %v846_v14, %v846_v14  ;;  %6066 = vst [vmem:[#allocation108_spill] sm:$0xff] %v4726_v26  ;;  %v4728_v33 = vpop.f32.mrf.mxu3  ;;  %v670_v41 = vadd.f32 %v669_v34, %v4633_v7  ;;  %v3845_v14 = vld [vmem:[#allocation13 + $0xe8] sm:$0xf]  ;;  %v3847_v26 = vld [vmem:[#allocation13 + $0xf8] sm:$0xf0] }
 0x110   :  { %6067 = vst [vmem:[#allocation109_spill] sm:$0xff] %v4728_v33  ;;  %v4735_v36 = vor.u32 %v4018_v19, %v3845_v14  ;;  %v4740_v33 = vor.u32 %v4016_v62, %v3847_v26  ;;  %v4013_v34 = vld [vmem:[#allocation13 + $0xcc] sm:$0xf0]  ;;  %v4746_v19 = vor.u32 %v4011_v54, %v3823_v56  ;;  %v4012_v14 = vld [vmem:[#allocation13 + $0xcc] sm:$0xf] }
 0x111   :  { %1240 = vmatmul.bf16.vlgmr.msra.gmra.mxu0 %v4720_v44  ;;  %1253 = vmatmul.bf16.vlgmr.msra.gmra.mxu1 %v4720_v44  ;;  %v698_v6 = vpop.f32.mrf.mxu1  ;;  %6069 = vst [vmem:[#allocation111_spill] sm:$0xff] %v4733_v55  ;;  %v4744_v29 = vor.u32 %v4013_v34, %v3821_v5  ;;  %v3831_v62 = vld [vmem:[#allocation13 + $0xd8] sm:$0xf0]  ;;  %v3805_v26 = vld [vmem:[#allocation13 + $0xa0] sm:$0xf] }
 0x112   :  { %1266 = vmatmul.bf16.vlgmr.msra.gmra.mxu2 %v4720_v44  ;;  %1279 = vmatmul.bf16.vlgmr.msra.gmra.mxu3 %v4720_v44  ;;  %6070 = vst [vmem:[#allocation112_spill] sm:$0xff] %v4735_v36  ;;  %v4737_v63 = vadd.f32 %v698_v6, %v670_v41  ;;  %v4749_v41 = vor.u32 %v4014_v24, %v3829_v25  ;;  %v4009_v6 = vld [vmem:[#allocation13 + $0xac] sm:$0xf0]  ;;  %v4010_v5 = vld [vmem:[#allocation13 + $0xb4] sm:$0xf0] }
 0x113   :  { %1555 = vmatpush.bf16.msra.mxu0 %v4731_v45  ;;  %6072 = vst [vmem:[#allocation114_spill] sm:$0xff] %v4740_v33  ;;  %1568 = vmatpush.bf16.msra.mxu1 %v4733_v55  ;;  %v4007_v45 = vld [vmem:[#allocation13 + $0xa4] sm:$0xf]  ;;  %v3807_v55 = vld [vmem:[#allocation13 + $0xb0] sm:$0xf0]  ;;  %v4754_v54 = vor.u32 %v4009_v6, %v3805_v26 }
 0x114   :  { %6071 = vst [vmem:[#allocation113_spill] sm:$0xff] %v4737_v63  ;;  %1581 = vmatpush.bf16.msra.mxu2 %v4735_v36  ;;  %1594 = vmatpush.bf16.msra.mxu3 %v4740_v33  ;;  %v4751_v63 = vor.u32 %v4012_v14, %v3831_v62  ;;  %v4761_v24 = vor.u32 %v4007_v45, %v3807_v55  ;;  %v4008_v62 = vld [vmem:[#allocation13 + $0xac] sm:$0xf]  ;;  %v3815_v33 = vld [vmem:[#allocation13 + $0xb8] sm:$0xf0] }
 0x115   :  { %6073 = vst [vmem:[#allocation115_spill] sm:$0xff] %v4744_v29  ;;  %v4763_v14 = vor.u32 %v4010_v5, %v3813_v13 }
 0x116   :  { %6074 = vst [vmem:[#allocation116_spill] sm:$0xff] %v4746_v19  ;;  %v727_v36 = vpop.f32.mrf.mxu2  ;;  %v4756_v34 = vpop.f32.mrf.mxu0 }
 0x117   :  { %6075 = vst [vmem:[#allocation117_spill] sm:$0xff] %v4749_v41  ;;  %1556 = vmatpush.bf16.msra.mxu0 %v4744_v29  ;;  %v728_v56 = vadd.f32 %v727_v36, %v4668_v53  ;;  %v756_v25 = vpop.f32.mrf.mxu3  ;;  %1569 = vmatpush.bf16.msra.mxu1 %v4746_v19  ;;  %v4771_v36 = vor.u32 %v4008_v62, %v3815_v33 }
 0x118   :  { %6076 = vst [vmem:[#allocation118_spill] sm:$0xff] %v4751_v63  ;;  %1582 = vmatpush.bf16.msra.mxu2 %v4749_v41  ;;  %1595 = vmatpush.bf16.msra.mxu3 %v4751_v63 }
 0x119   :  { %6077 = vst [vmem:[#allocation119_spill] sm:$0xff] %v4754_v54  ;;  %v4765_v28 = vpop.f32.mrf.mxu1  ;;  %v4768_v26 = vadd.f32 %v756_v25, %v728_v56 }
 0x11a   :  { %6078 = vst [vmem:[#allocation120_spill] sm:$0xff] %v4756_v34  ;;  %v3789_v34 = vld [vmem:[#allocation13 + $0x80] sm:$0xf] }
 0x11b   :  { %6079 = vst [vmem:[#allocation121_spill] sm:$0xff] %v4761_v24  ;;  %1557 = vmatpush.bf16.msra.mxu0 %v4754_v54  ;;  %1570 = vmatpush.bf16.msra.mxu1 %v4761_v24  ;;  %v4006_v24 = vld [vmem:[#allocation13 + $0x94] sm:$0xf0] }
 0x11c   :  { %6080 = vst [vmem:[#allocation122_spill] sm:$0xff] %v4763_v14  ;;  %1583 = vmatpush.bf16.msra.mxu2 %v4763_v14  ;;  %1596 = vmatpush.bf16.msra.mxu3 %v4771_v36  ;;  %v3797_v14 = vld [vmem:[#allocation13 + $0x88] sm:$0xf] }
 0x11d   :  { %6081 = vst [vmem:[#allocation123_spill] sm:$0xff] %v4765_v28 }
 0x11e   :  { %6082 = vst [vmem:[#allocation124_spill] sm:$0xff] %v4768_v26  ;;  %v4779_v13 = vpop.f32.mrf.mxu2  ;;  %v674_v55 = vpop.f32.mrf.mxu0  ;;  %v4003_v26 = vld [vmem:[#allocation13 + $0x84] sm:$0xf] }
 0x11f   :  { %6083 = vst [vmem:[#allocation125_spill] sm:$0xff] %v4771_v36  ;;  %v4782_v45 = vpop.f32.mrf.mxu3  ;;  %v675_v33 = vadd.f32 %v674_v55, %v4633_v7  ;;  %v3791_v36 = vld [vmem:[#allocation13 + $0x90] sm:$0xf0]  ;;  %v4794_v55 = vor.u32 %v4006_v24, %v3797_v14  ;;  %v3781_v24 = vld [vmem:[#allocation13 + $0x68] sm:$0xf] }
 0x120   :  { %6084 = vst [vmem:[#allocation126_spill] sm:$0xff] %v4779_v13  ;;  %v4002_v14 = vld [vmem:[#allocation13 + $0x74] sm:$0xf0] }
 0x121   :  { %1292 = vmatmul.bf16.vlgmr.msrb.gmra.mxu0 %v4720_v44  ;;  %1305 = vmatmul.bf16.vlgmr.msrb.gmra.mxu1 %v4720_v44  ;;  %6085 = vst [vmem:[#allocation127_spill] sm:$0xff] %v4782_v45  ;;  %v703_v6 = vpop.f32.mrf.mxu1  ;;  %v4792_v45 = vor.u32 %v4003_v26, %v3791_v36  ;;  %v3775_v26 = vld [vmem:[#allocation13 + $0x70] sm:$0xf0] }
 0x122   :  { %1318 = vmatmul.bf16.vlgmr.msrb.gmra.mxu2 %v4720_v44  ;;  %1331 = vmatmul.bf16.vlgmr.msrb.gmra.mxu3 %v4720_v44  ;;  %v4785_v5 = vadd.f32 %v703_v6, %v675_v33  ;;  %v4005_v44 = vld [vmem:[#allocation13 + $0x8c] sm:$0xf0]  ;;  %6090 = vst [vmem:[#allocation132_spill] sm:$0xff] %v4794_v55  ;;  %v4004_v33 = vld [vmem:[#allocation13 + $0x8c] sm:$0xf] }
 0x123   :  { %v4790_v13 = vor.u32 %v4005_v44, %v3789_v34  ;;  %6089 = vst [vmem:[#allocation131_spill] sm:$0xff] %v4792_v45  ;;  %v3799_v6 = vld [vmem:[#allocation13 + $0x98] sm:$0xf0]  ;;  %1571 = vmatpush.bf16.msra.mxu1 %v4792_v45  ;;  %1584 = vmatpush.bf16.msra.mxu2 %v4794_v55  ;;  %v4001_v34 = vld [vmem:[#allocation13 + $0x6c] sm:$0xf0] }
 0x124   :  { %6086 = vst [vmem:[#allocation128_spill] sm:$0xff] %v4785_v5 }
 0x125   :  { %6088 = vst [vmem:[#allocation130_spill] sm:$0xff] %v4790_v13  ;;  %1558 = vmatpush.bf16.msra.mxu0 %v4790_v13 }
 0x126   :  { %v732_v56 = vpop.f32.mrf.mxu2 }
 0x127   :  { %v733_v25 = vadd.f32 %v732_v56, %v4668_v53  ;;  %v761_v62 = vpop.f32.mrf.mxu3  ;;  %v4797_v56 = vor.u32 %v4004_v33, %v3799_v6  ;;  %v4000_v33 = vld [vmem:[#allocation13 + $0x6c] sm:$0xf]  ;;  %v3783_v6 = vld [vmem:[#allocation13 + $0x78] sm:$0xf0] }
 0x128   :  { %v4809_v5 = vor.u32 %v4000_v33, %v3783_v6  ;;  %v3996_v33 = vld [vmem:[#allocation13 + $0x4c] sm:$0xf]  ;;  %v3767_v6 = vld [vmem:[#allocation13 + $0x58] sm:$0xf0] }
 0x129   :  { %v4788_v28 = vadd.f32 %v761_v62, %v733_v25  ;;  %6091 = vst [vmem:[#allocation133_spill] sm:$0xff] %v4797_v56  ;;  %v3773_v25 = vld [vmem:[#allocation13 + $0x60] sm:$0xf]  ;;  %v3999_v62 = vld [vmem:[#allocation13 + $0x64] sm:$0xf]  ;;  %1597 = vmatpush.bf16.msra.mxu3 %v4797_v56 }
 0x12a   :  { %v4802_v44 = vor.u32 %v4001_v34, %v3773_v25  ;;  %v4804_v36 = vor.u32 %v3999_v62, %v3775_v26  ;;  %6095 = vst [vmem:[#allocation137_spill] sm:$0xff] %v4809_v5  ;;  %v3757_v56 = vld [vmem:[#allocation13 + $0x40] sm:$0xf]  ;;  %v3997_v25 = vld [vmem:[#allocation13 + $0x4c] sm:$0xf0] }
 0x12b   :  { %6087 = vst [vmem:[#allocation129_spill] sm:$0xff] %v4788_v28  ;;  %v4806_v28 = vor.u32 %v4002_v14, %v3781_v24  ;;  %v3995_v34 = vld [vmem:[#allocation13 + $0x44] sm:$0xf]  ;;  %v4814_v55 = vor.u32 %v3997_v25, %v3757_v56  ;;  %v3759_v62 = vld [vmem:[#allocation13 + $0x50] sm:$0xf0] }
 0x12c   :  { %6092 = vst [vmem:[#allocation134_spill] sm:$0xff] %v4802_v44  ;;  %1559 = vmatpush.bf16.msra.mxu0 %v4802_v44  ;;  %1572 = vmatpush.bf16.msra.mxu1 %v4804_v36  ;;  %v3765_v26 = vld [vmem:[#allocation13 + $0x48] sm:$0xf]  ;;  %v3998_v24 = vld [vmem:[#allocation13 + $0x54] sm:$0xf0]  ;;  %v4816_v14 = vor.u32 %v3995_v34, %v3759_v62 }
 0x12d   :  { %6093 = vst [vmem:[#allocation135_spill] sm:$0xff] %v4804_v36  ;;  %1585 = vmatpush.bf16.msra.mxu2 %v4806_v28  ;;  %1598 = vmatpush.bf16.msra.mxu3 %v4809_v5  ;;  %v4818_v45 = vor.u32 %v3998_v24, %v3765_v26  ;;  %v4821_v36 = vor.u32 %v3996_v33, %v3767_v6  ;;  %v3741_v5 = vld [vmem:[#allocation13 + $0x20] sm:$0xf]  ;;  %v3993_v56 = vld [vmem:[#allocation13 + $0x2c] sm:$0xf0] }
 0x12e   :  { %6094 = vst [vmem:[#allocation136_spill] sm:$0xff] %v4806_v28  ;;  %v3991_v25 = vld [vmem:[#allocation13 + $0x24] sm:$0xf]  ;;  %v4826_v28 = vor.u32 %v3993_v56, %v3741_v5  ;;  %v3743_v34 = vld [vmem:[#allocation13 + $0x30] sm:$0xf0] }
 0x12f   :  { %6096 = vst [vmem:[#allocation138_spill] sm:$0xff] %v4814_v55  ;;  %v3749_v62 = vld [vmem:[#allocation13 + $0x28] sm:$0xf]  ;;  %v3994_v26 = vld [vmem:[#allocation13 + $0x34] sm:$0xf0]  ;;  %v4828_v24 = vor.u32 %v3991_v25, %v3743_v34 }
 0x130   :  { %6097 = vst [vmem:[#allocation139_spill] sm:$0xff] %v4816_v14  ;;  %1560 = vmatpush.bf16.msra.mxu0 %v4814_v55  ;;  %1573 = vmatpush.bf16.msra.mxu1 %v4816_v14  ;;  %v4830_v44 = vor.u32 %v3994_v26, %v3749_v62  ;;  %v3992_v33 = vld [vmem:[#allocation13 + $0x2c] sm:$0xf]  ;;  %v3751_v6 = vld [vmem:[#allocation13 + $0x38] sm:$0xf0] }
 0x131   :  { %6098 = vst [vmem:[#allocation140_spill] sm:$0xff] %v4818_v45  ;;  %1586 = vmatpush.bf16.msra.mxu2 %v4818_v45  ;;  %1599 = vmatpush.bf16.msra.mxu3 %v4821_v36  ;;  %v4833_v14 = vor.u32 %v3992_v33, %v3751_v6  ;;  %v3725_v5 = vld [vmem:[#allocation13] sm:$0xf]  ;;  %v3989_v56 = vld [vmem:[#allocation13 + $0xc] sm:$0xf0] }
 0x132   :  { %6099 = vst [vmem:[#allocation141_spill] sm:$0xff] %v4821_v36  ;;  %v3987_v36 = vld [vmem:[#allocation13 + $0x4] sm:$0xf]  ;;  %v4838_v45 = vor.u32 %v3989_v56, %v3725_v5  ;;  %v3727_v25 = vld [vmem:[#allocation13 + $0x10] sm:$0xf0]  ;;  %v4855_v5 = vpop.f32.mrf.mxu1  ;;  %v546_v56 = vadd.f32 %v4452_v51, %v4472_v2 }
 0x133   :  { %6100 = vst [vmem:[#allocation142_spill] sm:$0xff] %v4826_v28  ;;  %v3733_v34 = vld [vmem:[#allocation13 + $0x8] sm:$0xf]  ;;  %v3990_v62 = vld [vmem:[#allocation13 + $0x14] sm:$0xf0]  ;;  %v4840_v26 = vor.u32 %v3987_v36, %v3727_v25  ;;  %v4853_v36 = vpop.f32.mrf.mxu0  ;;  %v604_v25 = vadd.f32 %v4474_v3, %v4491_v20  ;;  %v662_v20 = vadd.f32 %v4683_v27, %v4633_v7  ;;  %v6114_v2 = vld [vmem:[#allocation59_spill] sm:$0xff] }
 0x134   :  { %6101 = vst [vmem:[#allocation143_spill] sm:$0xff] %v4828_v24  ;;  %1561 = vmatpush.bf16.msra.mxu0 %v4826_v28  ;;  %1574 = vmatpush.bf16.msra.mxu1 %v4828_v24  ;;  %v4842_v55 = vor.u32 %v3990_v62, %v3733_v34  ;;  %v3988_v33 = vld [vmem:[#allocation13 + $0xc] sm:$0xf]  ;;  %v3735_v6 = vld [vmem:[#allocation13 + $0x18] sm:$0xf0]  ;;  %v575_v34 = vadd.f32 %v4455_v52, %v546_v56 }
 0x135   :  { %6102 = vst [vmem:[#allocation144_spill] sm:$0xff] %v4830_v44  ;;  %1587 = vmatpush.bf16.msra.mxu2 %v4830_v44  ;;  %1600 = vmatpush.bf16.msra.mxu3 %v4833_v14  ;;  %v4845_v24 = vor.u32 %v3988_v33, %v3735_v6  ;;  %v633_v62 = vadd.f32 %v4477_v4, %v604_v25  ;;  %v4869_v33 = vpop.f32.mrf.mxu2  ;;  %v4871_v6 = vpop.f32.mrf.mxu3 }
 0x136   :  { %6103 = vst [vmem:[#allocation145_spill] sm:$0xff] %v4833_v14  ;;  %v691_v56 = vadd.f32 %v4685_v50, %v662_v20  ;;  %v798_v20 = vld [vmem:[%s5748_s5] sm:$0xf] }
 0x137   :  { %6104 = vst [vmem:[#allocation146_spill] sm:$0xff] %v4838_v45 }
 0x138   :  { %6105 = vst [vmem:[#allocation147_spill] sm:$0xff] %v4840_v26  ;;  %1562 = vmatpush.bf16.msra.mxu0 %v4838_v45  ;;  %1575 = vmatpush.bf16.msra.mxu1 %v4840_v26 }
 0x139   :  { %6106 = vst [vmem:[#allocation148_spill] sm:$0xff] %v4842_v55  ;;  %1588 = vmatpush.bf16.msra.mxu2 %v4842_v55  ;;  %1601 = vmatpush.bf16.msra.mxu3 %v4845_v24 }
 0x13a   :  { %6107 = vst [vmem:[#allocation149_spill] sm:$0xff] %v4845_v24 }
 0x13b   :  { %6108 = vst [vmem:[#allocation150_spill] sm:$0xff] %v4853_v36 }
 0x13c   :  { %1637 = vmatpush.bf16.msrb.mxu0 %v4424_v49  ;;  %1650 = vmatpush.bf16.msrb.mxu1 %v4426_v31  ;;  %6109 = vst [vmem:[#allocation151_spill] sm:$0xff] %v4855_v5 }
 0x13d   :  { %1663 = vmatpush.bf16.msrb.mxu2 %v4428_v32  ;;  %1676 = vmatpush.bf16.msrb.mxu3 %v4437_v38  ;;  %6110 = vst [vmem:[#allocation152_spill] sm:$0xff] %v4869_v33 }
 0x13e   :  { %6111 = vst [vmem:[#allocation153_spill] sm:$0xff] %v4871_v6 }
 0x140   :  { %1638 = vmatpush.bf16.msrb.mxu0 %v4439_v42  ;;  %1651 = vmatpush.bf16.msrb.mxu1 %v4441_v43 }
 0x141   :  { %1664 = vmatpush.bf16.msrb.mxu2 %v4444_v47  ;;  %1677 = vmatpush.bf16.msrb.mxu3 %v4462_v57 }
 0x144   :  { %1639 = vmatpush.bf16.msrb.mxu0 %v4464_v60  ;;  %1652 = vmatpush.bf16.msrb.mxu1 %v4467_v0 }
 0x145   :  { %1665 = vmatpush.bf16.msrb.mxu2 %v4469_v1  ;;  %1678 = vmatpush.bf16.msrb.mxu3 %v4484_v12 }
 0x148   :  { %1640 = vmatpush.bf16.msrb.mxu0 %v4486_v16  ;;  %1653 = vmatpush.bf16.msrb.mxu1 %v4488_v17 }
 0x149   :  { %1666 = vmatpush.bf16.msrb.mxu2 %v4494_v21  ;;  %1679 = vmatpush.bf16.msrb.mxu3 %v4506_v30 }
 0x14c   :  { %1641 = vmatpush.bf16.msrb.mxu0 %v4508_v39  ;;  %1654 = vmatpush.bf16.msrb.mxu1 %v4510_v40 }
 0x14d   :  { %1667 = vmatpush.bf16.msrb.mxu2 %v4513_v46  ;;  %1680 = vmatpush.bf16.msrb.mxu3 %v4522_v61 }
 0x150   :  { %1642 = vmatpush.bf16.msrb.mxu0 %v4528_v10  ;;  %1655 = vmatpush.bf16.msrb.mxu1 %v4530_v15 }
 0x151   :  { %1668 = vmatpush.bf16.msrb.mxu2 %v4532_v18  ;;  %1681 = vmatpush.bf16.msrb.mxu3 %v4535_v23 }
 0x154   :  { %1643 = vmatpush.bf16.msrb.mxu0 %v4543_v37  ;;  %1656 = vmatpush.bf16.msrb.mxu1 %v4547_v59  ;;  %v4912_v59 = vperm.slane %v798_v20, 2 }
 0x155   :  { %1669 = vmatpush.bf16.msrb.mxu2 %v4552_v9  ;;  %1682 = vmatpush.bf16.msrb.mxu3 %v4554_v11  ;;  %v6115_v9 = vld [vmem:[#allocation60_spill] sm:$0xff]  ;;  %v4914_v11 = vperm.slane %v798_v20, 3 }
 0x158   :  { %1644 = vmatpush.bf16.msrb.mxu0 %v4559_v22  ;;  %1657 = vmatpush.bf16.msrb.mxu1 %v6114_v2 }
 0x159   :  { %1670 = vmatpush.bf16.msrb.mxu2 %v6115_v9 }
 0x18e   :  { %v1241_v51 = vpop.f32.mrf.mxu0  ;;  %v1254_v3 = vpop.f32.mrf.mxu1 }
 0x18f   :  { %v1614_v5 = vadd.f32 %v1241_v51, %v575_v34  ;;  %v1615_v36 = vadd.f32 %v1254_v3, %v633_v62 }
 0x191   :  { %v1618_v52 = vmul.f32 0.5, %v1614_v5  ;;  %v1622_v4 = vmul.f32 0.5, %v1615_v36 }
 0x193   :  { %4038 = vtanh.f32 %v1618_v52  ;;  %v4896_v52 = vperm.slane %v798_v20, 0 }
 0x194   :  { %4040 = vtanh.f32 %v1622_v4  ;;  %v4898_v4 = vperm.slane %v798_v20, 1  ;;  %v720_v20 = vadd.f32 %v4704_v35, %v4668_v53  ;;  %v6131_v53 = vld [vmem:[#allocation82_spill] sm:$0xff] }
 0x195   :  { %v1267_v25 = vpop.f32.mrf.mxu2  ;;  %v4884_v34 = vpop.f32.mrf.mxu3  ;;  %6112 = vst [vmem:[#allocation154_spill] sm:$0xff] %v4896_v52 }
 0x196   :  { %v1616_v27 = vadd.f32 %v1267_v25, %v691_v56  ;;  %v1243_v36 = vpop.f32.mrf.mxu0  ;;  %v1256_v5 = vpop.f32.mrf.mxu1  ;;  %6113 = vst [vmem:[#allocation155_spill] sm:$0xff] %v4898_v4 }
 0x198   :  { %4042 = vtanh.f32 %v1616_v27 }
 0x199   :  { %v4039_v50 = vpop.eup %4038 }
 0x19a   :  { %v4041_v62 = vpop.eup %4040  ;;  %v1620_v51 = vmul.f32 0.5, %v4039_v50 }
 0x19b   :  { %v1624_v3 = vmul.f32 0.5, %v4041_v62 }
 0x19c   :  { %v1621_v56 = vadd.f32 0.5, %v1620_v51 }
 0x19d   :  { %v1625_v25 = vadd.f32 0.5, %v1624_v3  ;;  %v1269_v27 = vpop.f32.mrf.mxu2  ;;  %v1282_v36 = vpop.f32.mrf.mxu3 }
 0x19e   :  { %v4043_v5 = vpop.eup %4042  ;;  %v1293_v6 = vpop.f32.mrf.mxu0 }
 0x19f   :  { %v1306_v50 = vpop.f32.mrf.mxu1  ;;  %v1631_v62 = vmul.f32 %v1625_v25, %v4701_v48  ;;  %v1632_v33 = vmul.f32 %v4043_v5, %v1621_v56  ;;  %v1340_v7 = vadd.f32 %v1293_v6, %v4896_v52  ;;  %v6116_v48 = vld [vmem:[#allocation61_spill] sm:$0xff] }
 0x1a0   :  { %v1341_v51 = vadd.f32 %v1306_v50, %v4898_v4  ;;  %1683 = vmatpush.bf16.msrb.mxu3 %v6116_v48 }
 0x1a1   :  { %v4908_v3 = vadd.f32 %v1632_v33, %v1631_v62  ;;  %v1344_v27 = vmul.f32 0.5, %v1340_v7 }
 0x1a2   :  { %v1348_v36 = vmul.f32 0.5, %v1341_v51 }
 0x1a3   :  { %4044 = vtanh.f32 %v1344_v27 }
 0x1a4   :  { %4046 = vtanh.f32 %v1348_v36 }
 0x1a5   :  { %v1319_v6 = vpop.f32.mrf.mxu2  ;;  %v1332_v56 = vpop.f32.mrf.mxu3 }
 0x1a6   :  { %v1342_v25 = vadd.f32 %v1319_v6, %v4912_v59  ;;  %v1343_v33 = vadd.f32 %v1332_v56, %v4914_v11  ;;  %v1295_v7 = vpop.f32.mrf.mxu0  ;;  %v749_v56 = vadd.f32 %v4708_v8, %v720_v20  ;;  %v6118_v8 = vld [vmem:[#allocation64_spill] sm:$0xff] }
 0x1a7   :  { %v1308_v5 = vpop.f32.mrf.mxu1 }
 0x1a8   :  { %4048 = vtanh.f32 %v1342_v25  ;;  %v1353_v50 = vmul.f32 0.5, %v1343_v33  ;;  %v1617_v25 = vadd.f32 %v4884_v34, %v749_v56  ;;  %v6119_v34 = vld [vmem:[#allocation66_spill] sm:$0xff]  ;;  %v6123_v56 = vld [vmem:[#allocation71_spill] sm:$0xff] }
 0x1a9   :  { %v4045_v62 = vpop.eup %4044 }
 0x1aa   :  { %v4047_v51 = vpop.eup %4046  ;;  %v1346_v4 = vmul.f32 0.5, %v4045_v62  ;;  %4050 = vtanh.f32 %v1353_v50  ;;  %v1627_v35 = vmul.f32 0.5, %v1617_v25 }
 0x1ab   :  { %v1350_v52 = vmul.f32 0.5, %v4047_v51 }
 0x1ac   :  { %v1347_v27 = vadd.f32 0.5, %v1346_v4 }
 0x1ad   :  { %v1321_v36 = vpop.f32.mrf.mxu2  ;;  %v1334_v48 = vpop.f32.mrf.mxu3  ;;  %v1351_v2 = vadd.f32 0.5, %v1350_v52  ;;  %v6120_v52 = vld [vmem:[#allocation67_spill] sm:$0xff] }
 0x1ae   :  { %v4049_v9 = vpop.eup %4048  ;;  %v6122_v36 = vld [vmem:[#allocation69_spill] sm:$0xff] }
 0x1af   :  { %v1358_v6 = vmul.f32 %v4049_v9, %v1347_v27  ;;  %v1357_v7 = vmul.f32 0.0, %v1351_v2  ;;  %v6117_v2 = vld [vmem:[#allocation63_spill] sm:$0xff]  ;;  %v6121_v27 = vld [vmem:[#allocation68_spill] sm:$0xff] }
 0x1b0   :  { %v4051_v5 = vpop.eup %4050 }
 0x1b1   :  { %v4923_v33 = vadd.f32 %v1358_v6, %v1357_v7  ;;  %v1355_v62 = vmul.f32 0.5, %v4051_v5  ;;  %v6124_v7 = vld [vmem:[#allocation72_spill] sm:$0xff] }
 0x1b3   :  { %4052 = vtanh.f32 %v4923_v33  ;;  %v1356_v51 = vadd.f32 0.5, %v1355_v62  ;;  %v6125_v62 = vld [vmem:[#allocation73_spill] sm:$0xff] }
 0x1b4   :  { %4054 = vtanh.f32 %v1627_v35  ;;  %v6126_v35 = vld [vmem:[#allocation74_spill] sm:$0xff] }
 0x1b5   :  { %4056 = vtanh.f32 %v4908_v3 }
 0x1b9   :  { %v4053_v50 = vpop.eup %4052 }
 0x1ba   :  { %v1361_v4 = vmul.f32 %v4053_v50, %v1356_v51  ;;  %v4055_v9 = vpop.eup %4054  ;;  %v6127_v51 = vld [vmem:[#allocation75_spill] sm:$0xff]  ;;  %v6128_v50 = vld [vmem:[#allocation76_spill] sm:$0xff] }
 0x1bb   :  { %v1629_v20 = vmul.f32 0.5, %v4055_v9  ;;  %v4057_v6 = vpop.eup %4056  ;;  %v6130_v9 = vld [vmem:[#allocation81_spill] sm:$0xff] }
 0x1bc   :  { %v1362_v48 = vpack.c.bf16 %v1361_v4, %v1361_v4 }
 0x1bd   :  { %v1630_v5 = vadd.f32 0.5, %v1629_v20  ;;  %v6133_v20 = vld [vmem:[#allocation85_spill] sm:$0xff] }
 0x1be   :  { %1563 = vmatmul.bf16.vlgmr.msra.gmra.mxu0 %v1362_v48  ;;  %1576 = vmatmul.bf16.vlgmr.msra.gmra.mxu1 %v1362_v48 }
 0x1bf   :  { %1589 = vmatmul.bf16.vlgmr.msra.gmra.mxu2 %v1362_v48  ;;  %1602 = vmatmul.bf16.vlgmr.msra.gmra.mxu3 %v1362_v48  ;;  %v1635_v25 = vmul.f32 %v4057_v6, %v1630_v5  ;;  %v6129_v48 = vld [vmem:[#allocation79_spill] sm:$0xff]  ;;  %v6134_v6 = vld [vmem:[#allocation86_spill] sm:$0xff] }
 0x1c0   :  { %1689 = vmatpush.bf16.msra.mxu0 %v6117_v2  ;;  %1702 = vmatpush.bf16.msra.mxu1 %v6118_v8  ;;  %v6135_v5 = vld [vmem:[#allocation87_spill] sm:$0xff] }
 0x1c1   :  { %1715 = vmatpush.bf16.msra.mxu2 %v6119_v34  ;;  %1728 = vmatpush.bf16.msra.mxu3 %v6120_v52  ;;  %v1636_v4 = vpack.c.bf16 %v1635_v25, %v1635_v25  ;;  %v6137_v25 = vld [vmem:[#allocation91_spill] sm:$0xff] }
 0x1c4   :  { %1690 = vmatpush.bf16.msra.mxu0 %v6121_v27  ;;  %1703 = vmatpush.bf16.msra.mxu1 %v6122_v36 }
 0x1c5   :  { %1716 = vmatpush.bf16.msra.mxu2 %v6123_v56  ;;  %1729 = vmatpush.bf16.msra.mxu3 %v6124_v7  ;;  %v6132_v56 = vld [vmem:[#allocation84_spill] sm:$0xff] }
 0x1c8   :  { %1691 = vmatpush.bf16.msra.mxu0 %v6125_v62  ;;  %1704 = vmatpush.bf16.msra.mxu1 %v6126_v35 }
 0x1c9   :  { %1717 = vmatpush.bf16.msra.mxu2 %v6127_v51  ;;  %1730 = vmatpush.bf16.msra.mxu3 %v6128_v50  ;;  %v6136_v50 = vld [vmem:[#allocation89_spill] sm:$0xff]  ;;  %v6142_v51 = vld [vmem:[#allocation98_spill] sm:$0xff] }
 0x1cc   :  { %1692 = vmatpush.bf16.msra.mxu0 %v6129_v48  ;;  %1705 = vmatpush.bf16.msra.mxu1 %v6130_v9  ;;  %v6138_v48 = vld [vmem:[#allocation92_spill] sm:$0xff]  ;;  %v6139_v9 = vld [vmem:[#allocation93_spill] sm:$0xff] }
 0x1cd   :  { %1718 = vmatpush.bf16.msra.mxu2 %v6131_v53  ;;  %1731 = vmatpush.bf16.msra.mxu3 %v6132_v56  ;;  %v6140_v53 = vld [vmem:[#allocation94_spill] sm:$0xff]  ;;  %v6141_v56 = vld [vmem:[#allocation96_spill] sm:$0xff] }
 0x1ce   :  { %1645 = vmatmul.bf16.vlgmr.msrb.gmra.mxu0 %v1636_v4  ;;  %1658 = vmatmul.bf16.vlgmr.msrb.gmra.mxu1 %v1636_v4 }
 0x1cf   :  { %1671 = vmatmul.bf16.vlgmr.msrb.gmra.mxu2 %v1636_v4  ;;  %1684 = vmatmul.bf16.vlgmr.msrb.gmra.mxu3 %v1636_v4 }
 0x1d0   :  { %1693 = vmatpush.bf16.msra.mxu0 %v6133_v20  ;;  %1706 = vmatpush.bf16.msra.mxu1 %v6134_v6  ;;  %v6143_v20 = vld [vmem:[#allocation99_spill] sm:$0xff]  ;;  %v6144_v6 = vld [vmem:[#allocation100_spill] sm:$0xff] }
 0x1d1   :  { %1719 = vmatpush.bf16.msra.mxu2 %v6135_v5  ;;  %1732 = vmatpush.bf16.msra.mxu3 %v6136_v50  ;;  %v6145_v5 = vld [vmem:[#allocation101_spill] sm:$0xff]  ;;  %v6146_v50 = vld [vmem:[#allocation102_spill] sm:$0xff] }
 0x1d4   :  { %1694 = vmatpush.bf16.msra.mxu0 %v6137_v25  ;;  %1707 = vmatpush.bf16.msra.mxu1 %v6138_v48  ;;  %v6147_v25 = vld [vmem:[#allocation103_spill] sm:$0xff]  ;;  %v6148_v48 = vld [vmem:[#allocation110_spill] sm:$0xff] }
 0x1d5   :  { %1720 = vmatpush.bf16.msra.mxu2 %v6139_v9  ;;  %1733 = vmatpush.bf16.msra.mxu3 %v6140_v53  ;;  %v6149_v9 = vld [vmem:[#allocation111_spill] sm:$0xff] }
 0x1d8   :  { %1695 = vmatpush.bf16.msra.mxu0 %v6141_v56  ;;  %1708 = vmatpush.bf16.msra.mxu1 %v4674_v58  ;;  %v6150_v58 = vld [vmem:[#allocation112_spill] sm:$0xff] }
 0x1d9   :  { %1721 = vmatpush.bf16.msra.mxu2 %v6142_v51  ;;  %1734 = vmatpush.bf16.msra.mxu3 %v6143_v20  ;;  %v6151_v51 = vld [vmem:[#allocation114_spill] sm:$0xff] }
 0x1dc   :  { %1696 = vmatpush.bf16.msra.mxu0 %v6144_v6  ;;  %1709 = vmatpush.bf16.msra.mxu1 %v6145_v5 }
 0x1dd   :  { %1722 = vmatpush.bf16.msra.mxu2 %v6146_v50  ;;  %1735 = vmatpush.bf16.msra.mxu3 %v6147_v25  ;;  %v6154_v25 = vld [vmem:[#allocation125_spill] sm:$0xff] }
 0x1df   :  { %1697 = vmatmul.bf16.vlgmr.msra.gmra.mxu0 %v1636_v4  ;;  %1710 = vmatmul.bf16.vlgmr.msra.gmra.mxu1 %v1636_v4 }
 0x1e0   :  { %1768 = vmatpush.bf16.msrb.mxu0 %v6148_v48  ;;  %1781 = vmatpush.bf16.msrb.mxu1 %v6149_v9  ;;  %v6152_v48 = vld [vmem:[#allocation121_spill] sm:$0xff]  ;;  %v6153_v9 = vld [vmem:[#allocation122_spill] sm:$0xff] }
 0x1e1   :  { %1723 = vmatmul.bf16.vlgmr.msra.gmra.mxu2 %v1636_v4  ;;  %1736 = vmatmul.bf16.vlgmr.msra.gmra.mxu3 %v1636_v4  ;;  %v6155_v4 = vld [vmem:[#allocation131_spill] sm:$0xff] }
 0x1e2   :  { %1794 = vmatpush.bf16.msrb.mxu2 %v6150_v58  ;;  %1807 = vmatpush.bf16.msrb.mxu3 %v6151_v51  ;;  %v6156_v51 = vld [vmem:[#allocation132_spill] sm:$0xff] }
 0x1e4   :  { %1769 = vmatpush.bf16.msrb.mxu0 %v4744_v29  ;;  %1782 = vmatpush.bf16.msrb.mxu1 %v4746_v19  ;;  %v6157_v29 = vld [vmem:[#allocation133_spill] sm:$0xff]  ;;  %v6158_v19 = vld [vmem:[#allocation134_spill] sm:$0xff] }
 0x1e6   :  { %1795 = vmatpush.bf16.msrb.mxu2 %v4749_v41  ;;  %1808 = vmatpush.bf16.msrb.mxu3 %v4751_v63  ;;  %v6159_v41 = vld [vmem:[#allocation135_spill] sm:$0xff]  ;;  %v6160_v63 = vld [vmem:[#allocation136_spill] sm:$0xff] }
 0x1e8   :  { %1770 = vmatpush.bf16.msrb.mxu0 %v4754_v54  ;;  %1783 = vmatpush.bf16.msrb.mxu1 %v6152_v48  ;;  %v6161_v54 = vld [vmem:[#allocation137_spill] sm:$0xff]  ;;  %v6162_v48 = vld [vmem:[#allocation138_spill] sm:$0xff] }
 0x1ea   :  { %1796 = vmatpush.bf16.msrb.mxu2 %v6153_v9  ;;  %1809 = vmatpush.bf16.msrb.mxu3 %v6154_v25  ;;  %v6163_v9 = vld [vmem:[#allocation139_spill] sm:$0xff]  ;;  %v6164_v25 = vld [vmem:[#allocation140_spill] sm:$0xff] }
 0x1ec   :  { %1771 = vmatpush.bf16.msrb.mxu0 %v4790_v13  ;;  %1784 = vmatpush.bf16.msrb.mxu1 %v6155_v4  ;;  %v6165_v13 = vld [vmem:[#allocation141_spill] sm:$0xff] }
 0x1ee   :  { %1797 = vmatpush.bf16.msrb.mxu2 %v6156_v51  ;;  %1810 = vmatpush.bf16.msrb.mxu3 %v6157_v29  ;;  %v6166_v51 = vld [vmem:[#allocation143_spill] sm:$0xff] }
 0x1f0   :  { %1772 = vmatpush.bf16.msrb.mxu0 %v6158_v19  ;;  %1785 = vmatpush.bf16.msrb.mxu1 %v6159_v41 }
 0x1f2   :  { %1798 = vmatpush.bf16.msrb.mxu2 %v6160_v63  ;;  %1811 = vmatpush.bf16.msrb.mxu3 %v6161_v54 }
 0x1f4   :  { %1773 = vmatpush.bf16.msrb.mxu0 %v6162_v48  ;;  %1786 = vmatpush.bf16.msrb.mxu1 %v6163_v9 }
 0x1f6   :  { %1799 = vmatpush.bf16.msrb.mxu2 %v6164_v25  ;;  %1812 = vmatpush.bf16.msrb.mxu3 %v6165_v13 }
 0x1f8   :  { %1774 = vmatpush.bf16.msrb.mxu0 %v4826_v28  ;;  %1787 = vmatpush.bf16.msrb.mxu1 %v6166_v51 }
 0x1fa   :  { %1800 = vmatpush.bf16.msrb.mxu2 %v4830_v44  ;;  %1813 = vmatpush.bf16.msrb.mxu3 %v4833_v14 }
 0x1fc   :  { %1775 = vmatpush.bf16.msrb.mxu0 %v4838_v45  ;;  %1788 = vmatpush.bf16.msrb.mxu1 %v4840_v26 }
 0x1fe   :  { %1801 = vmatpush.bf16.msrb.mxu2 %v4842_v55  ;;  %1814 = vmatpush.bf16.msrb.mxu3 %v4845_v24 }
 0x200   :  { %1850 = vmatpush.bf16.msra.mxu0 %v4424_v49  ;;  %1863 = vmatpush.bf16.msra.mxu1 %v4426_v31 }
 0x202   :  { %1876 = vmatpush.bf16.msra.mxu2 %v4428_v32  ;;  %1889 = vmatpush.bf16.msra.mxu3 %v4437_v38 }
 0x204   :  { %1851 = vmatpush.bf16.msra.mxu0 %v4439_v42  ;;  %1864 = vmatpush.bf16.msra.mxu1 %v4441_v43 }
 0x206   :  { %1877 = vmatpush.bf16.msra.mxu2 %v4444_v47  ;;  %1890 = vmatpush.bf16.msra.mxu3 %v4462_v57  ;;  %v6175_v57 = vld [vmem:[#allocation104_spill] sm:$0xff] }
 0x208   :  { %1852 = vmatpush.bf16.msra.mxu0 %v4464_v60  ;;  %1865 = vmatpush.bf16.msra.mxu1 %v4467_v0  ;;  %v6174_v0 = vld [vmem:[#allocation38_spill] sm:$0xff] }
 0x20a   :  { %1878 = vmatpush.bf16.msra.mxu2 %v4469_v1  ;;  %1891 = vmatpush.bf16.msra.mxu3 %v4484_v12  ;;  %v6173_v1 = vld [vmem:[#allocation30_spill] sm:$0xff] }
 0x20c   :  { %1853 = vmatpush.bf16.msra.mxu0 %v4486_v16  ;;  %1866 = vmatpush.bf16.msra.mxu1 %v4488_v17 }
 0x20e   :  { %1879 = vmatpush.bf16.msra.mxu2 %v4494_v21  ;;  %1892 = vmatpush.bf16.msra.mxu3 %v4506_v30  ;;  %v6167_v21 = vld [vmem:[#allocation54_spill] sm:$0xff]  ;;  %v6168_v30 = vld [vmem:[#allocation56_spill] sm:$0xff] }
 0x210   :  { %1854 = vmatpush.bf16.msra.mxu0 %v4508_v39  ;;  %1867 = vmatpush.bf16.msra.mxu1 %v4510_v40  ;;  %v6169_v39 = vld [vmem:[#allocation57_spill] sm:$0xff] }
 0x212   :  { %1880 = vmatpush.bf16.msra.mxu2 %v4513_v46  ;;  %1893 = vmatpush.bf16.msra.mxu3 %v4522_v61  ;;  %v6170_v46 = vld [vmem:[#allocation59_spill] sm:$0xff]  ;;  %v6171_v61 = vld [vmem:[#allocation60_spill] sm:$0xff] }
 0x214   :  { %1855 = vmatpush.bf16.msra.mxu0 %v4528_v10  ;;  %1868 = vmatpush.bf16.msra.mxu1 %v4530_v15  ;;  %v6172_v10 = vld [vmem:[#allocation61_spill] sm:$0xff] }
 0x216   :  { %1881 = vmatpush.bf16.msra.mxu2 %v4532_v18  ;;  %1894 = vmatpush.bf16.msra.mxu3 %v4535_v23 }
 0x218   :  { %1856 = vmatpush.bf16.msra.mxu0 %v4543_v37  ;;  %1869 = vmatpush.bf16.msra.mxu1 %v6167_v21 }
 0x21a   :  { %1882 = vmatpush.bf16.msra.mxu2 %v6168_v30  ;;  %1895 = vmatpush.bf16.msra.mxu3 %v6169_v39 }
 0x21c   :  { %1857 = vmatpush.bf16.msra.mxu0 %v4559_v22  ;;  %1870 = vmatpush.bf16.msra.mxu1 %v6170_v46 }
 0x21e   :  { %1883 = vmatpush.bf16.msra.mxu2 %v6171_v61  ;;  %1896 = vmatpush.bf16.msra.mxu3 %v6172_v10 }
 0x23b   :  { %v1564_v15 = vpop.f32.mrf.mxu0  ;;  %v1577_v18 = vpop.f32.mrf.mxu1 }
 0x242   :  { %v1590_v40 = vpop.f32.mrf.mxu2  ;;  %v1603_v23 = vpop.f32.mrf.mxu3 }
 0x243   :  { %v1566_v17 = vpop.f32.mrf.mxu0  ;;  %v1579_v37 = vpop.f32.mrf.mxu1 }
 0x24a   :  { %v1592_v16 = vpop.f32.mrf.mxu2  ;;  %v1605_v21 = vpop.f32.mrf.mxu3 }
 0x24b   :  { %v1646_v12 = vpop.f32.mrf.mxu0  ;;  %v1659_v30 = vpop.f32.mrf.mxu1 }
 0x24c   :  { %v1827_v39 = vadd.f32 %v1646_v12, %v6173_v1  ;;  %v1828_v22 = vadd.f32 %v1659_v30, %v6174_v0 }
 0x24e   :  { %v1831_v60 = vmul.f32 0.5, %v1827_v39  ;;  %v1835_v46 = vmul.f32 0.5, %v1828_v22 }
 0x250   :  { %4058 = vtanh.f32 %v1831_v60 }
 0x251   :  { %4060 = vtanh.f32 %v1835_v46 }
 0x252   :  { %v1672_v61 = vpop.f32.mrf.mxu2  ;;  %v1685_v10 = vpop.f32.mrf.mxu3 }
 0x253   :  { %v1829_v47 = vadd.f32 %v1672_v61, %v6175_v57  ;;  %v1648_v43 = vpop.f32.mrf.mxu0  ;;  %v1661_v42 = vpop.f32.mrf.mxu1 }
 0x254   :  { %v6176_v42 = vld [vmem:[#allocation154_spill] sm:$0xff] }
 0x255   :  { %4062 = vtanh.f32 %v1829_v47  ;;  %v6177_v47 = vld [vmem:[#allocation155_spill] sm:$0xff] }
 0x256   :  { %v4059_v17 = vpop.eup %4058 }
 0x257   :  { %v4061_v16 = vpop.eup %4060  ;;  %v1833_v21 = vmul.f32 0.5, %v4059_v17 }
 0x258   :  { %v1837_v37 = vmul.f32 0.5, %v4061_v16 }
 0x259   :  { %v1834_v38 = vadd.f32 0.5, %v1833_v21 }
 0x25a   :  { %v1838_v32 = vadd.f32 0.5, %v1837_v37  ;;  %v1674_v1 = vpop.f32.mrf.mxu2  ;;  %v1687_v12 = vpop.f32.mrf.mxu3 }
 0x25b   :  { %v4063_v0 = vpop.eup %4062 }
 0x25c   :  { %v1844_v30 = vmul.f32 %v1838_v32, %v4908_v3  ;;  %v1845_v60 = vmul.f32 %v4063_v0, %v1834_v38  ;;  %v1698_v39 = vpop.f32.mrf.mxu0  ;;  %v1711_v46 = vpop.f32.mrf.mxu1 }
 0x25d   :  { %v1741_v22 = vadd.f32 %v1698_v39, %v1564_v15  ;;  %v1742_v24 = vadd.f32 %v1711_v46, %v1577_v18 }
 0x25e   :  { %v5027_v57 = vadd.f32 %v1845_v60, %v1844_v30 }
 0x25f   :  { %v1745_v43 = vadd.f32 %v1741_v22, %v6176_v42  ;;  %v1746_v61 = vadd.f32 %v1742_v24, %v6177_v47 }
 0x261   :  { %v1749_v17 = vmul.f32 0.5, %v1745_v43  ;;  %v1753_v16 = vmul.f32 0.5, %v1746_v61 }
 0x263   :  { %4064 = vtanh.f32 %v1749_v17 }
 0x264   :  { %v1724_v21 = vpop.f32.mrf.mxu2  ;;  %v1737_v37 = vpop.f32.mrf.mxu3  ;;  %4066 = vtanh.f32 %v1753_v16  ;;  %v6178_v16 = vld [vmem:[#allocation107_spill] sm:$0xff] }
 0x265   :  { %v1743_v1 = vadd.f32 %v1724_v21, %v1590_v40  ;;  %v1744_v12 = vadd.f32 %v1737_v37, %v1603_v23  ;;  %v1700_v32 = vpop.f32.mrf.mxu0  ;;  %v1713_v38 = vpop.f32.mrf.mxu1  ;;  %v1830_v21 = vadd.f32 %v1685_v10, %v6178_v16  ;;  %v6188_v16 = vld [vmem:[#allocation87_spill] sm:$0xff] }
 0x267   :  { %v1747_v3 = vadd.f32 %v1743_v1, %v4912_v59  ;;  %v1748_v15 = vadd.f32 %v1744_v12, %v4914_v11  ;;  %v1840_v12 = vmul.f32 0.5, %v1830_v21  ;;  %v6189_v21 = vld [vmem:[#allocation89_spill] sm:$0xff] }
 0x269   :  { %4068 = vtanh.f32 %v1747_v3  ;;  %v1758_v18 = vmul.f32 0.5, %v1748_v15  ;;  %v4065_v0 = vpop.eup %4064 }
 0x26a   :  { %v4067_v30 = vpop.eup %4066  ;;  %v1751_v60 = vmul.f32 0.5, %v4065_v0  ;;  %v6179_v0 = vld [vmem:[#allocation71_spill] sm:$0xff] }
 0x26b   :  { %v1755_v24 = vmul.f32 0.5, %v4067_v30  ;;  %4070 = vtanh.f32 %v1758_v18 }
 0x26c   :  { %v1726_v39 = vpop.f32.mrf.mxu2  ;;  %v1739_v46 = vpop.f32.mrf.mxu3  ;;  %v1752_v22 = vadd.f32 0.5, %v1751_v60 }
 0x26d   :  { %v1756_v43 = vadd.f32 0.5, %v1755_v24  ;;  %v6180_v24 = vld [vmem:[#allocation75_spill] sm:$0xff]  ;;  %v6181_v39 = vld [vmem:[#allocation76_spill] sm:$0xff] }
 0x26f   :  { %v4069_v61 = vpop.eup %4068  ;;  %v1762_v40 = vmul.f32 %v1756_v43, %v4923_v33  ;;  %v6183_v43 = vld [vmem:[#allocation81_spill] sm:$0xff] }
 0x270   :  { %v1763_v23 = vmul.f32 %v4069_v61, %v1752_v22  ;;  %v6182_v22 = vld [vmem:[#allocation79_spill] sm:$0xff]  ;;  %v6184_v61 = vld [vmem:[#allocation82_spill] sm:$0xff] }
 0x271   :  { %v4071_v17 = vpop.eup %4070 }
 0x272   :  { %v5035_v37 = vadd.f32 %v1763_v23, %v1762_v40  ;;  %v1760_v1 = vmul.f32 0.5, %v4071_v17  ;;  %v6185_v40 = vld [vmem:[#allocation84_spill] sm:$0xff]  ;;  %v6186_v23 = vld [vmem:[#allocation85_spill] sm:$0xff]  ;;  %v6187_v17 = vld [vmem:[#allocation86_spill] sm:$0xff] }
 0x274   :  { %4072 = vtanh.f32 %v5035_v37  ;;  %v1761_v32 = vadd.f32 0.5, %v1760_v1  ;;  %v6190_v1 = vld [vmem:[#allocation91_spill] sm:$0xff] }
 0x275   :  { %4074 = vtanh.f32 %v1840_v12  ;;  %v6191_v12 = vld [vmem:[#allocation92_spill] sm:$0xff] }
 0x276   :  { %4076 = vtanh.f32 %v5027_v57 }
 0x27a   :  { %v4073_v38 = vpop.eup %4072 }
 0x27b   :  { %v1766_v3 = vmul.f32 %v4073_v38, %v1761_v32  ;;  %v4075_v18 = vpop.eup %4074  ;;  %v6192_v32 = vld [vmem:[#allocation93_spill] sm:$0xff] }
 0x27c   :  { %v1842_v10 = vmul.f32 0.5, %v4075_v18  ;;  %v4077_v33 = vpop.eup %4076  ;;  %v6193_v38 = vld [vmem:[#allocation97_spill] sm:$0xff]  ;;  %v6196_v18 = vld [vmem:[#allocation110_spill] sm:$0xff] }
 0x27d   :  { %v1767_v15 = vpack.c.bf16 %v1766_v3, %v1766_v3  ;;  %v6194_v3 = vld [vmem:[#allocation98_spill] sm:$0xff] }
 0x27e   :  { %v1843_v30 = vadd.f32 0.5, %v1842_v10  ;;  %v6197_v10 = vld [vmem:[#allocation111_spill] sm:$0xff] }
 0x27f   :  { %1776 = vmatmul.bf16.vlgmr.msrb.gmra.mxu0 %v1767_v15  ;;  %1789 = vmatmul.bf16.vlgmr.msrb.gmra.mxu1 %v1767_v15 }
 0x280   :  { %1802 = vmatmul.bf16.vlgmr.msrb.gmra.mxu2 %v1767_v15  ;;  %1815 = vmatmul.bf16.vlgmr.msrb.gmra.mxu3 %v1767_v15  ;;  %v1848_v60 = vmul.f32 %v4077_v33, %v1843_v30  ;;  %v6195_v15 = vld [vmem:[#allocation103_spill] sm:$0xff]  ;;  %v6198_v33 = vld [vmem:[#allocation114_spill] sm:$0xff] }
 0x281   :  { %1902 = vmatpush.bf16.msrb.mxu0 %v6117_v2  ;;  %1915 = vmatpush.bf16.msrb.mxu1 %v6118_v8  ;;  %v6199_v30 = vld [vmem:[#allocation115_spill] sm:$0xff] }
 0x282   :  { %1928 = vmatpush.bf16.msrb.mxu2 %v6119_v34  ;;  %1941 = vmatpush.bf16.msrb.mxu3 %v6120_v52  ;;  %v1849_v46 = vpack.c.bf16 %v1848_v60, %v1848_v60  ;;  %v6200_v60 = vld [vmem:[#allocation116_spill] sm:$0xff] }
 0x285   :  { %1903 = vmatpush.bf16.msrb.mxu0 %v6121_v27  ;;  %1916 = vmatpush.bf16.msrb.mxu1 %v6122_v36 }
 0x286   :  { %1929 = vmatpush.bf16.msrb.mxu2 %v6179_v0  ;;  %1942 = vmatpush.bf16.msrb.mxu3 %v6124_v7 }
 0x289   :  { %1904 = vmatpush.bf16.msrb.mxu0 %v6125_v62  ;;  %1917 = vmatpush.bf16.msrb.mxu1 %v6126_v35 }
 0x28a   :  { %1930 = vmatpush.bf16.msrb.mxu2 %v6180_v24  ;;  %1943 = vmatpush.bf16.msrb.mxu3 %v6181_v39 }
 0x28d   :  { %1905 = vmatpush.bf16.msrb.mxu0 %v6182_v22  ;;  %1918 = vmatpush.bf16.msrb.mxu1 %v6183_v43 }
 0x28e   :  { %1931 = vmatpush.bf16.msrb.mxu2 %v6184_v61  ;;  %1944 = vmatpush.bf16.msrb.mxu3 %v6185_v40 }
 0x28f   :  { %1858 = vmatmul.bf16.vlgmr.msra.gmra.mxu0 %v1849_v46  ;;  %1871 = vmatmul.bf16.vlgmr.msra.gmra.mxu1 %v1849_v46 }
 0x290   :  { %1884 = vmatmul.bf16.vlgmr.msra.gmra.mxu2 %v1849_v46  ;;  %1897 = vmatmul.bf16.vlgmr.msra.gmra.mxu3 %v1849_v46 }
 0x291   :  { %1906 = vmatpush.bf16.msrb.mxu0 %v6186_v23  ;;  %1919 = vmatpush.bf16.msrb.mxu1 %v6187_v17 }
 0x292   :  { %1932 = vmatpush.bf16.msrb.mxu2 %v6188_v16  ;;  %1945 = vmatpush.bf16.msrb.mxu3 %v6189_v21 }
 0x295   :  { %1907 = vmatpush.bf16.msrb.mxu0 %v6190_v1  ;;  %1920 = vmatpush.bf16.msrb.mxu1 %v6191_v12 }
 0x296   :  { %1933 = vmatpush.bf16.msrb.mxu2 %v6192_v32  ;;  %1946 = vmatpush.bf16.msrb.mxu3 %v6140_v53 }
 0x299   :  { %1908 = vmatpush.bf16.msrb.mxu0 %v6141_v56  ;;  %1921 = vmatpush.bf16.msrb.mxu1 %v6193_v38 }
 0x29a   :  { %1934 = vmatpush.bf16.msrb.mxu2 %v6194_v3  ;;  %1947 = vmatpush.bf16.msrb.mxu3 %v6143_v20 }
 0x29d   :  { %1909 = vmatpush.bf16.msrb.mxu0 %v6144_v6  ;;  %1922 = vmatpush.bf16.msrb.mxu1 %v6145_v5  ;;  %v6201_v5 = vld [vmem:[#allocation117_spill] sm:$0xff] }
 0x29e   :  { %1935 = vmatpush.bf16.msrb.mxu2 %v6146_v50  ;;  %1948 = vmatpush.bf16.msrb.mxu3 %v6195_v15  ;;  %v6202_v50 = vld [vmem:[#allocation118_spill] sm:$0xff]  ;;  %v6203_v15 = vld [vmem:[#allocation119_spill] sm:$0xff]  ;;  %v6206_v6 = vld [vmem:[#allocation125_spill] sm:$0xff] }
 0x2a0   :  { %1910 = vmatmul.bf16.vlgmr.msrb.gmra.mxu0 %v1849_v46  ;;  %1923 = vmatmul.bf16.vlgmr.msrb.gmra.mxu1 %v1849_v46 }
 0x2a1   :  { %1981 = vmatpush.bf16.msra.mxu0 %v6196_v18  ;;  %1994 = vmatpush.bf16.msra.mxu1 %v6197_v10  ;;  %v6204_v18 = vld [vmem:[#allocation121_spill] sm:$0xff]  ;;  %v6205_v10 = vld [vmem:[#allocation122_spill] sm:$0xff] }
 0x2a2   :  { %1936 = vmatmul.bf16.vlgmr.msrb.gmra.mxu2 %v1849_v46  ;;  %1949 = vmatmul.bf16.vlgmr.msrb.gmra.mxu3 %v1849_v46  ;;  %v6207_v46 = vld [vmem:[#allocation130_spill] sm:$0xff] }
 0x2a3   :  { %2007 = vmatpush.bf16.msra.mxu2 %v6150_v58  ;;  %2020 = vmatpush.bf16.msra.mxu3 %v6198_v33  ;;  %v6208_v33 = vld [vmem:[#allocation132_spill] sm:$0xff] }
 0x2a5   :  { %1982 = vmatpush.bf16.msra.mxu0 %v6199_v30  ;;  %1995 = vmatpush.bf16.msra.mxu1 %v6200_v60 }
 0x2a7   :  { %2008 = vmatpush.bf16.msra.mxu2 %v6201_v5  ;;  %2021 = vmatpush.bf16.msra.mxu3 %v6202_v50 }
 0x2a9   :  { %1983 = vmatpush.bf16.msra.mxu0 %v6203_v15  ;;  %1996 = vmatpush.bf16.msra.mxu1 %v6204_v18  ;;  %v6247_v18 = vld [vmem:[#allocation105_spill] sm:$0xff] }
 0x2ab   :  { %2009 = vmatpush.bf16.msra.mxu2 %v6205_v10  ;;  %2022 = vmatpush.bf16.msra.mxu3 %v6206_v6  ;;  %v6246_v10 = vld [vmem:[#allocation83_spill] sm:$0xff] }
 0x2ad   :  { %1984 = vmatpush.bf16.msra.mxu0 %v6207_v46  ;;  %1997 = vmatpush.bf16.msra.mxu1 %v6155_v4 }
 0x2af   :  { %2010 = vmatpush.bf16.msra.mxu2 %v6208_v33  ;;  %2023 = vmatpush.bf16.msra.mxu3 %v6157_v29  ;;  %v6245_v29 = vld [vmem:[#allocation44_spill] sm:$0xff] }
 0x2b1   :  { %1985 = vmatpush.bf16.msra.mxu0 %v6158_v19  ;;  %1998 = vmatpush.bf16.msra.mxu1 %v6159_v41  ;;  %v6243_v41 = vld [vmem:[#allocation43_spill] sm:$0xff]  ;;  %v6244_v19 = vld [vmem:[#allocation37_spill] sm:$0xff] }
 0x2b3   :  { %2011 = vmatpush.bf16.msra.mxu2 %v6160_v63  ;;  %2024 = vmatpush.bf16.msra.mxu3 %v6161_v54  ;;  %v6240_v54 = vld [vmem:[#allocation29_spill] sm:$0xff] }
 0x2b5   :  { %1986 = vmatpush.bf16.msra.mxu0 %v6162_v48  ;;  %1999 = vmatpush.bf16.msra.mxu1 %v6163_v9 }
 0x2b7   :  { %2012 = vmatpush.bf16.msra.mxu2 %v6164_v25  ;;  %2025 = vmatpush.bf16.msra.mxu3 %v6165_v13  ;;  %v6209_v25 = vld [vmem:[#allocation149_spill] sm:$0xff]  ;;  %v6210_v13 = vld [vmem:[#allocation20_spill] sm:$0xff] }
 0x2b9   :  { %1987 = vmatpush.bf16.msra.mxu0 %v4826_v28  ;;  %2000 = vmatpush.bf16.msra.mxu1 %v6166_v51  ;;  %v6211_v28 = vld [vmem:[#allocation21_spill] sm:$0xff]  ;;  %v6212_v51 = vld [vmem:[#allocation22_spill] sm:$0xff] }
 0x2bb   :  { %2013 = vmatpush.bf16.msra.mxu2 %v4830_v44  ;;  %2026 = vmatpush.bf16.msra.mxu3 %v4833_v14  ;;  %v6213_v44 = vld [vmem:[#allocation23_spill] sm:$0xff]  ;;  %v6214_v14 = vld [vmem:[#allocation24_spill] sm:$0xff] }
 0x2bd   :  { %1988 = vmatpush.bf16.msra.mxu0 %v4838_v45  ;;  %2001 = vmatpush.bf16.msra.mxu1 %v4840_v26  ;;  %v6215_v45 = vld [vmem:[#allocation25_spill] sm:$0xff]  ;;  %v6216_v26 = vld [vmem:[#allocation26_spill] sm:$0xff] }
 0x2bf   :  { %2014 = vmatpush.bf16.msra.mxu2 %v4842_v55  ;;  %2027 = vmatpush.bf16.msra.mxu3 %v6209_v25  ;;  %v6219_v55 = vld [vmem:[#allocation31_spill] sm:$0xff]  ;;  %v6220_v25 = vld [vmem:[#allocation32_spill] sm:$0xff] }
 0x2c1   :  { %2063 = vmatpush.bf16.msrb.mxu0 %v4424_v49  ;;  %2076 = vmatpush.bf16.msrb.mxu1 %v4426_v31  ;;  %v6217_v49 = vld [vmem:[#allocation27_spill] sm:$0xff]  ;;  %v6218_v31 = vld [vmem:[#allocation28_spill] sm:$0xff] }
 0x2c3   :  { %2089 = vmatpush.bf16.msrb.mxu2 %v6210_v13  ;;  %2102 = vmatpush.bf16.msrb.mxu3 %v6211_v28  ;;  %v6221_v13 = vld [vmem:[#allocation33_spill] sm:$0xff]  ;;  %v6222_v28 = vld [vmem:[#allocation35_spill] sm:$0xff] }
 0x2c5   :  { %2064 = vmatpush.bf16.msrb.mxu0 %v6212_v51  ;;  %2077 = vmatpush.bf16.msrb.mxu1 %v6213_v44  ;;  %v6223_v51 = vld [vmem:[#allocation39_spill] sm:$0xff]  ;;  %v6224_v44 = vld [vmem:[#allocation40_spill] sm:$0xff] }
 0x2c7   :  { %2090 = vmatpush.bf16.msrb.mxu2 %v6214_v14  ;;  %2103 = vmatpush.bf16.msrb.mxu3 %v6215_v45  ;;  %v6225_v14 = vld [vmem:[#allocation41_spill] sm:$0xff]  ;;  %v6226_v45 = vld [vmem:[#allocation42_spill] sm:$0xff] }
 0x2c9   :  { %2065 = vmatpush.bf16.msrb.mxu0 %v6216_v26  ;;  %2078 = vmatpush.bf16.msrb.mxu1 %v6217_v49  ;;  %v6227_v26 = vld [vmem:[#allocation45_spill] sm:$0xff]  ;;  %v6228_v49 = vld [vmem:[#allocation47_spill] sm:$0xff] }
 0x2cb   :  { %2091 = vmatpush.bf16.msrb.mxu2 %v6218_v31  ;;  %2104 = vmatpush.bf16.msrb.mxu3 %v6219_v55  ;;  %v6229_v31 = vld [vmem:[#allocation48_spill] sm:$0xff]  ;;  %v6230_v55 = vld [vmem:[#allocation49_spill] sm:$0xff] }
 0x2cd   :  { %2066 = vmatpush.bf16.msrb.mxu0 %v6220_v25  ;;  %2079 = vmatpush.bf16.msrb.mxu1 %v6221_v13  ;;  %v6231_v25 = vld [vmem:[#allocation50_spill] sm:$0xff]  ;;  %v6232_v13 = vld [vmem:[#allocation52_spill] sm:$0xff] }
 0x2cf   :  { %2092 = vmatpush.bf16.msrb.mxu2 %v6222_v28  ;;  %2105 = vmatpush.bf16.msrb.mxu3 %v6223_v51  ;;  %v6233_v28 = vld [vmem:[#allocation54_spill] sm:$0xff]  ;;  %v6234_v51 = vld [vmem:[#allocation56_spill] sm:$0xff] }
 0x2d1   :  { %2067 = vmatpush.bf16.msrb.mxu0 %v6224_v44  ;;  %2080 = vmatpush.bf16.msrb.mxu1 %v6225_v14  ;;  %v6235_v44 = vld [vmem:[#allocation57_spill] sm:$0xff]  ;;  %v6236_v14 = vld [vmem:[#allocation58_spill] sm:$0xff] }
 0x2d3   :  { %2093 = vmatpush.bf16.msrb.mxu2 %v6226_v45  ;;  %2106 = vmatpush.bf16.msrb.mxu3 %v6227_v26  ;;  %v6237_v45 = vld [vmem:[#allocation59_spill] sm:$0xff]  ;;  %v6238_v26 = vld [vmem:[#allocation60_spill] sm:$0xff] }
 0x2d5   :  { %2068 = vmatpush.bf16.msrb.mxu0 %v6228_v49  ;;  %2081 = vmatpush.bf16.msrb.mxu1 %v6229_v31  ;;  %v6239_v49 = vld [vmem:[#allocation61_spill] sm:$0xff] }
 0x2d7   :  { %2094 = vmatpush.bf16.msrb.mxu2 %v6230_v55  ;;  %2107 = vmatpush.bf16.msrb.mxu3 %v6231_v25 }
 0x2d9   :  { %2069 = vmatpush.bf16.msrb.mxu0 %v6232_v13  ;;  %2082 = vmatpush.bf16.msrb.mxu1 %v6233_v28  ;;  %v6241_v28 = vld [vmem:[#allocation36_spill] sm:$0xff] }
 0x2da   :  { %v551_v63 = vadd.f32 %v6241_v28, %v6240_v54  ;;  %v6248_v28 = vld [vmem:[#allocation106_spill] sm:$0xff] }
 0x2db   :  { %2095 = vmatpush.bf16.msrb.mxu2 %v6234_v51  ;;  %2108 = vmatpush.bf16.msrb.mxu3 %v6235_v44  ;;  %v6242_v51 = vld [vmem:[#allocation34_spill] sm:$0xff] }
 0x2dc   :  { %v609_v44 = vadd.f32 %v6243_v41, %v6242_v51 }
 0x2dd   :  { %2070 = vmatpush.bf16.msrb.mxu0 %v6236_v14  ;;  %2083 = vmatpush.bf16.msrb.mxu1 %v6237_v45  ;;  %v580_v14 = vadd.f32 %v6244_v19, %v551_v63 }
 0x2de   :  { %v638_v45 = vadd.f32 %v6245_v29, %v609_v44 }
 0x2df   :  { %2096 = vmatpush.bf16.msrb.mxu2 %v6238_v26  ;;  %2109 = vmatpush.bf16.msrb.mxu3 %v6239_v49 }
 0x2fc   :  { %v1777_v31 = vpop.f32.mrf.mxu0  ;;  %v1790_v55 = vpop.f32.mrf.mxu1 }
 0x303   :  { %v1803_v9 = vpop.f32.mrf.mxu2  ;;  %v1816_v25 = vpop.f32.mrf.mxu3 }
 0x304   :  { %v1779_v48 = vpop.f32.mrf.mxu0  ;;  %v1792_v13 = vpop.f32.mrf.mxu1 }
 0x305   :  { %v667_v48 = vadd.f32 %v6247_v18, %v6246_v10 }
 0x307   :  { %v696_v54 = vadd.f32 %v6248_v28, %v667_v48 }
 0x30b   :  { %v1805_v33 = vpop.f32.mrf.mxu2  ;;  %v1818_v26 = vpop.f32.mrf.mxu3 }
 0x30c   :  { %v1859_v4 = vpop.f32.mrf.mxu0  ;;  %v1872_v49 = vpop.f32.mrf.mxu1 }
 0x30d   :  { %v2040_v46 = vadd.f32 %v1859_v4, %v580_v14  ;;  %v2041_v6 = vadd.f32 %v1872_v49, %v638_v45 }
 0x30f   :  { %v2044_v13 = vmul.f32 0.5, %v2040_v46  ;;  %v2048_v15 = vmul.f32 0.5, %v2041_v6 }
 0x311   :  { %4078 = vtanh.f32 %v2044_v13 }
 0x312   :  { %4080 = vtanh.f32 %v2048_v15 }
 0x313   :  { %v1885_v41 = vpop.f32.mrf.mxu2  ;;  %v1898_v51 = vpop.f32.mrf.mxu3 }
 0x314   :  { %v2042_v63 = vadd.f32 %v1885_v41, %v696_v54  ;;  %v1861_v19 = vpop.f32.mrf.mxu0  ;;  %v1874_v29 = vpop.f32.mrf.mxu1 }
 0x316   :  { %4082 = vtanh.f32 %v2042_v63 }
 0x317   :  { %v4079_v44 = vpop.eup %4078 }
 0x318   :  { %v4081_v26 = vpop.eup %4080  ;;  %v2046_v33 = vmul.f32 0.5, %v4079_v44 }
 0x319   :  { %v2050_v14 = vmul.f32 0.5, %v4081_v26 }
 0x31a   :  { %v2047_v49 = vadd.f32 0.5, %v2046_v33 }
 0x31b   :  { %v2051_v45 = vadd.f32 0.5, %v2050_v14  ;;  %v1887_v4 = vpop.f32.mrf.mxu2  ;;  %v1900_v18 = vpop.f32.mrf.mxu3 }
 0x31c   :  { %v4083_v46 = vpop.eup %4082 }
 0x31d   :  { %v2057_v6 = vmul.f32 %v2051_v45, %v5027_v57  ;;  %v2058_v13 = vmul.f32 %v4083_v46, %v2047_v49  ;;  %v1911_v48 = vpop.f32.mrf.mxu0  ;;  %v1924_v15 = vpop.f32.mrf.mxu1 }
 0x31e   :  { %v1954_v28 = vadd.f32 %v1911_v48, %v1777_v31  ;;  %v1955_v10 = vadd.f32 %v1924_v15, %v1790_v55 }
 0x31f   :  { %v5145_v54 = vadd.f32 %v2058_v13, %v2057_v6  ;;  %v6250_v6 = vld [vmem:[#allocation108_spill] sm:$0xff] }
 0x320   :  { %v1958_v41 = vadd.f32 %v1954_v28, %v6176_v42  ;;  %v1959_v63 = vadd.f32 %v1955_v10, %v6177_v47  ;;  %v6249_v10 = vld [vmem:[#allocation95_spill] sm:$0xff] }
 0x321   :  { %v725_v13 = vadd.f32 %v6250_v6, %v6249_v10  ;;  %v6276_v10 = vld [vmem:[#allocation143_spill] sm:$0xff] }
 0x322   :  { %v1962_v19 = vmul.f32 0.5, %v1958_v41  ;;  %v1966_v29 = vmul.f32 0.5, %v1959_v63  ;;  %v6251_v63 = vld [vmem:[#allocation109_spill] sm:$0xff] }
 0x324   :  { %4084 = vtanh.f32 %v1962_v19  ;;  %v754_v19 = vadd.f32 %v6251_v63, %v725_v13  ;;  %v6258_v63 = vld [vmem:[#allocation114_spill] sm:$0xff] }
 0x325   :  { %v1937_v44 = vpop.f32.mrf.mxu2  ;;  %v1950_v26 = vpop.f32.mrf.mxu3  ;;  %4086 = vtanh.f32 %v1966_v29 }
 0x326   :  { %v1956_v33 = vadd.f32 %v1937_v44, %v1803_v9  ;;  %v1957_v14 = vadd.f32 %v1950_v26, %v1816_v25  ;;  %v1913_v57 = vpop.f32.mrf.mxu0  ;;  %v1926_v49 = vpop.f32.mrf.mxu1 }
 0x328   :  { %v1960_v45 = vadd.f32 %v1956_v33, %v4912_v59  ;;  %v1961_v31 = vadd.f32 %v1957_v14, %v4914_v11  ;;  %v2043_v33 = vadd.f32 %v1898_v51, %v754_v19  ;;  %v6259_v19 = vld [vmem:[#allocation119_spill] sm:$0xff] }
 0x32a   :  { %4088 = vtanh.f32 %v1960_v45  ;;  %v1971_v55 = vmul.f32 0.5, %v1961_v31  ;;  %v4085_v4 = vpop.eup %4084  ;;  %v2053_v49 = vmul.f32 0.5, %v2043_v33  ;;  %v6263_v33 = vld [vmem:[#allocation130_spill] sm:$0xff] }
 0x32b   :  { %v4087_v18 = vpop.eup %4086  ;;  %v1964_v46 = vmul.f32 0.5, %v4085_v4 }
 0x32c   :  { %v1968_v48 = vmul.f32 0.5, %v4087_v18  ;;  %4090 = vtanh.f32 %v1971_v55 }
 0x32d   :  { %v1939_v15 = vpop.f32.mrf.mxu2  ;;  %v1952_v28 = vpop.f32.mrf.mxu3  ;;  %v1965_v9 = vadd.f32 0.5, %v1964_v46 }
 0x32e   :  { %v1969_v25 = vadd.f32 0.5, %v1968_v48  ;;  %v6252_v48 = vld [vmem:[#allocation100_spill] sm:$0xff]  ;;  %v6253_v15 = vld [vmem:[#allocation101_spill] sm:$0xff]  ;;  %v6254_v28 = vld [vmem:[#allocation102_spill] sm:$0xff] }
 0x330   :  { %v4089_v41 = vpop.eup %4088  ;;  %v1975_v29 = vmul.f32 %v1969_v25, %v5035_v37  ;;  %v6256_v25 = vld [vmem:[#allocation110_spill] sm:$0xff] }
 0x331   :  { %v1976_v44 = vmul.f32 %v4089_v41, %v1965_v9  ;;  %v6255_v9 = vld [vmem:[#allocation103_spill] sm:$0xff] }
 0x332   :  { %v4091_v26 = vpop.eup %4090  ;;  %v6257_v41 = vld [vmem:[#allocation111_spill] sm:$0xff] }
 0x333   :  { %v5155_v14 = vadd.f32 %v1976_v44, %v1975_v29  ;;  %v1973_v57 = vmul.f32 0.5, %v4091_v26  ;;  %v6260_v29 = vld [vmem:[#allocation121_spill] sm:$0xff]  ;;  %v6261_v44 = vld [vmem:[#allocation122_spill] sm:$0xff] }
 0x334   :  { %v6262_v26 = vld [vmem:[#allocation125_spill] sm:$0xff] }
 0x335   :  { %4092 = vtanh.f32 %v5155_v14  ;;  %v1974_v45 = vadd.f32 0.5, %v1973_v57  ;;  %v6264_v57 = vld [vmem:[#allocation131_spill] sm:$0xff] }
 0x336   :  { %4094 = vtanh.f32 %v2053_v49  ;;  %v6265_v49 = vld [vmem:[#allocation132_spill] sm:$0xff] }
 0x337   :  { %4096 = vtanh.f32 %v5145_v54 }
 0x33b   :  { %v4093_v31 = vpop.eup %4092 }
 0x33c   :  { %v1979_v55 = vmul.f32 %v4093_v31, %v1974_v45  ;;  %v4095_v18 = vpop.eup %4094  ;;  %v6266_v45 = vld [vmem:[#allocation133_spill] sm:$0xff]  ;;  %v6267_v31 = vld [vmem:[#allocation134_spill] sm:$0xff] }
 0x33d   :  { %v2055_v51 = vmul.f32 0.5, %v4095_v18  ;;  %v4097_v37 = vpop.eup %4096  ;;  %v6270_v18 = vld [vmem:[#allocation137_spill] sm:$0xff] }
 0x33e   :  { %v1980_v4 = vpack.c.bf16 %v1979_v55, %v1979_v55  ;;  %v6268_v55 = vld [vmem:[#allocation135_spill] sm:$0xff] }
 0x33f   :  { %v2056_v46 = vadd.f32 0.5, %v2055_v51  ;;  %v6271_v51 = vld [vmem:[#allocation138_spill] sm:$0xff] }
 0x340   :  { %1989 = vmatmul.bf16.vlgmr.msra.gmra.mxu0 %v1980_v4  ;;  %2002 = vmatmul.bf16.vlgmr.msra.gmra.mxu1 %v1980_v4 }
 0x341   :  { %2015 = vmatmul.bf16.vlgmr.msra.gmra.mxu2 %v1980_v4  ;;  %2028 = vmatmul.bf16.vlgmr.msra.gmra.mxu3 %v1980_v4  ;;  %v2061_v6 = vmul.f32 %v4097_v37, %v2056_v46  ;;  %v6269_v4 = vld [vmem:[#allocation136_spill] sm:$0xff]  ;;  %v6272_v37 = vld [vmem:[#allocation139_spill] sm:$0xff] }
 0x342   :  { %2115 = vmatpush.bf16.msra.mxu0 %v6117_v2  ;;  %2128 = vmatpush.bf16.msra.mxu1 %v6118_v8  ;;  %v6273_v46 = vld [vmem:[#allocation140_spill] sm:$0xff] }
 0x343   :  { %2141 = vmatpush.bf16.msra.mxu2 %v6119_v34  ;;  %2154 = vmatpush.bf16.msra.mxu3 %v6120_v52  ;;  %v2062_v13 = vpack.c.bf16 %v2061_v6, %v2061_v6  ;;  %v6274_v6 = vld [vmem:[#allocation141_spill] sm:$0xff] }
 0x346   :  { %2116 = vmatpush.bf16.msra.mxu0 %v6121_v27  ;;  %2129 = vmatpush.bf16.msra.mxu1 %v6122_v36 }
 0x347   :  { %2142 = vmatpush.bf16.msra.mxu2 %v6179_v0  ;;  %2155 = vmatpush.bf16.msra.mxu3 %v6124_v7 }
 0x34a   :  { %2117 = vmatpush.bf16.msra.mxu0 %v6125_v62  ;;  %2130 = vmatpush.bf16.msra.mxu1 %v6126_v35 }
 0x34b   :  { %2143 = vmatpush.bf16.msra.mxu2 %v6180_v24  ;;  %2156 = vmatpush.bf16.msra.mxu3 %v6181_v39 }
 0x34e   :  { %2118 = vmatpush.bf16.msra.mxu0 %v6182_v22  ;;  %2131 = vmatpush.bf16.msra.mxu1 %v6183_v43 }
 0x34f   :  { %2144 = vmatpush.bf16.msra.mxu2 %v6184_v61  ;;  %2157 = vmatpush.bf16.msra.mxu3 %v6185_v40 }
 0x350   :  { %2071 = vmatmul.bf16.vlgmr.msrb.gmra.mxu0 %v2062_v13  ;;  %2084 = vmatmul.bf16.vlgmr.msrb.gmra.mxu1 %v2062_v13 }
 0x351   :  { %2097 = vmatmul.bf16.vlgmr.msrb.gmra.mxu2 %v2062_v13  ;;  %2110 = vmatmul.bf16.vlgmr.msrb.gmra.mxu3 %v2062_v13 }
 0x352   :  { %2119 = vmatpush.bf16.msra.mxu0 %v6186_v23  ;;  %2132 = vmatpush.bf16.msra.mxu1 %v6187_v17 }
 0x353   :  { %2145 = vmatpush.bf16.msra.mxu2 %v6188_v16  ;;  %2158 = vmatpush.bf16.msra.mxu3 %v6189_v21 }
 0x356   :  { %2120 = vmatpush.bf16.msra.mxu0 %v6190_v1  ;;  %2133 = vmatpush.bf16.msra.mxu1 %v6191_v12 }
 0x357   :  { %2146 = vmatpush.bf16.msra.mxu2 %v6192_v32  ;;  %2159 = vmatpush.bf16.msra.mxu3 %v6140_v53 }
 0x35a   :  { %2121 = vmatpush.bf16.msra.mxu0 %v6141_v56  ;;  %2134 = vmatpush.bf16.msra.mxu1 %v6193_v38 }
 0x35b   :  { %2147 = vmatpush.bf16.msra.mxu2 %v6194_v3  ;;  %2160 = vmatpush.bf16.msra.mxu3 %v6143_v20 }
 0x35e   :  { %2122 = vmatpush.bf16.msra.mxu0 %v6252_v48  ;;  %2135 = vmatpush.bf16.msra.mxu1 %v6253_v15 }
 0x35f   :  { %2148 = vmatpush.bf16.msra.mxu2 %v6254_v28  ;;  %2161 = vmatpush.bf16.msra.mxu3 %v6255_v9 }
 0x361   :  { %2123 = vmatmul.bf16.vlgmr.msra.gmra.mxu0 %v2062_v13  ;;  %2136 = vmatmul.bf16.vlgmr.msra.gmra.mxu1 %v2062_v13 }
 0x362   :  { %2194 = vmatpush.bf16.msrb.mxu0 %v6256_v25  ;;  %2207 = vmatpush.bf16.msrb.mxu1 %v6257_v41 }
 0x363   :  { %2149 = vmatmul.bf16.vlgmr.msra.gmra.mxu2 %v2062_v13  ;;  %2162 = vmatmul.bf16.vlgmr.msra.gmra.mxu3 %v2062_v13  ;;  %v6275_v13 = vld [vmem:[#allocation142_spill] sm:$0xff] }
 0x364   :  { %2220 = vmatpush.bf16.msrb.mxu2 %v6150_v58  ;;  %2233 = vmatpush.bf16.msrb.mxu3 %v6258_v63 }
 0x366   :  { %2195 = vmatpush.bf16.msrb.mxu0 %v6199_v30  ;;  %2208 = vmatpush.bf16.msrb.mxu1 %v6200_v60 }
 0x368   :  { %2221 = vmatpush.bf16.msrb.mxu2 %v6201_v5  ;;  %2234 = vmatpush.bf16.msrb.mxu3 %v6202_v50  ;;  %v6317_v50 = vld [vmem:[#allocation113_spill] sm:$0xff] }
 0x36a   :  { %2196 = vmatpush.bf16.msrb.mxu0 %v6259_v19  ;;  %2209 = vmatpush.bf16.msrb.mxu1 %v6260_v29  ;;  %v6316_v29 = vld [vmem:[#allocation55_spill] sm:$0xff] }
 0x36c   :  { %2222 = vmatpush.bf16.msrb.mxu2 %v6261_v44  ;;  %2235 = vmatpush.bf16.msrb.mxu3 %v6262_v26  ;;  %v6315_v44 = vld [vmem:[#allocation46_spill] sm:$0xff] }
 0x36e   :  { %2197 = vmatpush.bf16.msrb.mxu0 %v6263_v33  ;;  %2210 = vmatpush.bf16.msrb.mxu1 %v6264_v57 }
 0x370   :  { %2223 = vmatpush.bf16.msrb.mxu2 %v6265_v49  ;;  %2236 = vmatpush.bf16.msrb.mxu3 %v6266_v45  ;;  %v6277_v45 = vld [vmem:[#allocation144_spill] sm:$0xff] }
 0x372   :  { %2198 = vmatpush.bf16.msrb.mxu0 %v6267_v31  ;;  %2211 = vmatpush.bf16.msrb.mxu1 %v6268_v55  ;;  %v6278_v31 = vld [vmem:[#allocation145_spill] sm:$0xff]  ;;  %v6279_v55 = vld [vmem:[#allocation146_spill] sm:$0xff] }
 0x374   :  { %2224 = vmatpush.bf16.msrb.mxu2 %v6269_v4  ;;  %2237 = vmatpush.bf16.msrb.mxu3 %v6270_v18  ;;  %v6280_v4 = vld [vmem:[#allocation147_spill] sm:$0xff]  ;;  %v6281_v18 = vld [vmem:[#allocation18_spill] sm:$0xff] }
 0x376   :  { %2199 = vmatpush.bf16.msrb.mxu0 %v6271_v51  ;;  %2212 = vmatpush.bf16.msrb.mxu1 %v6272_v37  ;;  %v6282_v51 = vld [vmem:[#allocation19_spill] sm:$0xff]  ;;  %v6283_v37 = vld [vmem:[#allocation148_spill] sm:$0xff] }
 0x378   :  { %2225 = vmatpush.bf16.msrb.mxu2 %v6273_v46  ;;  %2238 = vmatpush.bf16.msrb.mxu3 %v6274_v6  ;;  %v6284_v46 = vld [vmem:[#allocation149_spill] sm:$0xff]  ;;  %v6285_v6 = vld [vmem:[#allocation20_spill] sm:$0xff] }
 0x37a   :  { %2200 = vmatpush.bf16.msrb.mxu0 %v6275_v13  ;;  %2213 = vmatpush.bf16.msrb.mxu1 %v6276_v10  ;;  %v6286_v13 = vld [vmem:[#allocation21_spill] sm:$0xff]  ;;  %v6287_v10 = vld [vmem:[#allocation22_spill] sm:$0xff] }
 0x37c   :  { %2226 = vmatpush.bf16.msrb.mxu2 %v6277_v45  ;;  %2239 = vmatpush.bf16.msrb.mxu3 %v6278_v31  ;;  %v6288_v45 = vld [vmem:[#allocation23_spill] sm:$0xff]  ;;  %v6289_v31 = vld [vmem:[#allocation24_spill] sm:$0xff] }
 0x37e   :  { %2201 = vmatpush.bf16.msrb.mxu0 %v6279_v55  ;;  %2214 = vmatpush.bf16.msrb.mxu1 %v6280_v4  ;;  %v6290_v55 = vld [vmem:[#allocation25_spill] sm:$0xff]  ;;  %v6291_v4 = vld [vmem:[#allocation26_spill] sm:$0xff] }
 0x380   :  { %2227 = vmatpush.bf16.msrb.mxu2 %v6283_v37  ;;  %2240 = vmatpush.bf16.msrb.mxu3 %v6284_v46  ;;  %v6294_v37 = vld [vmem:[#allocation31_spill] sm:$0xff]  ;;  %v6295_v46 = vld [vmem:[#allocation32_spill] sm:$0xff] }
 0x382   :  { %2276 = vmatpush.bf16.msra.mxu0 %v6281_v18  ;;  %2289 = vmatpush.bf16.msra.mxu1 %v6282_v51  ;;  %v6292_v18 = vld [vmem:[#allocation27_spill] sm:$0xff]  ;;  %v6293_v51 = vld [vmem:[#allocation28_spill] sm:$0xff] }
 0x384   :  { %2302 = vmatpush.bf16.msra.mxu2 %v6285_v6  ;;  %2315 = vmatpush.bf16.msra.mxu3 %v6286_v13  ;;  %v6296_v6 = vld [vmem:[#allocation33_spill] sm:$0xff]  ;;  %v6297_v13 = vld [vmem:[#allocation35_spill] sm:$0xff] }
 0x386   :  { %2277 = vmatpush.bf16.msra.mxu0 %v6287_v10  ;;  %2290 = vmatpush.bf16.msra.mxu1 %v6288_v45  ;;  %v6298_v10 = vld [vmem:[#allocation39_spill] sm:$0xff]  ;;  %v6299_v45 = vld [vmem:[#allocation40_spill] sm:$0xff] }
 0x388   :  { %2303 = vmatpush.bf16.msra.mxu2 %v6289_v31  ;;  %2316 = vmatpush.bf16.msra.mxu3 %v6290_v55  ;;  %v6300_v31 = vld [vmem:[#allocation41_spill] sm:$0xff]  ;;  %v6301_v55 = vld [vmem:[#allocation42_spill] sm:$0xff] }
 0x38a   :  { %2278 = vmatpush.bf16.msra.mxu0 %v6291_v4  ;;  %2291 = vmatpush.bf16.msra.mxu1 %v6292_v18  ;;  %v6302_v4 = vld [vmem:[#allocation45_spill] sm:$0xff]  ;;  %v6303_v18 = vld [vmem:[#allocation47_spill] sm:$0xff] }
 0x38c   :  { %2304 = vmatpush.bf16.msra.mxu2 %v6293_v51  ;;  %2317 = vmatpush.bf16.msra.mxu3 %v6294_v37  ;;  %v6304_v51 = vld [vmem:[#allocation48_spill] sm:$0xff]  ;;  %v6305_v37 = vld [vmem:[#allocation49_spill] sm:$0xff] }
 0x38e   :  { %2279 = vmatpush.bf16.msra.mxu0 %v6295_v46  ;;  %2292 = vmatpush.bf16.msra.mxu1 %v6296_v6  ;;  %v6306_v46 = vld [vmem:[#allocation50_spill] sm:$0xff]  ;;  %v6307_v6 = vld [vmem:[#allocation52_spill] sm:$0xff] }
 0x390   :  { %2305 = vmatpush.bf16.msra.mxu2 %v6297_v13  ;;  %2318 = vmatpush.bf16.msra.mxu3 %v6298_v10  ;;  %v6308_v13 = vld [vmem:[#allocation54_spill] sm:$0xff]  ;;  %v6309_v10 = vld [vmem:[#allocation56_spill] sm:$0xff] }
 0x392   :  { %2280 = vmatpush.bf16.msra.mxu0 %v6299_v45  ;;  %2293 = vmatpush.bf16.msra.mxu1 %v6300_v31  ;;  %v6310_v45 = vld [vmem:[#allocation57_spill] sm:$0xff]  ;;  %v6311_v31 = vld [vmem:[#allocation58_spill] sm:$0xff] }
 0x394   :  { %2306 = vmatpush.bf16.msra.mxu2 %v6301_v55  ;;  %2319 = vmatpush.bf16.msra.mxu3 %v6302_v4  ;;  %v6312_v55 = vld [vmem:[#allocation59_spill] sm:$0xff]  ;;  %v6313_v4 = vld [vmem:[#allocation60_spill] sm:$0xff] }
 0x396   :  { %2281 = vmatpush.bf16.msra.mxu0 %v6303_v18  ;;  %2294 = vmatpush.bf16.msra.mxu1 %v6304_v51  ;;  %v6314_v18 = vld [vmem:[#allocation61_spill] sm:$0xff] }
 0x398   :  { %2307 = vmatpush.bf16.msra.mxu2 %v6305_v37  ;;  %2320 = vmatpush.bf16.msra.mxu3 %v6306_v46 }
 0x39a   :  { %2282 = vmatpush.bf16.msra.mxu0 %v6307_v6  ;;  %2295 = vmatpush.bf16.msra.mxu1 %v6308_v13 }
 0x39c   :  { %2308 = vmatpush.bf16.msra.mxu2 %v6309_v10  ;;  %2321 = vmatpush.bf16.msra.mxu3 %v6310_v45 }
 0x39e   :  { %2283 = vmatpush.bf16.msra.mxu0 %v6311_v31  ;;  %2296 = vmatpush.bf16.msra.mxu1 %v6312_v55 }
 0x3a0   :  { %2309 = vmatpush.bf16.msra.mxu2 %v6313_v4  ;;  %2322 = vmatpush.bf16.msra.mxu3 %v6314_v18 }
 0x3bd   :  { %v1990_v51 = vpop.f32.mrf.mxu0  ;;  %v2003_v37 = vpop.f32.mrf.mxu1 }
 0x3c4   :  { %v2016_v49 = vpop.f32.mrf.mxu2  ;;  %v2029_v46 = vpop.f32.mrf.mxu3 }
 0x3c5   :  { %v1992_v57 = vpop.f32.mrf.mxu0  ;;  %v2005_v6 = vpop.f32.mrf.mxu1 }
 0x3cc   :  { %v2018_v33 = vpop.f32.mrf.mxu2  ;;  %v2031_v13 = vpop.f32.mrf.mxu3 }
 0x3cd   :  { %v2072_v26 = vpop.f32.mrf.mxu0  ;;  %v2085_v10 = vpop.f32.mrf.mxu1 }
 0x3ce   :  { %v2253_v45 = vadd.f32 %v2072_v26, %v6315_v44  ;;  %v2254_v31 = vadd.f32 %v2085_v10, %v6316_v29 }
 0x3d0   :  { %v2257_v19 = vmul.f32 0.5, %v2253_v45  ;;  %v2261_v55 = vmul.f32 0.5, %v2254_v31 }
 0x3d2   :  { %4098 = vtanh.f32 %v2257_v19 }
 0x3d3   :  { %4100 = vtanh.f32 %v2261_v55 }
 0x3d4   :  { %v2098_v4 = vpop.f32.mrf.mxu2  ;;  %v2111_v18 = vpop.f32.mrf.mxu3 }
 0x3d5   :  { %v2255_v5 = vadd.f32 %v2098_v4, %v6317_v50  ;;  %v2074_v60 = vpop.f32.mrf.mxu0  ;;  %v2087_v30 = vpop.f32.mrf.mxu1 }
 0x3d7   :  { %4102 = vtanh.f32 %v2255_v5 }
 0x3d8   :  { %v4099_v57 = vpop.eup %4098 }
 0x3d9   :  { %v4101_v33 = vpop.eup %4100  ;;  %v2259_v6 = vmul.f32 0.5, %v4099_v57 }
 0x3da   :  { %v2263_v13 = vmul.f32 0.5, %v4101_v33 }
 0x3db   :  { %v2260_v63 = vadd.f32 0.5, %v2259_v6 }
 0x3dc   :  { %v2264_v58 = vadd.f32 0.5, %v2263_v13  ;;  %v2100_v44 = vpop.f32.mrf.mxu2  ;;  %v2113_v26 = vpop.f32.mrf.mxu3 }
 0x3dd   :  { %v4103_v10 = vpop.eup %4102 }
 0x3de   :  { %v2270_v29 = vmul.f32 %v2264_v58, %v5145_v54  ;;  %v2271_v19 = vmul.f32 %v4103_v10, %v2260_v63  ;;  %v2124_v45 = vpop.f32.mrf.mxu0  ;;  %v2137_v31 = vpop.f32.mrf.mxu1 }
 0x3df   :  { %v2167_v55 = vadd.f32 %v2124_v45, %v1990_v51  ;;  %v2168_v41 = vadd.f32 %v2137_v31, %v2003_v37 }
 0x3e0   :  { %v5259_v50 = vadd.f32 %v2271_v19, %v2270_v29 }
 0x3e1   :  { %v2171_v5 = vadd.f32 %v2167_v55, %v6176_v42  ;;  %v2172_v30 = vadd.f32 %v2168_v41, %v6177_v47 }
 0x3e3   :  { %v2175_v60 = vmul.f32 0.5, %v2171_v5  ;;  %v2179_v4 = vmul.f32 0.5, %v2172_v30  ;;  %v6318_v30 = vld [vmem:[#allocation124_spill] sm:$0xff] }
 0x3e5   :  { %4104 = vtanh.f32 %v2175_v60  ;;  %v2256_v60 = vadd.f32 %v2111_v18, %v6318_v30  ;;  %v6330_v30 = vld [vmem:[#allocation130_spill] sm:$0xff] }
 0x3e6   :  { %v2150_v57 = vpop.f32.mrf.mxu2  ;;  %v2163_v33 = vpop.f32.mrf.mxu3  ;;  %4106 = vtanh.f32 %v2179_v4 }
 0x3e7   :  { %v2169_v6 = vadd.f32 %v2150_v57, %v2016_v49  ;;  %v2170_v13 = vadd.f32 %v2163_v33, %v2029_v46  ;;  %v2126_v58 = vpop.f32.mrf.mxu0  ;;  %v2139_v54 = vpop.f32.mrf.mxu1  ;;  %v2266_v33 = vmul.f32 0.5, %v2256_v60  ;;  %v6331_v60 = vld [vmem:[#allocation131_spill] sm:$0xff] }
 0x3e9   :  { %v2173_v63 = vadd.f32 %v2169_v6, %v4912_v59  ;;  %v2174_v51 = vadd.f32 %v2170_v13, %v4914_v11 }
 0x3eb   :  { %4108 = vtanh.f32 %v2173_v63  ;;  %v2184_v37 = vmul.f32 0.5, %v2174_v51  ;;  %v4105_v44 = vpop.eup %4104 }
 0x3ec   :  { %v4107_v26 = vpop.eup %4106  ;;  %v2177_v10 = vmul.f32 0.5, %v4105_v44 }
 0x3ed   :  { %v2181_v41 = vmul.f32 0.5, %v4107_v26  ;;  %4110 = vtanh.f32 %v2184_v37  ;;  %v6319_v26 = vld [vmem:[#allocation111_spill] sm:$0xff] }
 0x3ee   :  { %v2152_v29 = vpop.f32.mrf.mxu2  ;;  %v2165_v19 = vpop.f32.mrf.mxu3  ;;  %v2178_v45 = vadd.f32 0.5, %v2177_v10  ;;  %v6320_v10 = vld [vmem:[#allocation112_spill] sm:$0xff] }
 0x3ef   :  { %v2182_v31 = vadd.f32 0.5, %v2181_v41  ;;  %v6321_v41 = vld [vmem:[#allocation114_spill] sm:$0xff]  ;;  %v6322_v29 = vld [vmem:[#allocation115_spill] sm:$0xff]  ;;  %v6323_v19 = vld [vmem:[#allocation116_spill] sm:$0xff] }
 0x3f1   :  { %v4109_v55 = vpop.eup %4108  ;;  %v2188_v49 = vmul.f32 %v2182_v31, %v5155_v14  ;;  %v6325_v31 = vld [vmem:[#allocation118_spill] sm:$0xff] }
 0x3f2   :  { %v2189_v46 = vmul.f32 %v4109_v55, %v2178_v45  ;;  %v6324_v45 = vld [vmem:[#allocation117_spill] sm:$0xff]  ;;  %v6326_v55 = vld [vmem:[#allocation119_spill] sm:$0xff] }
 0x3f3   :  { %v4111_v5 = vpop.eup %4110 }
 0x3f4   :  { %v5267_v4 = vadd.f32 %v2189_v46, %v2188_v49  ;;  %v2186_v57 = vmul.f32 0.5, %v4111_v5  ;;  %v6327_v49 = vld [vmem:[#allocation121_spill] sm:$0xff]  ;;  %v6328_v46 = vld [vmem:[#allocation122_spill] sm:$0xff] }
 0x3f5   :  { %v6329_v5 = vld [vmem:[#allocation125_spill] sm:$0xff] }
 0x3f6   :  { %4112 = vtanh.f32 %v5267_v4  ;;  %v2187_v6 = vadd.f32 0.5, %v2186_v57  ;;  %v6332_v57 = vld [vmem:[#allocation132_spill] sm:$0xff] }
 0x3f7   :  { %4114 = vtanh.f32 %v2266_v33  ;;  %v6333_v33 = vld [vmem:[#allocation133_spill] sm:$0xff] }
 0x3f8   :  { %4116 = vtanh.f32 %v5259_v50 }
 0x3fc   :  { %v4113_v13 = vpop.eup %4112 }
 0x3fd   :  { %v2192_v58 = vmul.f32 %v4113_v13, %v2187_v6  ;;  %v4115_v63 = vpop.eup %4114  ;;  %v6334_v6 = vld [vmem:[#allocation134_spill] sm:$0xff]  ;;  %v6335_v13 = vld [vmem:[#allocation135_spill] sm:$0xff] }
 0x3fe   :  { %v2268_v14 = vmul.f32 0.5, %v4115_v63  ;;  %v4117_v18 = vpop.eup %4116  ;;  %v6338_v63 = vld [vmem:[#allocation138_spill] sm:$0xff] }
 0x3ff   :  { %v2193_v54 = vpack.c.bf16 %v2192_v58, %v2192_v58  ;;  %v6336_v58 = vld [vmem:[#allocation136_spill] sm:$0xff] }
 0x400   :  { %v2269_v51 = vadd.f32 0.5, %v2268_v14  ;;  %v6339_v14 = vld [vmem:[#allocation139_spill] sm:$0xff] }
 0x401   :  { %2202 = vmatmul.bf16.vlgmr.msrb.gmra.mxu0 %v2193_v54  ;;  %2215 = vmatmul.bf16.vlgmr.msrb.gmra.mxu1 %v2193_v54 }
 0x402   :  { %2228 = vmatmul.bf16.vlgmr.msrb.gmra.mxu2 %v2193_v54  ;;  %2241 = vmatmul.bf16.vlgmr.msrb.gmra.mxu3 %v2193_v54  ;;  %v2274_v37 = vmul.f32 %v4117_v18, %v2269_v51  ;;  %v6337_v54 = vld [vmem:[#allocation137_spill] sm:$0xff]  ;;  %v6340_v18 = vld [vmem:[#allocation140_spill] sm:$0xff] }
 0x403   :  { %2328 = vmatpush.bf16.msrb.mxu0 %v6117_v2  ;;  %2341 = vmatpush.bf16.msrb.mxu1 %v6118_v8  ;;  %v6341_v51 = vld [vmem:[#allocation141_spill] sm:$0xff] }
 0x404   :  { %2354 = vmatpush.bf16.msrb.mxu2 %v6119_v34  ;;  %2367 = vmatpush.bf16.msrb.mxu3 %v6120_v52  ;;  %v2275_v44 = vpack.c.bf16 %v2274_v37, %v2274_v37  ;;  %v6342_v37 = vld [vmem:[#allocation142_spill] sm:$0xff] }
 0x407   :  { %2329 = vmatpush.bf16.msrb.mxu0 %v6121_v27  ;;  %2342 = vmatpush.bf16.msrb.mxu1 %v6122_v36 }
 0x408   :  { %2355 = vmatpush.bf16.msrb.mxu2 %v6179_v0  ;;  %2368 = vmatpush.bf16.msrb.mxu3 %v6124_v7 }
 0x40b   :  { %2330 = vmatpush.bf16.msrb.mxu0 %v6125_v62  ;;  %2343 = vmatpush.bf16.msrb.mxu1 %v6126_v35 }
 0x40c   :  { %2356 = vmatpush.bf16.msrb.mxu2 %v6180_v24  ;;  %2369 = vmatpush.bf16.msrb.mxu3 %v6181_v39 }
 0x40f   :  { %2331 = vmatpush.bf16.msrb.mxu0 %v6182_v22  ;;  %2344 = vmatpush.bf16.msrb.mxu1 %v6183_v43 }
 0x410   :  { %2357 = vmatpush.bf16.msrb.mxu2 %v6184_v61  ;;  %2370 = vmatpush.bf16.msrb.mxu3 %v6185_v40 }
 0x411   :  { %2284 = vmatmul.bf16.vlgmr.msra.gmra.mxu0 %v2275_v44  ;;  %2297 = vmatmul.bf16.vlgmr.msra.gmra.mxu1 %v2275_v44 }
 0x412   :  { %2310 = vmatmul.bf16.vlgmr.msra.gmra.mxu2 %v2275_v44  ;;  %2323 = vmatmul.bf16.vlgmr.msra.gmra.mxu3 %v2275_v44 }
 0x413   :  { %2332 = vmatpush.bf16.msrb.mxu0 %v6186_v23  ;;  %2345 = vmatpush.bf16.msrb.mxu1 %v6187_v17 }
 0x414   :  { %2358 = vmatpush.bf16.msrb.mxu2 %v6188_v16  ;;  %2371 = vmatpush.bf16.msrb.mxu3 %v6189_v21 }
 0x417   :  { %2333 = vmatpush.bf16.msrb.mxu0 %v6190_v1  ;;  %2346 = vmatpush.bf16.msrb.mxu1 %v6191_v12 }
 0x418   :  { %2359 = vmatpush.bf16.msrb.mxu2 %v6192_v32  ;;  %2372 = vmatpush.bf16.msrb.mxu3 %v6140_v53 }
 0x41b   :  { %2334 = vmatpush.bf16.msrb.mxu0 %v6141_v56  ;;  %2347 = vmatpush.bf16.msrb.mxu1 %v6193_v38 }
 0x41c   :  { %2360 = vmatpush.bf16.msrb.mxu2 %v6194_v3  ;;  %2373 = vmatpush.bf16.msrb.mxu3 %v6143_v20 }
 0x41f   :  { %2335 = vmatpush.bf16.msrb.mxu0 %v6252_v48  ;;  %2348 = vmatpush.bf16.msrb.mxu1 %v6253_v15 }
 0x420   :  { %2361 = vmatpush.bf16.msrb.mxu2 %v6254_v28  ;;  %2374 = vmatpush.bf16.msrb.mxu3 %v6255_v9 }
 0x422   :  { %2336 = vmatmul.bf16.vlgmr.msrb.gmra.mxu0 %v2275_v44  ;;  %2349 = vmatmul.bf16.vlgmr.msrb.gmra.mxu1 %v2275_v44 }
 0x423   :  { %2407 = vmatpush.bf16.msra.mxu0 %v6256_v25  ;;  %2420 = vmatpush.bf16.msra.mxu1 %v6319_v26 }
 0x424   :  { %2362 = vmatmul.bf16.vlgmr.msrb.gmra.mxu2 %v2275_v44  ;;  %2375 = vmatmul.bf16.vlgmr.msrb.gmra.mxu3 %v2275_v44  ;;  %v6343_v44 = vld [vmem:[#allocation143_spill] sm:$0xff] }
 0x425   :  { %2433 = vmatpush.bf16.msra.mxu2 %v6320_v10  ;;  %2446 = vmatpush.bf16.msra.mxu3 %v6321_v41  ;;  %v6388_v41 = vld [vmem:[#allocation83_spill] sm:$0xff]  ;;  %v6389_v10 = vld [vmem:[#allocation120_spill] sm:$0xff] }
 0x427   :  { %2408 = vmatpush.bf16.msra.mxu0 %v6322_v29  ;;  %2421 = vmatpush.bf16.msra.mxu1 %v6323_v19 }
 0x429   :  { %2434 = vmatpush.bf16.msra.mxu2 %v6324_v45  ;;  %2447 = vmatpush.bf16.msra.mxu3 %v6325_v31 }
 0x42b   :  { %2409 = vmatpush.bf16.msra.mxu0 %v6326_v55  ;;  %2422 = vmatpush.bf16.msra.mxu1 %v6327_v49  ;;  %v6386_v49 = vld [vmem:[#allocation53_spill] sm:$0xff] }
 0x42c   :  { %v6387_v55 = vld [vmem:[#allocation65_spill] sm:$0xff] }
 0x42d   :  { %2435 = vmatpush.bf16.msra.mxu2 %v6328_v46  ;;  %2448 = vmatpush.bf16.msra.mxu3 %v6329_v5  ;;  %v6385_v46 = vld [vmem:[#allocation62_spill] sm:$0xff] }
 0x42f   :  { %2410 = vmatpush.bf16.msra.mxu0 %v6330_v30  ;;  %2423 = vmatpush.bf16.msra.mxu1 %v6331_v60  ;;  %v6382_v30 = vld [vmem:[#allocation29_spill] sm:$0xff] }
 0x431   :  { %2436 = vmatpush.bf16.msra.mxu2 %v6332_v57  ;;  %2449 = vmatpush.bf16.msra.mxu3 %v6333_v33  ;;  %v6344_v33 = vld [vmem:[#allocation144_spill] sm:$0xff] }
 0x433   :  { %2411 = vmatpush.bf16.msra.mxu0 %v6334_v6  ;;  %2424 = vmatpush.bf16.msra.mxu1 %v6335_v13  ;;  %v6345_v6 = vld [vmem:[#allocation145_spill] sm:$0xff]  ;;  %v6346_v13 = vld [vmem:[#allocation146_spill] sm:$0xff] }
 0x435   :  { %2437 = vmatpush.bf16.msra.mxu2 %v6336_v58  ;;  %2450 = vmatpush.bf16.msra.mxu3 %v6337_v54  ;;  %v6347_v58 = vld [vmem:[#allocation147_spill] sm:$0xff]  ;;  %v6348_v54 = vld [vmem:[#allocation18_spill] sm:$0xff] }
 0x437   :  { %2412 = vmatpush.bf16.msra.mxu0 %v6338_v63  ;;  %2425 = vmatpush.bf16.msra.mxu1 %v6339_v14  ;;  %v6349_v63 = vld [vmem:[#allocation19_spill] sm:$0xff]  ;;  %v6350_v14 = vld [vmem:[#allocation148_spill] sm:$0xff] }
 0x439   :  { %2438 = vmatpush.bf16.msra.mxu2 %v6340_v18  ;;  %2451 = vmatpush.bf16.msra.mxu3 %v6341_v51  ;;  %v6351_v18 = vld [vmem:[#allocation149_spill] sm:$0xff]  ;;  %v6352_v51 = vld [vmem:[#allocation20_spill] sm:$0xff] }
 0x43b   :  { %2413 = vmatpush.bf16.msra.mxu0 %v6342_v37  ;;  %2426 = vmatpush.bf16.msra.mxu1 %v6343_v44  ;;  %v6353_v37 = vld [vmem:[#allocation21_spill] sm:$0xff]  ;;  %v6354_v44 = vld [vmem:[#allocation22_spill] sm:$0xff] }
 0x43d   :  { %2439 = vmatpush.bf16.msra.mxu2 %v6344_v33  ;;  %2452 = vmatpush.bf16.msra.mxu3 %v6345_v6  ;;  %v6355_v33 = vld [vmem:[#allocation23_spill] sm:$0xff]  ;;  %v6356_v6 = vld [vmem:[#allocation24_spill] sm:$0xff] }
 0x43f   :  { %2414 = vmatpush.bf16.msra.mxu0 %v6346_v13  ;;  %2427 = vmatpush.bf16.msra.mxu1 %v6347_v58  ;;  %v6357_v13 = vld [vmem:[#allocation25_spill] sm:$0xff]  ;;  %v6358_v58 = vld [vmem:[#allocation26_spill] sm:$0xff] }
 0x441   :  { %2440 = vmatpush.bf16.msra.mxu2 %v6350_v14  ;;  %2453 = vmatpush.bf16.msra.mxu3 %v6351_v18  ;;  %v6361_v14 = vld [vmem:[#allocation31_spill] sm:$0xff]  ;;  %v6362_v18 = vld [vmem:[#allocation32_spill] sm:$0xff] }
 0x443   :  { %2489 = vmatpush.bf16.msrb.mxu0 %v6348_v54  ;;  %2502 = vmatpush.bf16.msrb.mxu1 %v6349_v63  ;;  %v6359_v54 = vld [vmem:[#allocation27_spill] sm:$0xff]  ;;  %v6360_v63 = vld [vmem:[#allocation28_spill] sm:$0xff] }
 0x445   :  { %2515 = vmatpush.bf16.msrb.mxu2 %v6352_v51  ;;  %2528 = vmatpush.bf16.msrb.mxu3 %v6353_v37  ;;  %v6363_v51 = vld [vmem:[#allocation33_spill] sm:$0xff]  ;;  %v6364_v37 = vld [vmem:[#allocation35_spill] sm:$0xff] }
 0x447   :  { %2490 = vmatpush.bf16.msrb.mxu0 %v6354_v44  ;;  %2503 = vmatpush.bf16.msrb.mxu1 %v6355_v33  ;;  %v6365_v44 = vld [vmem:[#allocation39_spill] sm:$0xff]  ;;  %v6366_v33 = vld [vmem:[#allocation40_spill] sm:$0xff] }
 0x449   :  { %2516 = vmatpush.bf16.msrb.mxu2 %v6356_v6  ;;  %2529 = vmatpush.bf16.msrb.mxu3 %v6357_v13  ;;  %v6367_v6 = vld [vmem:[#allocation41_spill] sm:$0xff]  ;;  %v6368_v13 = vld [vmem:[#allocation42_spill] sm:$0xff] }
 0x44b   :  { %2491 = vmatpush.bf16.msrb.mxu0 %v6358_v58  ;;  %2504 = vmatpush.bf16.msrb.mxu1 %v6359_v54  ;;  %v6369_v58 = vld [vmem:[#allocation45_spill] sm:$0xff]  ;;  %v6370_v54 = vld [vmem:[#allocation47_spill] sm:$0xff] }
 0x44d   :  { %2517 = vmatpush.bf16.msrb.mxu2 %v6360_v63  ;;  %2530 = vmatpush.bf16.msrb.mxu3 %v6361_v14  ;;  %v6371_v63 = vld [vmem:[#allocation48_spill] sm:$0xff]  ;;  %v6372_v14 = vld [vmem:[#allocation49_spill] sm:$0xff] }
 0x44f   :  { %2492 = vmatpush.bf16.msrb.mxu0 %v6362_v18  ;;  %2505 = vmatpush.bf16.msrb.mxu1 %v6363_v51  ;;  %v6373_v18 = vld [vmem:[#allocation50_spill] sm:$0xff]  ;;  %v6374_v51 = vld [vmem:[#allocation52_spill] sm:$0xff] }
 0x451   :  { %2518 = vmatpush.bf16.msrb.mxu2 %v6364_v37  ;;  %2531 = vmatpush.bf16.msrb.mxu3 %v6365_v44  ;;  %v6375_v37 = vld [vmem:[#allocation54_spill] sm:$0xff]  ;;  %v6376_v44 = vld [vmem:[#allocation56_spill] sm:$0xff] }
 0x453   :  { %2493 = vmatpush.bf16.msrb.mxu0 %v6366_v33  ;;  %2506 = vmatpush.bf16.msrb.mxu1 %v6367_v6  ;;  %v6377_v33 = vld [vmem:[#allocation57_spill] sm:$0xff]  ;;  %v6378_v6 = vld [vmem:[#allocation58_spill] sm:$0xff] }
 0x455   :  { %2519 = vmatpush.bf16.msrb.mxu2 %v6368_v13  ;;  %2532 = vmatpush.bf16.msrb.mxu3 %v6369_v58  ;;  %v6379_v13 = vld [vmem:[#allocation59_spill] sm:$0xff]  ;;  %v6380_v58 = vld [vmem:[#allocation60_spill] sm:$0xff] }
 0x457   :  { %2494 = vmatpush.bf16.msrb.mxu0 %v6370_v54  ;;  %2507 = vmatpush.bf16.msrb.mxu1 %v6371_v63  ;;  %v6381_v54 = vld [vmem:[#allocation61_spill] sm:$0xff] }
 0x459   :  { %2520 = vmatpush.bf16.msrb.mxu2 %v6372_v14  ;;  %2533 = vmatpush.bf16.msrb.mxu3 %v6373_v18 }
 0x45b   :  { %2495 = vmatpush.bf16.msrb.mxu0 %v6374_v51  ;;  %2508 = vmatpush.bf16.msrb.mxu1 %v6375_v37  ;;  %v6383_v37 = vld [vmem:[#allocation51_spill] sm:$0xff] }
 0x45c   :  { %v556_v5 = vadd.f32 %v6383_v37, %v6382_v30  ;;  %v6390_v37 = vld [vmem:[#allocation123_spill] sm:$0xff] }
 0x45d   :  { %2521 = vmatpush.bf16.msrb.mxu2 %v6376_v44  ;;  %2534 = vmatpush.bf16.msrb.mxu3 %v6377_v33  ;;  %v6384_v44 = vld [vmem:[#allocation34_spill] sm:$0xff] }
 0x45e   :  { %v614_v33 = vadd.f32 %v6385_v46, %v6384_v44 }
 0x45f   :  { %2496 = vmatpush.bf16.msrb.mxu0 %v6378_v6  ;;  %2509 = vmatpush.bf16.msrb.mxu1 %v6379_v13  ;;  %v585_v6 = vadd.f32 %v6386_v49, %v556_v5 }
 0x460   :  { %v643_v13 = vadd.f32 %v6387_v55, %v614_v33 }
 0x461   :  { %2522 = vmatpush.bf16.msrb.mxu2 %v6380_v58  ;;  %2535 = vmatpush.bf16.msrb.mxu3 %v6381_v54 }
 0x47e   :  { %v2203_v63 = vpop.f32.mrf.mxu0  ;;  %v2216_v14 = vpop.f32.mrf.mxu1 }
 0x485   :  { %v2229_v57 = vpop.f32.mrf.mxu2  ;;  %v2242_v18 = vpop.f32.mrf.mxu3 }
 0x486   :  { %v2205_v60 = vpop.f32.mrf.mxu0  ;;  %v2218_v51 = vpop.f32.mrf.mxu1 }
 0x487   :  { %v672_v60 = vadd.f32 %v6389_v10, %v6388_v41 }
 0x489   :  { %v701_v30 = vadd.f32 %v6390_v37, %v672_v60 }
 0x48d   :  { %v2231_v31 = vpop.f32.mrf.mxu2  ;;  %v2244_v58 = vpop.f32.mrf.mxu3 }
 0x48e   :  { %v2285_v45 = vpop.f32.mrf.mxu0  ;;  %v2298_v54 = vpop.f32.mrf.mxu1 }
 0x48f   :  { %v2466_v19 = vadd.f32 %v2285_v45, %v585_v6  ;;  %v2467_v29 = vadd.f32 %v2298_v54, %v643_v13 }
 0x491   :  { %v2470_v51 = vmul.f32 0.5, %v2466_v19  ;;  %v2474_v26 = vmul.f32 0.5, %v2467_v29 }
 0x493   :  { %4118 = vtanh.f32 %v2470_v51 }
 0x494   :  { %4120 = vtanh.f32 %v2474_v26 }
 0x495   :  { %v2311_v46 = vpop.f32.mrf.mxu2  ;;  %v2324_v44 = vpop.f32.mrf.mxu3 }
 0x496   :  { %v2468_v49 = vadd.f32 %v2311_v46, %v701_v30  ;;  %v2287_v5 = vpop.f32.mrf.mxu0  ;;  %v2300_v55 = vpop.f32.mrf.mxu1 }
 0x498   :  { %4122 = vtanh.f32 %v2468_v49 }
 0x499   :  { %v4119_v31 = vpop.eup %4118 }
 0x49a   :  { %v4121_v33 = vpop.eup %4120  ;;  %v2472_v58 = vmul.f32 0.5, %v4119_v31 }
 0x49b   :  { %v2476_v45 = vmul.f32 0.5, %v4121_v33 }
 0x49c   :  { %v2473_v6 = vadd.f32 0.5, %v2472_v58 }
 0x49d   :  { %v2477_v13 = vadd.f32 0.5, %v2476_v45  ;;  %v2313_v54 = vpop.f32.mrf.mxu2  ;;  %v2326_v10 = vpop.f32.mrf.mxu3 }
 0x49e   :  { %v4123_v19 = vpop.eup %4122 }
 0x49f   :  { %v2483_v29 = vmul.f32 %v2477_v13, %v5259_v50  ;;  %v2484_v51 = vmul.f32 %v4123_v19, %v2473_v6  ;;  %v2337_v60 = vpop.f32.mrf.mxu0  ;;  %v2350_v26 = vpop.f32.mrf.mxu1 }
 0x4a0   :  { %v2380_v37 = vadd.f32 %v2337_v60, %v2203_v63  ;;  %v2381_v41 = vadd.f32 %v2350_v26, %v2216_v14 }
 0x4a1   :  { %v5377_v30 = vadd.f32 %v2484_v51, %v2483_v29  ;;  %v6392_v29 = vld [vmem:[#allocation126_spill] sm:$0xff] }
 0x4a2   :  { %v2384_v46 = vadd.f32 %v2380_v37, %v6176_v42  ;;  %v2385_v49 = vadd.f32 %v2381_v41, %v6177_v47  ;;  %v6391_v41 = vld [vmem:[#allocation95_spill] sm:$0xff] }
 0x4a3   :  { %v730_v51 = vadd.f32 %v6392_v29, %v6391_v41  ;;  %v6418_v41 = vld [vmem:[#allocation143_spill] sm:$0xff] }
 0x4a4   :  { %v2388_v5 = vmul.f32 0.5, %v2384_v46  ;;  %v2392_v55 = vmul.f32 0.5, %v2385_v49  ;;  %v6393_v49 = vld [vmem:[#allocation127_spill] sm:$0xff] }
 0x4a6   :  { %4124 = vtanh.f32 %v2388_v5  ;;  %v759_v5 = vadd.f32 %v6393_v49, %v730_v51  ;;  %v6400_v49 = vld [vmem:[#allocation118_spill] sm:$0xff] }
 0x4a7   :  { %v2363_v31 = vpop.f32.mrf.mxu2  ;;  %v2376_v33 = vpop.f32.mrf.mxu3  ;;  %4126 = vtanh.f32 %v2392_v55 }
 0x4a8   :  { %v2382_v58 = vadd.f32 %v2363_v31, %v2229_v57  ;;  %v2383_v45 = vadd.f32 %v2376_v33, %v2242_v18  ;;  %v2339_v50 = vpop.f32.mrf.mxu0  ;;  %v2352_v6 = vpop.f32.mrf.mxu1 }
 0x4aa   :  { %v2386_v13 = vadd.f32 %v2382_v58, %v4912_v59  ;;  %v2387_v63 = vadd.f32 %v2383_v45, %v4914_v11  ;;  %v2469_v58 = vadd.f32 %v2324_v44, %v759_v5  ;;  %v6401_v5 = vld [vmem:[#allocation119_spill] sm:$0xff] }
 0x4ac   :  { %4128 = vtanh.f32 %v2386_v13  ;;  %v2397_v14 = vmul.f32 0.5, %v2387_v63  ;;  %v4125_v54 = vpop.eup %4124  ;;  %v2479_v6 = vmul.f32 0.5, %v2469_v58  ;;  %v6405_v58 = vld [vmem:[#allocation130_spill] sm:$0xff] }
 0x4ad   :  { %v4127_v10 = vpop.eup %4126  ;;  %v2390_v19 = vmul.f32 0.5, %v4125_v54 }
 0x4ae   :  { %v2394_v60 = vmul.f32 0.5, %v4127_v10  ;;  %4130 = vtanh.f32 %v2397_v14 }
 0x4af   :  { %v2365_v26 = vpop.f32.mrf.mxu2  ;;  %v2378_v37 = vpop.f32.mrf.mxu3  ;;  %v2391_v57 = vadd.f32 0.5, %v2390_v19 }
 0x4b0   :  { %v2395_v18 = vadd.f32 0.5, %v2394_v60  ;;  %v6394_v60 = vld [vmem:[#allocation111_spill] sm:$0xff]  ;;  %v6395_v26 = vld [vmem:[#allocation112_spill] sm:$0xff]  ;;  %v6396_v37 = vld [vmem:[#allocation114_spill] sm:$0xff] }
 0x4b2   :  { %v4129_v46 = vpop.eup %4128  ;;  %v2401_v55 = vmul.f32 %v2395_v18, %v5267_v4  ;;  %v6398_v18 = vld [vmem:[#allocation116_spill] sm:$0xff] }
 0x4b3   :  { %v2402_v31 = vmul.f32 %v4129_v46, %v2391_v57  ;;  %v6397_v57 = vld [vmem:[#allocation115_spill] sm:$0xff]  ;;  %v6399_v46 = vld [vmem:[#allocation117_spill] sm:$0xff] }
 0x4b4   :  { %v4131_v33 = vpop.eup %4130 }
 0x4b5   :  { %v5387_v45 = vadd.f32 %v2402_v31, %v2401_v55  ;;  %v2399_v50 = vmul.f32 0.5, %v4131_v33  ;;  %v6402_v55 = vld [vmem:[#allocation121_spill] sm:$0xff]  ;;  %v6403_v31 = vld [vmem:[#allocation122_spill] sm:$0xff] }
 0x4b6   :  { %v6404_v33 = vld [vmem:[#allocation125_spill] sm:$0xff] }
 0x4b7   :  { %4132 = vtanh.f32 %v5387_v45  ;;  %v2400_v13 = vadd.f32 0.5, %v2399_v50  ;;  %v6406_v50 = vld [vmem:[#allocation131_spill] sm:$0xff] }
 0x4b8   :  { %4134 = vtanh.f32 %v2479_v6  ;;  %v6407_v6 = vld [vmem:[#allocation132_spill] sm:$0xff] }
 0x4b9   :  { %4136 = vtanh.f32 %v5377_v30 }
 0x4bd   :  { %v4133_v63 = vpop.eup %4132 }
 0x4be   :  { %v2405_v14 = vmul.f32 %v4133_v63, %v2400_v13  ;;  %v4135_v10 = vpop.eup %4134  ;;  %v6408_v13 = vld [vmem:[#allocation133_spill] sm:$0xff]  ;;  %v6409_v63 = vld [vmem:[#allocation134_spill] sm:$0xff] }
 0x4bf   :  { %v2481_v4 = vmul.f32 0.5, %v4135_v10  ;;  %v4137_v44 = vpop.eup %4136  ;;  %v6412_v10 = vld [vmem:[#allocation137_spill] sm:$0xff] }
 0x4c0   :  { %v2406_v54 = vpack.c.bf16 %v2405_v14, %v2405_v14  ;;  %v6410_v14 = vld [vmem:[#allocation135_spill] sm:$0xff] }
 0x4c1   :  { %v2482_v19 = vadd.f32 0.5, %v2481_v4  ;;  %v6413_v4 = vld [vmem:[#allocation138_spill] sm:$0xff] }
 0x4c2   :  { %2415 = vmatmul.bf16.vlgmr.msra.gmra.mxu0 %v2406_v54  ;;  %2428 = vmatmul.bf16.vlgmr.msra.gmra.mxu1 %v2406_v54 }
 0x4c3   :  { %2441 = vmatmul.bf16.vlgmr.msra.gmra.mxu2 %v2406_v54  ;;  %2454 = vmatmul.bf16.vlgmr.msra.gmra.mxu3 %v2406_v54  ;;  %v2487_v29 = vmul.f32 %v4137_v44, %v2482_v19  ;;  %v6411_v54 = vld [vmem:[#allocation136_spill] sm:$0xff]  ;;  %v6414_v44 = vld [vmem:[#allocation139_spill] sm:$0xff] }
 0x4c4   :  { %2541 = vmatpush.bf16.msra.mxu0 %v6117_v2  ;;  %2554 = vmatpush.bf16.msra.mxu1 %v6118_v8  ;;  %v6415_v19 = vld [vmem:[#allocation140_spill] sm:$0xff] }
 0x4c5   :  { %2567 = vmatpush.bf16.msra.mxu2 %v6119_v34  ;;  %2580 = vmatpush.bf16.msra.mxu3 %v6120_v52  ;;  %v2488_v51 = vpack.c.bf16 %v2487_v29, %v2487_v29  ;;  %v6416_v29 = vld [vmem:[#allocation141_spill] sm:$0xff] }
 0x4c8   :  { %2542 = vmatpush.bf16.msra.mxu0 %v6121_v27  ;;  %2555 = vmatpush.bf16.msra.mxu1 %v6122_v36 }
 0x4c9   :  { %2568 = vmatpush.bf16.msra.mxu2 %v6179_v0  ;;  %2581 = vmatpush.bf16.msra.mxu3 %v6124_v7 }
 0x4cc   :  { %2543 = vmatpush.bf16.msra.mxu0 %v6125_v62  ;;  %2556 = vmatpush.bf16.msra.mxu1 %v6126_v35 }
 0x4cd   :  { %2569 = vmatpush.bf16.msra.mxu2 %v6180_v24  ;;  %2582 = vmatpush.bf16.msra.mxu3 %v6181_v39 }
 0x4d0   :  { %2544 = vmatpush.bf16.msra.mxu0 %v6182_v22  ;;  %2557 = vmatpush.bf16.msra.mxu1 %v6183_v43 }
 0x4d1   :  { %2570 = vmatpush.bf16.msra.mxu2 %v6184_v61  ;;  %2583 = vmatpush.bf16.msra.mxu3 %v6185_v40 }
 0x4d2   :  { %2497 = vmatmul.bf16.vlgmr.msrb.gmra.mxu0 %v2488_v51  ;;  %2510 = vmatmul.bf16.vlgmr.msrb.gmra.mxu1 %v2488_v51 }
 0x4d3   :  { %2523 = vmatmul.bf16.vlgmr.msrb.gmra.mxu2 %v2488_v51  ;;  %2536 = vmatmul.bf16.vlgmr.msrb.gmra.mxu3 %v2488_v51 }
 0x4d4   :  { %2545 = vmatpush.bf16.msra.mxu0 %v6186_v23  ;;  %2558 = vmatpush.bf16.msra.mxu1 %v6187_v17 }
 0x4d5   :  { %2571 = vmatpush.bf16.msra.mxu2 %v6188_v16  ;;  %2584 = vmatpush.bf16.msra.mxu3 %v6189_v21 }
 0x4d8   :  { %2546 = vmatpush.bf16.msra.mxu0 %v6190_v1  ;;  %2559 = vmatpush.bf16.msra.mxu1 %v6191_v12 }
 0x4d9   :  { %2572 = vmatpush.bf16.msra.mxu2 %v6192_v32  ;;  %2585 = vmatpush.bf16.msra.mxu3 %v6140_v53 }
 0x4dc   :  { %2547 = vmatpush.bf16.msra.mxu0 %v6141_v56  ;;  %2560 = vmatpush.bf16.msra.mxu1 %v6193_v38 }
 0x4dd   :  { %2573 = vmatpush.bf16.msra.mxu2 %v6194_v3  ;;  %2586 = vmatpush.bf16.msra.mxu3 %v6143_v20 }
 0x4e0   :  { %2548 = vmatpush.bf16.msra.mxu0 %v6252_v48  ;;  %2561 = vmatpush.bf16.msra.mxu1 %v6253_v15 }
 0x4e1   :  { %2574 = vmatpush.bf16.msra.mxu2 %v6254_v28  ;;  %2587 = vmatpush.bf16.msra.mxu3 %v6255_v9 }
 0x4e3   :  { %2549 = vmatmul.bf16.vlgmr.msra.gmra.mxu0 %v2488_v51  ;;  %2562 = vmatmul.bf16.vlgmr.msra.gmra.mxu1 %v2488_v51 }
 0x4e4   :  { %2620 = vmatpush.bf16.msrb.mxu0 %v6256_v25  ;;  %2633 = vmatpush.bf16.msrb.mxu1 %v6394_v60 }
 0x4e5   :  { %2575 = vmatmul.bf16.vlgmr.msra.gmra.mxu2 %v2488_v51  ;;  %2588 = vmatmul.bf16.vlgmr.msra.gmra.mxu3 %v2488_v51  ;;  %v6417_v51 = vld [vmem:[#allocation142_spill] sm:$0xff] }
 0x4e6   :  { %2646 = vmatpush.bf16.msrb.mxu2 %v6395_v26  ;;  %2659 = vmatpush.bf16.msrb.mxu3 %v6396_v37 }
 0x4e8   :  { %2621 = vmatpush.bf16.msrb.mxu0 %v6397_v57  ;;  %2634 = vmatpush.bf16.msrb.mxu1 %v6398_v18 }
 0x4ea   :  { %2647 = vmatpush.bf16.msrb.mxu2 %v6399_v46  ;;  %2660 = vmatpush.bf16.msrb.mxu3 %v6400_v49  ;;  %v6459_v49 = vld [vmem:[#allocation128_spill] sm:$0xff] }
 0x4ec   :  { %2622 = vmatpush.bf16.msrb.mxu0 %v6401_v5  ;;  %2635 = vmatpush.bf16.msrb.mxu1 %v6402_v55  ;;  %v6458_v55 = vld [vmem:[#allocation80_spill] sm:$0xff] }
 0x4ee   :  { %2648 = vmatpush.bf16.msrb.mxu2 %v6403_v31  ;;  %2661 = vmatpush.bf16.msrb.mxu3 %v6404_v33  ;;  %v6457_v31 = vld [vmem:[#allocation70_spill] sm:$0xff] }
 0x4f0   :  { %2623 = vmatpush.bf16.msrb.mxu0 %v6405_v58  ;;  %2636 = vmatpush.bf16.msrb.mxu1 %v6406_v50 }
 0x4f2   :  { %2649 = vmatpush.bf16.msrb.mxu2 %v6407_v6  ;;  %2662 = vmatpush.bf16.msrb.mxu3 %v6408_v13  ;;  %v6419_v13 = vld [vmem:[#allocation144_spill] sm:$0xff] }
 0x4f4   :  { %2624 = vmatpush.bf16.msrb.mxu0 %v6409_v63  ;;  %2637 = vmatpush.bf16.msrb.mxu1 %v6410_v14  ;;  %v6420_v63 = vld [vmem:[#allocation145_spill] sm:$0xff]  ;;  %v6421_v14 = vld [vmem:[#allocation146_spill] sm:$0xff] }
 0x4f6   :  { %2650 = vmatpush.bf16.msrb.mxu2 %v6411_v54  ;;  %2663 = vmatpush.bf16.msrb.mxu3 %v6412_v10  ;;  %v6422_v54 = vld [vmem:[#allocation147_spill] sm:$0xff]  ;;  %v6423_v10 = vld [vmem:[#allocation18_spill] sm:$0xff] }
 0x4f8   :  { %2625 = vmatpush.bf16.msrb.mxu0 %v6413_v4  ;;  %2638 = vmatpush.bf16.msrb.mxu1 %v6414_v44  ;;  %v6424_v4 = vld [vmem:[#allocation19_spill] sm:$0xff]  ;;  %v6425_v44 = vld [vmem:[#allocation148_spill] sm:$0xff] }
 0x4fa   :  { %2651 = vmatpush.bf16.msrb.mxu2 %v6415_v19  ;;  %2664 = vmatpush.bf16.msrb.mxu3 %v6416_v29  ;;  %v6426_v19 = vld [vmem:[#allocation149_spill] sm:$0xff]  ;;  %v6427_v29 = vld [vmem:[#allocation20_spill] sm:$0xff] }
 0x4fc   :  { %2626 = vmatpush.bf16.msrb.mxu0 %v6417_v51  ;;  %2639 = vmatpush.bf16.msrb.mxu1 %v6418_v41  ;;  %v6428_v51 = vld [vmem:[#allocation21_spill] sm:$0xff]  ;;  %v6429_v41 = vld [vmem:[#allocation22_spill] sm:$0xff] }
 0x4fe   :  { %2652 = vmatpush.bf16.msrb.mxu2 %v6419_v13  ;;  %2665 = vmatpush.bf16.msrb.mxu3 %v6420_v63  ;;  %v6430_v13 = vld [vmem:[#allocation23_spill] sm:$0xff]  ;;  %v6431_v63 = vld [vmem:[#allocation24_spill] sm:$0xff] }
 0x500   :  { %2627 = vmatpush.bf16.msrb.mxu0 %v6421_v14  ;;  %2640 = vmatpush.bf16.msrb.mxu1 %v6422_v54  ;;  %v6432_v14 = vld [vmem:[#allocation25_spill] sm:$0xff]  ;;  %v6433_v54 = vld [vmem:[#allocation26_spill] sm:$0xff] }
 0x502   :  { %2653 = vmatpush.bf16.msrb.mxu2 %v6425_v44  ;;  %2666 = vmatpush.bf16.msrb.mxu3 %v6426_v19  ;;  %v6436_v44 = vld [vmem:[#allocation31_spill] sm:$0xff]  ;;  %v6437_v19 = vld [vmem:[#allocation32_spill] sm:$0xff] }
 0x504   :  { %2702 = vmatpush.bf16.msra.mxu0 %v6423_v10  ;;  %2715 = vmatpush.bf16.msra.mxu1 %v6424_v4  ;;  %v6434_v10 = vld [vmem:[#allocation27_spill] sm:$0xff]  ;;  %v6435_v4 = vld [vmem:[#allocation28_spill] sm:$0xff] }
 0x506   :  { %2728 = vmatpush.bf16.msra.mxu2 %v6427_v29  ;;  %2741 = vmatpush.bf16.msra.mxu3 %v6428_v51  ;;  %v6438_v29 = vld [vmem:[#allocation33_spill] sm:$0xff]  ;;  %v6439_v51 = vld [vmem:[#allocation35_spill] sm:$0xff] }
 0x508   :  { %2703 = vmatpush.bf16.msra.mxu0 %v6429_v41  ;;  %2716 = vmatpush.bf16.msra.mxu1 %v6430_v13  ;;  %v6440_v41 = vld [vmem:[#allocation39_spill] sm:$0xff]  ;;  %v6441_v13 = vld [vmem:[#allocation40_spill] sm:$0xff] }
 0x50a   :  { %2729 = vmatpush.bf16.msra.mxu2 %v6431_v63  ;;  %2742 = vmatpush.bf16.msra.mxu3 %v6432_v14  ;;  %v6442_v63 = vld [vmem:[#allocation41_spill] sm:$0xff]  ;;  %v6443_v14 = vld [vmem:[#allocation42_spill] sm:$0xff] }
 0x50c   :  { %2704 = vmatpush.bf16.msra.mxu0 %v6433_v54  ;;  %2717 = vmatpush.bf16.msra.mxu1 %v6434_v10  ;;  %v6444_v54 = vld [vmem:[#allocation45_spill] sm:$0xff]  ;;  %v6445_v10 = vld [vmem:[#allocation47_spill] sm:$0xff] }
 0x50e   :  { %2730 = vmatpush.bf16.msra.mxu2 %v6435_v4  ;;  %2743 = vmatpush.bf16.msra.mxu3 %v6436_v44  ;;  %v6446_v4 = vld [vmem:[#allocation48_spill] sm:$0xff]  ;;  %v6447_v44 = vld [vmem:[#allocation49_spill] sm:$0xff] }
 0x510   :  { %2705 = vmatpush.bf16.msra.mxu0 %v6437_v19  ;;  %2718 = vmatpush.bf16.msra.mxu1 %v6438_v29  ;;  %v6448_v19 = vld [vmem:[#allocation50_spill] sm:$0xff]  ;;  %v6449_v29 = vld [vmem:[#allocation52_spill] sm:$0xff] }
 0x512   :  { %2731 = vmatpush.bf16.msra.mxu2 %v6439_v51  ;;  %2744 = vmatpush.bf16.msra.mxu3 %v6440_v41  ;;  %v6450_v51 = vld [vmem:[#allocation54_spill] sm:$0xff]  ;;  %v6451_v41 = vld [vmem:[#allocation56_spill] sm:$0xff] }
 0x514   :  { %2706 = vmatpush.bf16.msra.mxu0 %v6441_v13  ;;  %2719 = vmatpush.bf16.msra.mxu1 %v6442_v63  ;;  %v6452_v13 = vld [vmem:[#allocation57_spill] sm:$0xff]  ;;  %v6453_v63 = vld [vmem:[#allocation58_spill] sm:$0xff] }
 0x516   :  { %2732 = vmatpush.bf16.msra.mxu2 %v6443_v14  ;;  %2745 = vmatpush.bf16.msra.mxu3 %v6444_v54  ;;  %v6454_v14 = vld [vmem:[#allocation59_spill] sm:$0xff]  ;;  %v6455_v54 = vld [vmem:[#allocation60_spill] sm:$0xff] }
 0x518   :  { %2707 = vmatpush.bf16.msra.mxu0 %v6445_v10  ;;  %2720 = vmatpush.bf16.msra.mxu1 %v6446_v4  ;;  %v6456_v10 = vld [vmem:[#allocation61_spill] sm:$0xff] }
 0x51a   :  { %2733 = vmatpush.bf16.msra.mxu2 %v6447_v44  ;;  %2746 = vmatpush.bf16.msra.mxu3 %v6448_v19 }
 0x51c   :  { %2708 = vmatpush.bf16.msra.mxu0 %v6449_v29  ;;  %2721 = vmatpush.bf16.msra.mxu1 %v6450_v51 }
 0x51e   :  { %2734 = vmatpush.bf16.msra.mxu2 %v6451_v41  ;;  %2747 = vmatpush.bf16.msra.mxu3 %v6452_v13 }
 0x520   :  { %2709 = vmatpush.bf16.msra.mxu0 %v6453_v63  ;;  %2722 = vmatpush.bf16.msra.mxu1 %v6454_v14 }
 0x522   :  { %2735 = vmatpush.bf16.msra.mxu2 %v6455_v54  ;;  %2748 = vmatpush.bf16.msra.mxu3 %v6456_v10 }
 0x53f   :  { %v2416_v4 = vpop.f32.mrf.mxu0  ;;  %v2429_v44 = vpop.f32.mrf.mxu1 }
 0x546   :  { %v2442_v6 = vpop.f32.mrf.mxu2  ;;  %v2455_v19 = vpop.f32.mrf.mxu3 }
 0x547   :  { %v2418_v50 = vpop.f32.mrf.mxu0  ;;  %v2431_v29 = vpop.f32.mrf.mxu1 }
 0x54e   :  { %v2444_v58 = vpop.f32.mrf.mxu2  ;;  %v2457_v51 = vpop.f32.mrf.mxu3 }
 0x54f   :  { %v2498_v33 = vpop.f32.mrf.mxu0  ;;  %v2511_v41 = vpop.f32.mrf.mxu1 }
 0x550   :  { %v2679_v13 = vadd.f32 %v2498_v33, %v6457_v31  ;;  %v2680_v63 = vadd.f32 %v2511_v41, %v6458_v55 }
 0x552   :  { %v2683_v5 = vmul.f32 0.5, %v2679_v13  ;;  %v2687_v14 = vmul.f32 0.5, %v2680_v63 }
 0x554   :  { %4138 = vtanh.f32 %v2683_v5 }
 0x555   :  { %4140 = vtanh.f32 %v2687_v14 }
 0x556   :  { %v2524_v54 = vpop.f32.mrf.mxu2  ;;  %v2537_v10 = vpop.f32.mrf.mxu3 }
 0x557   :  { %v2681_v46 = vadd.f32 %v2524_v54, %v6459_v49  ;;  %v2500_v18 = vpop.f32.mrf.mxu0  ;;  %v2513_v57 = vpop.f32.mrf.mxu1 }
 0x559   :  { %4142 = vtanh.f32 %v2681_v46 }
 0x55a   :  { %v4139_v50 = vpop.eup %4138 }
 0x55b   :  { %v4141_v58 = vpop.eup %4140  ;;  %v2685_v29 = vmul.f32 0.5, %v4139_v50 }
 0x55c   :  { %v2689_v51 = vmul.f32 0.5, %v4141_v58 }
 0x55d   :  { %v2686_v37 = vadd.f32 0.5, %v2685_v29 }
 0x55e   :  { %v2690_v26 = vadd.f32 0.5, %v2689_v51  ;;  %v2526_v31 = vpop.f32.mrf.mxu2  ;;  %v2539_v33 = vpop.f32.mrf.mxu3 }
 0x55f   :  { %v4143_v41 = vpop.eup %4142 }
 0x560   :  { %v2696_v55 = vmul.f32 %v2690_v26, %v5377_v30  ;;  %v2697_v5 = vmul.f32 %v4143_v41, %v2686_v37  ;;  %v2550_v13 = vpop.f32.mrf.mxu0  ;;  %v2563_v63 = vpop.f32.mrf.mxu1 }
 0x561   :  { %v2593_v14 = vadd.f32 %v2550_v13, %v2416_v4  ;;  %v2594_v60 = vadd.f32 %v2563_v63, %v2429_v44 }
 0x562   :  { %v5491_v49 = vadd.f32 %v2697_v5, %v2696_v55 }
 0x563   :  { %v2597_v57 = vadd.f32 %v2593_v14, %v6176_v42  ;;  %v2598_v18 = vadd.f32 %v2594_v60, %v6177_v47 }
 0x565   :  { %v2601_v46 = vmul.f32 0.5, %v2597_v57  ;;  %v2605_v54 = vmul.f32 0.5, %v2598_v18  ;;  %v6460_v18 = vld [vmem:[#allocation129_spill] sm:$0xff] }
 0x567   :  { %4144 = vtanh.f32 %v2601_v46  ;;  %v2682_v46 = vadd.f32 %v2537_v10, %v6460_v18  ;;  %v6472_v18 = vld [vmem:[#allocation130_spill] sm:$0xff] }
 0x568   :  { %v2576_v50 = vpop.f32.mrf.mxu2  ;;  %v2589_v58 = vpop.f32.mrf.mxu3  ;;  %4146 = vtanh.f32 %v2605_v54 }
 0x569   :  { %v2595_v29 = vadd.f32 %v2576_v50, %v2442_v6  ;;  %v2596_v51 = vadd.f32 %v2589_v58, %v2455_v19  ;;  %v2552_v30 = vpop.f32.mrf.mxu0  ;;  %v2565_v26 = vpop.f32.mrf.mxu1  ;;  %v2692_v58 = vmul.f32 0.5, %v2682_v46  ;;  %v6473_v46 = vld [vmem:[#allocation131_spill] sm:$0xff] }
 0x56b   :  { %v2599_v37 = vadd.f32 %v2595_v29, %v4912_v59  ;;  %v2600_v4 = vadd.f32 %v2596_v51, %v4914_v11 }
 0x56d   :  { %4148 = vtanh.f32 %v2599_v37  ;;  %v2610_v44 = vmul.f32 0.5, %v2600_v4  ;;  %v4145_v31 = vpop.eup %4144 }
 0x56e   :  { %v4147_v33 = vpop.eup %4146  ;;  %v2603_v41 = vmul.f32 0.5, %v4145_v31 }
 0x56f   :  { %v2607_v60 = vmul.f32 0.5, %v4147_v33  ;;  %4150 = vtanh.f32 %v2610_v44  ;;  %v6461_v33 = vld [vmem:[#allocation111_spill] sm:$0xff] }
 0x570   :  { %v2578_v55 = vpop.f32.mrf.mxu2  ;;  %v2591_v5 = vpop.f32.mrf.mxu3  ;;  %v2604_v13 = vadd.f32 0.5, %v2603_v41  ;;  %v6462_v41 = vld [vmem:[#allocation112_spill] sm:$0xff] }
 0x571   :  { %v2608_v63 = vadd.f32 0.5, %v2607_v60  ;;  %v6463_v60 = vld [vmem:[#allocation114_spill] sm:$0xff]  ;;  %v6464_v55 = vld [vmem:[#allocation115_spill] sm:$0xff]  ;;  %v6465_v5 = vld [vmem:[#allocation116_spill] sm:$0xff] }
 0x573   :  { %v4149_v14 = vpop.eup %4148  ;;  %v2614_v6 = vmul.f32 %v2608_v63, %v5387_v45  ;;  %v6467_v63 = vld [vmem:[#allocation118_spill] sm:$0xff] }
 0x574   :  { %v2615_v19 = vmul.f32 %v4149_v14, %v2604_v13  ;;  %v6466_v13 = vld [vmem:[#allocation117_spill] sm:$0xff]  ;;  %v6468_v14 = vld [vmem:[#allocation119_spill] sm:$0xff] }
 0x575   :  { %v4151_v57 = vpop.eup %4150 }
 0x576   :  { %v5499_v54 = vadd.f32 %v2615_v19, %v2614_v6  ;;  %v2612_v50 = vmul.f32 0.5, %v4151_v57  ;;  %v6469_v6 = vld [vmem:[#allocation121_spill] sm:$0xff]  ;;  %v6470_v19 = vld [vmem:[#allocation122_spill] sm:$0xff] }
 0x577   :  { %v6471_v57 = vld [vmem:[#allocation125_spill] sm:$0xff] }
 0x578   :  { %4152 = vtanh.f32 %v5499_v54  ;;  %v2613_v29 = vadd.f32 0.5, %v2612_v50  ;;  %v6474_v50 = vld [vmem:[#allocation132_spill] sm:$0xff] }
 0x579   :  { %4154 = vtanh.f32 %v2692_v58  ;;  %v6475_v58 = vld [vmem:[#allocation133_spill] sm:$0xff] }
 0x57a   :  { %4156 = vtanh.f32 %v5491_v49 }
 0x57e   :  { %v4153_v51 = vpop.eup %4152 }
 0x57f   :  { %v2618_v30 = vmul.f32 %v4153_v51, %v2613_v29  ;;  %v4155_v37 = vpop.eup %4154  ;;  %v6476_v29 = vld [vmem:[#allocation134_spill] sm:$0xff]  ;;  %v6477_v51 = vld [vmem:[#allocation135_spill] sm:$0xff] }
 0x580   :  { %v2694_v45 = vmul.f32 0.5, %v4155_v37  ;;  %v4157_v10 = vpop.eup %4156  ;;  %v6480_v37 = vld [vmem:[#allocation138_spill] sm:$0xff] }
 0x581   :  { %v2619_v26 = vpack.c.bf16 %v2618_v30, %v2618_v30  ;;  %v6478_v30 = vld [vmem:[#allocation136_spill] sm:$0xff] }
 0x582   :  { %v2695_v4 = vadd.f32 0.5, %v2694_v45  ;;  %v6481_v45 = vld [vmem:[#allocation139_spill] sm:$0xff] }
 0x583   :  { %2628 = vmatmul.bf16.vlgmr.msrb.gmra.mxu0 %v2619_v26  ;;  %2641 = vmatmul.bf16.vlgmr.msrb.gmra.mxu1 %v2619_v26 }
 0x584   :  { %2654 = vmatmul.bf16.vlgmr.msrb.gmra.mxu2 %v2619_v26  ;;  %2667 = vmatmul.bf16.vlgmr.msrb.gmra.mxu3 %v2619_v26  ;;  %v2700_v44 = vmul.f32 %v4157_v10, %v2695_v4  ;;  %v6479_v26 = vld [vmem:[#allocation137_spill] sm:$0xff]  ;;  %v6482_v10 = vld [vmem:[#allocation140_spill] sm:$0xff] }
 0x585   :  { %2754 = vmatpush.bf16.msrb.mxu0 %v6117_v2  ;;  %2767 = vmatpush.bf16.msrb.mxu1 %v6118_v8  ;;  %v6483_v4 = vld [vmem:[#allocation141_spill] sm:$0xff] }
 0x586   :  { %2780 = vmatpush.bf16.msrb.mxu2 %v6119_v34  ;;  %2793 = vmatpush.bf16.msrb.mxu3 %v6120_v52  ;;  %v2701_v31 = vpack.c.bf16 %v2700_v44, %v2700_v44  ;;  %v6484_v44 = vld [vmem:[#allocation142_spill] sm:$0xff] }
 0x589   :  { %2755 = vmatpush.bf16.msrb.mxu0 %v6121_v27  ;;  %2768 = vmatpush.bf16.msrb.mxu1 %v6122_v36 }
 0x58a   :  { %2781 = vmatpush.bf16.msrb.mxu2 %v6179_v0  ;;  %2794 = vmatpush.bf16.msrb.mxu3 %v6124_v7 }
 0x58d   :  { %2756 = vmatpush.bf16.msrb.mxu0 %v6125_v62  ;;  %2769 = vmatpush.bf16.msrb.mxu1 %v6126_v35 }
 0x58e   :  { %2782 = vmatpush.bf16.msrb.mxu2 %v6180_v24  ;;  %2795 = vmatpush.bf16.msrb.mxu3 %v6181_v39 }
 0x591   :  { %2757 = vmatpush.bf16.msrb.mxu0 %v6182_v22  ;;  %2770 = vmatpush.bf16.msrb.mxu1 %v6183_v43 }
 0x592   :  { %2783 = vmatpush.bf16.msrb.mxu2 %v6184_v61  ;;  %2796 = vmatpush.bf16.msrb.mxu3 %v6185_v40 }
 0x593   :  { %2710 = vmatmul.bf16.vlgmr.msra.gmra.mxu0 %v2701_v31  ;;  %2723 = vmatmul.bf16.vlgmr.msra.gmra.mxu1 %v2701_v31 }
 0x594   :  { %2736 = vmatmul.bf16.vlgmr.msra.gmra.mxu2 %v2701_v31  ;;  %2749 = vmatmul.bf16.vlgmr.msra.gmra.mxu3 %v2701_v31 }
 0x595   :  { %2758 = vmatpush.bf16.msrb.mxu0 %v6186_v23  ;;  %2771 = vmatpush.bf16.msrb.mxu1 %v6187_v17 }
 0x596   :  { %2784 = vmatpush.bf16.msrb.mxu2 %v6188_v16  ;;  %2797 = vmatpush.bf16.msrb.mxu3 %v6189_v21 }
 0x599   :  { %2759 = vmatpush.bf16.msrb.mxu0 %v6190_v1  ;;  %2772 = vmatpush.bf16.msrb.mxu1 %v6191_v12 }
 0x59a   :  { %2785 = vmatpush.bf16.msrb.mxu2 %v6192_v32  ;;  %2798 = vmatpush.bf16.msrb.mxu3 %v6140_v53 }
 0x59d   :  { %2760 = vmatpush.bf16.msrb.mxu0 %v6141_v56  ;;  %2773 = vmatpush.bf16.msrb.mxu1 %v6193_v38 }
 0x59e   :  { %2786 = vmatpush.bf16.msrb.mxu2 %v6194_v3  ;;  %2799 = vmatpush.bf16.msrb.mxu3 %v6143_v20 }
 0x5a1   :  { %2761 = vmatpush.bf16.msrb.mxu0 %v6252_v48  ;;  %2774 = vmatpush.bf16.msrb.mxu1 %v6253_v15 }
 0x5a2   :  { %2787 = vmatpush.bf16.msrb.mxu2 %v6254_v28  ;;  %2800 = vmatpush.bf16.msrb.mxu3 %v6255_v9 }
 0x5a4   :  { %2762 = vmatmul.bf16.vlgmr.msrb.gmra.mxu0 %v2701_v31  ;;  %2775 = vmatmul.bf16.vlgmr.msrb.gmra.mxu1 %v2701_v31 }
 0x5a5   :  { %2833 = vmatpush.bf16.msra.mxu0 %v6256_v25  ;;  %2846 = vmatpush.bf16.msra.mxu1 %v6461_v33  ;;  %v6533_v33 = vld [vmem:[#allocation152_spill] sm:$0xff] }
 0x5a6   :  { %2788 = vmatmul.bf16.vlgmr.msrb.gmra.mxu2 %v2701_v31  ;;  %2801 = vmatmul.bf16.vlgmr.msrb.gmra.mxu3 %v2701_v31  ;;  %v6485_v31 = vld [vmem:[#allocation143_spill] sm:$0xff] }
 0x5a7   :  { %2859 = vmatpush.bf16.msra.mxu2 %v6462_v41  ;;  %2872 = vmatpush.bf16.msra.mxu3 %v6463_v60  ;;  %v6530_v60 = vld [vmem:[#allocation83_spill] sm:$0xff]  ;;  %v6531_v41 = vld [vmem:[#allocation150_spill] sm:$0xff] }
 0x5a9   :  { %2834 = vmatpush.bf16.msra.mxu0 %v6464_v55  ;;  %2847 = vmatpush.bf16.msra.mxu1 %v6465_v5 }
 0x5ab   :  { %2860 = vmatpush.bf16.msra.mxu2 %v6466_v13  ;;  %2873 = vmatpush.bf16.msra.mxu3 %v6467_v63 }
 0x5ad   :  { %2835 = vmatpush.bf16.msra.mxu0 %v6468_v14  ;;  %2848 = vmatpush.bf16.msra.mxu1 %v6469_v6  ;;  %v6528_v6 = vld [vmem:[#allocation78_spill] sm:$0xff] }
 0x5ae   :  { %v6529_v14 = vld [vmem:[#allocation90_spill] sm:$0xff] }
 0x5af   :  { %2861 = vmatpush.bf16.msra.mxu2 %v6470_v19  ;;  %2874 = vmatpush.bf16.msra.mxu3 %v6471_v57  ;;  %v6527_v19 = vld [vmem:[#allocation88_spill] sm:$0xff] }
 0x5b1   :  { %2836 = vmatpush.bf16.msra.mxu0 %v6472_v18  ;;  %2849 = vmatpush.bf16.msra.mxu1 %v6473_v46  ;;  %v6524_v18 = vld [vmem:[#allocation29_spill] sm:$0xff] }
 0x5b3   :  { %2862 = vmatpush.bf16.msra.mxu2 %v6474_v50  ;;  %2875 = vmatpush.bf16.msra.mxu3 %v6475_v58  ;;  %v6486_v58 = vld [vmem:[#allocation144_spill] sm:$0xff] }
 0x5b5   :  { %2837 = vmatpush.bf16.msra.mxu0 %v6476_v29  ;;  %2850 = vmatpush.bf16.msra.mxu1 %v6477_v51  ;;  %v6487_v29 = vld [vmem:[#allocation145_spill] sm:$0xff]  ;;  %v6488_v51 = vld [vmem:[#allocation146_spill] sm:$0xff] }
 0x5b7   :  { %2863 = vmatpush.bf16.msra.mxu2 %v6478_v30  ;;  %2876 = vmatpush.bf16.msra.mxu3 %v6479_v26  ;;  %v6489_v30 = vld [vmem:[#allocation147_spill] sm:$0xff]  ;;  %v6490_v26 = vld [vmem:[#allocation18_spill] sm:$0xff] }
 0x5b9   :  { %2838 = vmatpush.bf16.msra.mxu0 %v6480_v37  ;;  %2851 = vmatpush.bf16.msra.mxu1 %v6481_v45  ;;  %v6491_v37 = vld [vmem:[#allocation19_spill] sm:$0xff]  ;;  %v6492_v45 = vld [vmem:[#allocation148_spill] sm:$0xff] }
 0x5bb   :  { %2864 = vmatpush.bf16.msra.mxu2 %v6482_v10  ;;  %2877 = vmatpush.bf16.msra.mxu3 %v6483_v4  ;;  %v6493_v10 = vld [vmem:[#allocation149_spill] sm:$0xff]  ;;  %v6494_v4 = vld [vmem:[#allocation20_spill] sm:$0xff] }
 0x5bd   :  { %2839 = vmatpush.bf16.msra.mxu0 %v6484_v44  ;;  %2852 = vmatpush.bf16.msra.mxu1 %v6485_v31  ;;  %v6495_v44 = vld [vmem:[#allocation21_spill] sm:$0xff]  ;;  %v6496_v31 = vld [vmem:[#allocation22_spill] sm:$0xff] }
 0x5bf   :  { %2865 = vmatpush.bf16.msra.mxu2 %v6486_v58  ;;  %2878 = vmatpush.bf16.msra.mxu3 %v6487_v29  ;;  %v6497_v58 = vld [vmem:[#allocation23_spill] sm:$0xff]  ;;  %v6498_v29 = vld [vmem:[#allocation24_spill] sm:$0xff] }
 0x5c1   :  { %2840 = vmatpush.bf16.msra.mxu0 %v6488_v51  ;;  %2853 = vmatpush.bf16.msra.mxu1 %v6489_v30  ;;  %v6499_v51 = vld [vmem:[#allocation25_spill] sm:$0xff]  ;;  %v6500_v30 = vld [vmem:[#allocation26_spill] sm:$0xff] }
 0x5c3   :  { %2866 = vmatpush.bf16.msra.mxu2 %v6492_v45  ;;  %2879 = vmatpush.bf16.msra.mxu3 %v6493_v10  ;;  %v6503_v45 = vld [vmem:[#allocation31_spill] sm:$0xff]  ;;  %v6504_v10 = vld [vmem:[#allocation32_spill] sm:$0xff] }
 0x5c5   :  { %2915 = vmatpush.bf16.msrb.mxu0 %v6490_v26  ;;  %2928 = vmatpush.bf16.msrb.mxu1 %v6491_v37  ;;  %v6501_v26 = vld [vmem:[#allocation27_spill] sm:$0xff]  ;;  %v6502_v37 = vld [vmem:[#allocation28_spill] sm:$0xff] }
 0x5c7   :  { %2941 = vmatpush.bf16.msrb.mxu2 %v6494_v4  ;;  %2954 = vmatpush.bf16.msrb.mxu3 %v6495_v44  ;;  %v6505_v4 = vld [vmem:[#allocation33_spill] sm:$0xff]  ;;  %v6506_v44 = vld [vmem:[#allocation35_spill] sm:$0xff] }
 0x5c9   :  { %2916 = vmatpush.bf16.msrb.mxu0 %v6496_v31  ;;  %2929 = vmatpush.bf16.msrb.mxu1 %v6497_v58  ;;  %v6507_v31 = vld [vmem:[#allocation39_spill] sm:$0xff]  ;;  %v6508_v58 = vld [vmem:[#allocation40_spill] sm:$0xff] }
 0x5cb   :  { %2942 = vmatpush.bf16.msrb.mxu2 %v6498_v29  ;;  %2955 = vmatpush.bf16.msrb.mxu3 %v6499_v51  ;;  %v6509_v29 = vld [vmem:[#allocation41_spill] sm:$0xff]  ;;  %v6510_v51 = vld [vmem:[#allocation42_spill] sm:$0xff] }
 0x5cd   :  { %2917 = vmatpush.bf16.msrb.mxu0 %v6500_v30  ;;  %2930 = vmatpush.bf16.msrb.mxu1 %v6501_v26  ;;  %v6511_v30 = vld [vmem:[#allocation45_spill] sm:$0xff]  ;;  %v6512_v26 = vld [vmem:[#allocation47_spill] sm:$0xff] }
 0x5cf   :  { %2943 = vmatpush.bf16.msrb.mxu2 %v6502_v37  ;;  %2956 = vmatpush.bf16.msrb.mxu3 %v6503_v45  ;;  %v6513_v37 = vld [vmem:[#allocation48_spill] sm:$0xff]  ;;  %v6514_v45 = vld [vmem:[#allocation49_spill] sm:$0xff] }
 0x5d1   :  { %2918 = vmatpush.bf16.msrb.mxu0 %v6504_v10  ;;  %2931 = vmatpush.bf16.msrb.mxu1 %v6505_v4  ;;  %v6515_v10 = vld [vmem:[#allocation50_spill] sm:$0xff]  ;;  %v6516_v4 = vld [vmem:[#allocation52_spill] sm:$0xff] }
 0x5d3   :  { %2944 = vmatpush.bf16.msrb.mxu2 %v6506_v44  ;;  %2957 = vmatpush.bf16.msrb.mxu3 %v6507_v31  ;;  %v6517_v44 = vld [vmem:[#allocation54_spill] sm:$0xff]  ;;  %v6518_v31 = vld [vmem:[#allocation56_spill] sm:$0xff] }
 0x5d5   :  { %2919 = vmatpush.bf16.msrb.mxu0 %v6508_v58  ;;  %2932 = vmatpush.bf16.msrb.mxu1 %v6509_v29  ;;  %v6519_v58 = vld [vmem:[#allocation57_spill] sm:$0xff]  ;;  %v6520_v29 = vld [vmem:[#allocation58_spill] sm:$0xff] }
 0x5d7   :  { %2945 = vmatpush.bf16.msrb.mxu2 %v6510_v51  ;;  %2958 = vmatpush.bf16.msrb.mxu3 %v6511_v30  ;;  %v6521_v51 = vld [vmem:[#allocation59_spill] sm:$0xff]  ;;  %v6522_v30 = vld [vmem:[#allocation60_spill] sm:$0xff] }
 0x5d9   :  { %2920 = vmatpush.bf16.msrb.mxu0 %v6512_v26  ;;  %2933 = vmatpush.bf16.msrb.mxu1 %v6513_v37  ;;  %v6523_v26 = vld [vmem:[#allocation61_spill] sm:$0xff] }
 0x5db   :  { %2946 = vmatpush.bf16.msrb.mxu2 %v6514_v45  ;;  %2959 = vmatpush.bf16.msrb.mxu3 %v6515_v10 }
 0x5dd   :  { %2921 = vmatpush.bf16.msrb.mxu0 %v6516_v4  ;;  %2934 = vmatpush.bf16.msrb.mxu1 %v6517_v44  ;;  %v6525_v44 = vld [vmem:[#allocation77_spill] sm:$0xff] }
 0x5de   :  { %v561_v57 = vadd.f32 %v6525_v44, %v6524_v18 }
 0x5df   :  { %2947 = vmatpush.bf16.msrb.mxu2 %v6518_v31  ;;  %2960 = vmatpush.bf16.msrb.mxu3 %v6519_v58  ;;  %v6526_v31 = vld [vmem:[#allocation34_spill] sm:$0xff] }
 0x5e0   :  { %v619_v58 = vadd.f32 %v6527_v19, %v6526_v31  ;;  %v6534_v19 = vld [vmem:[#allocation151_spill] sm:$0xff] }
 0x5e1   :  { %2922 = vmatpush.bf16.msrb.mxu0 %v6520_v29  ;;  %2935 = vmatpush.bf16.msrb.mxu1 %v6521_v51  ;;  %v590_v29 = vadd.f32 %v6528_v6, %v561_v57  ;;  %v6535_v6 = vld [vmem:[#allocation153_spill] sm:$0xff] }
 0x5e2   :  { %v648_v51 = vadd.f32 %v6529_v14, %v619_v58 }
 0x5e3   :  { %2948 = vmatpush.bf16.msrb.mxu2 %v6522_v30  ;;  %2961 = vmatpush.bf16.msrb.mxu3 %v6523_v26 }
 0x600   :  { %v2629_v37 = vpop.f32.mrf.mxu0  ;;  %v2642_v45 = vpop.f32.mrf.mxu1 }
 0x607   :  { %v2655_v50 = vpop.f32.mrf.mxu2  ;;  %v2668_v10 = vpop.f32.mrf.mxu3 }
 0x608   :  { %v2631_v46 = vpop.f32.mrf.mxu0  ;;  %v2644_v4 = vpop.f32.mrf.mxu1 }
 0x609   :  { %v677_v46 = vadd.f32 %v6531_v41, %v6530_v60  ;;  %v6532_v4 = vld [vmem:[#allocation95_spill] sm:$0xff] }
 0x60a   :  { %v735_v25 = vadd.f32 %v6533_v33, %v6532_v4 }
 0x60b   :  { %v706_v31 = vadd.f32 %v6534_v19, %v677_v46 }
 0x60c   :  { %v764_v57 = vadd.f32 %v6535_v6, %v735_v25 }
 0x60f   :  { %v2657_v63 = vpop.f32.mrf.mxu2  ;;  %v2670_v30 = vpop.f32.mrf.mxu3 }
 0x610   :  { %v2711_v13 = vpop.f32.mrf.mxu0  ;;  %v2724_v26 = vpop.f32.mrf.mxu1 }
 0x611   :  { %v2892_v5 = vadd.f32 %v2711_v13, %v590_v29  ;;  %v2893_v55 = vadd.f32 %v2724_v26, %v648_v51 }
 0x613   :  { %v2896_v18 = vmul.f32 0.5, %v2892_v5  ;;  %v2900_v44 = vmul.f32 0.5, %v2893_v55 }
 0x615   :  { %4158 = vtanh.f32 %v2896_v18 }
 0x616   :  { %4160 = vtanh.f32 %v2900_v44 }
 0x617   :  { %v2737_v63 = vpop.f32.mrf.mxu2  ;;  %v2750_v14 = vpop.f32.mrf.mxu3 }
 0x618   :  { %v2894_v58 = vadd.f32 %v2737_v63, %v706_v31  ;;  %v2895_v30 = vadd.f32 %v2750_v14, %v764_v57  ;;  %v2713_v13 = vpop.f32.mrf.mxu0  ;;  %v2726_v29 = vpop.f32.mrf.mxu1 }
 0x61a   :  { %4162 = vtanh.f32 %v2894_v58  ;;  %v2905_v51 = vmul.f32 0.5, %v2895_v30 }
 0x61b   :  { %v4159_v41 = vpop.eup %4158 }
 0x61c   :  { %v4161_v60 = vpop.eup %4160  ;;  %v2898_v26 = vmul.f32 0.5, %v4159_v41  ;;  %4164 = vtanh.f32 %v2905_v51 }
 0x61d   :  { %v2902_v33 = vmul.f32 0.5, %v4161_v60 }
 0x61e   :  { %v2899_v55 = vadd.f32 0.5, %v2898_v26 }
 0x61f   :  { %v2903_v5 = vadd.f32 0.5, %v2902_v33  ;;  %v2739_v4 = vpop.f32.mrf.mxu2  ;;  %v2752_v46 = vpop.f32.mrf.mxu3 }
 0x620   :  { %v4163_v18 = vpop.eup %4162 }
 0x621   :  { %v2909_v25 = vmul.f32 %v2903_v5, %v5491_v49  ;;  %v2910_v44 = vmul.f32 %v4163_v18, %v2899_v55  ;;  %v2763_v19 = vpop.f32.mrf.mxu0  ;;  %v2776_v31 = vpop.f32.mrf.mxu1 }
 0x622   :  { %v2806_v6 = vadd.f32 %v2763_v19, %v2629_v37  ;;  %v2807_v57 = vadd.f32 %v2776_v31, %v2642_v45  ;;  %v4165_v63 = vpop.eup %4164 }
 0x623   :  { %v2911_v14 = vadd.f32 %v2910_v44, %v2909_v25  ;;  %v2907_v13 = vmul.f32 0.5, %v4165_v63 }
 0x624   :  { %v2810_v58 = vadd.f32 %v2806_v6, %v6176_v42  ;;  %v2811_v30 = vadd.f32 %v2807_v57, %v6177_v47 }
 0x625   :  { %4166 = vtanh.f32 %v2911_v14  ;;  %v2908_v37 = vadd.f32 0.5, %v2907_v13 }
 0x626   :  { %v2814_v29 = vmul.f32 0.5, %v2810_v58  ;;  %v2818_v51 = vmul.f32 0.5, %v2811_v30 }
 0x628   :  { %4168 = vtanh.f32 %v2814_v29 }
 0x629   :  { %v2789_v41 = vpop.f32.mrf.mxu2  ;;  %v2802_v60 = vpop.f32.mrf.mxu3  ;;  %4170 = vtanh.f32 %v2818_v51 }
 0x62a   :  { %v2808_v49 = vadd.f32 %v2789_v41, %v2655_v50  ;;  %v2809_v26 = vadd.f32 %v2802_v60, %v2668_v10  ;;  %v2765_v33 = vpop.f32.mrf.mxu0  ;;  %v2778_v55 = vpop.f32.mrf.mxu1 }
 0x62b   :  { %v4167_v45 = vpop.eup %4166 }
 0x62c   :  { %v2812_v5 = vadd.f32 %v2808_v49, %v4912_v59  ;;  %v2813_v4 = vadd.f32 %v2809_v26, %v4914_v11  ;;  %v2913_v46 = vmul.f32 %v4167_v45, %v2908_v37 }
 0x62e   :  { %4172 = vtanh.f32 %v2812_v5  ;;  %v2823_v18 = vmul.f32 0.5, %v2813_v4  ;;  %v4169_v25 = vpop.eup %4168 }
 0x62f   :  { %v4171_v44 = vpop.eup %4170  ;;  %v2816_v19 = vmul.f32 0.5, %v4169_v25 }
 0x630   :  { %v2820_v31 = vmul.f32 0.5, %v4171_v44  ;;  %4174 = vtanh.f32 %v2823_v18  ;;  %v3127_v44 = vld [vmem:[%s5749_s6 + $0x78] sm:$0xff] }
 0x631   :  { %v2791_v6 = vpop.f32.mrf.mxu2  ;;  %v2804_v57 = vpop.f32.mrf.mxu3  ;;  %v2817_v50 = vadd.f32 0.5, %v2816_v19  ;;  %v3126_v19 = vld [vmem:[%s5749_s6 + $0x70] sm:$0xff] }
 0x632   :  { %v2821_v10 = vadd.f32 0.5, %v2820_v31  ;;  %v3125_v57 = vld [vmem:[%s5749_s6 + $0x68] sm:$0xff] }
 0x634   :  { %v4173_v63 = vpop.eup %4172  ;;  %v2827_v14 = vmul.f32 %v2821_v10, %v5499_v54  ;;  %v6567_v54 = vld [vmem:[#allocation149_spill] sm:$0xff] }
 0x635   :  { %v2828_v58 = vmul.f32 %v4173_v63, %v2817_v50  ;;  %v3124_v63 = vld [vmem:[%s5749_s6 + $0x60] sm:$0xff] }
 0x636   :  { %v4175_v30 = vpop.eup %4174 }
 0x637   :  { %v5617_v13 = vadd.f32 %v2828_v58, %v2827_v14  ;;  %v2825_v29 = vmul.f32 0.5, %v4175_v30  ;;  %v3123_v14 = vld [vmem:[%s5749_s6 + $0x58] sm:$0xff]  ;;  %v3122_v58 = vld [vmem:[%s5749_s6 + $0x50] sm:$0xff] }
 0x639   :  { %4176 = vtanh.f32 %v5617_v13  ;;  %v2826_v51 = vadd.f32 0.5, %v2825_v29 }
 0x63f   :  { %v4177_v41 = vpop.eup %4176 }
 0x640   :  { %v2831_v60 = vmul.f32 %v4177_v41, %v2826_v51  ;;  %v3121_v51 = vld [vmem:[%s5749_s6 + $0x48] sm:$0xff] }
 0x642   :  { %v2832_v49 = vpack.c.bf16 %v2831_v60, %v2831_v60 }
 0x644   :  { %2841 = vmatmul.bf16.vlgmr.msra.gmra.mxu0 %v2832_v49  ;;  %2854 = vmatmul.bf16.vlgmr.msra.gmra.mxu1 %v2832_v49 }
 0x645   :  { %2867 = vmatmul.bf16.vlgmr.msra.gmra.mxu2 %v2832_v49  ;;  %2880 = vmatmul.bf16.vlgmr.msra.gmra.mxu3 %v2832_v49  ;;  %v3120_v49 = vld [vmem:[%s5749_s6 + $0x40] sm:$0xff] }
 0x646   :  { %2967 = vmatpush.bf16.msra.mxu0 %v6117_v2  ;;  %2980 = vmatpush.bf16.msra.mxu1 %v6118_v8  ;;  %v2914_v2 = vpack.c.bf16 %v2913_v46, %v2913_v46  ;;  %v6536_v8 = vld [vmem:[#allocation110_spill] sm:$0xff] }
 0x647   :  { %2993 = vmatpush.bf16.msra.mxu2 %v6119_v34  ;;  %3006 = vmatpush.bf16.msra.mxu3 %v6120_v52  ;;  %v6537_v34 = vld [vmem:[#allocation111_spill] sm:$0xff]  ;;  %v6539_v52 = vld [vmem:[#allocation114_spill] sm:$0xff] }
 0x64a   :  { %2968 = vmatpush.bf16.msra.mxu0 %v6121_v27  ;;  %2981 = vmatpush.bf16.msra.mxu1 %v6122_v36  ;;  %v6540_v27 = vld [vmem:[#allocation115_spill] sm:$0xff]  ;;  %v6541_v36 = vld [vmem:[#allocation116_spill] sm:$0xff] }
 0x64b   :  { %2994 = vmatpush.bf16.msra.mxu2 %v6179_v0  ;;  %3007 = vmatpush.bf16.msra.mxu3 %v6124_v7  ;;  %v6543_v7 = vld [vmem:[#allocation118_spill] sm:$0xff]  ;;  %v6547_v0 = vld [vmem:[#allocation125_spill] sm:$0xff] }
 0x64e   :  { %2969 = vmatpush.bf16.msra.mxu0 %v6125_v62  ;;  %2982 = vmatpush.bf16.msra.mxu1 %v6126_v35  ;;  %v6544_v62 = vld [vmem:[#allocation119_spill] sm:$0xff]  ;;  %v6545_v35 = vld [vmem:[#allocation121_spill] sm:$0xff] }
 0x64f   :  { %2995 = vmatpush.bf16.msra.mxu2 %v6180_v24  ;;  %3008 = vmatpush.bf16.msra.mxu3 %v6181_v39  ;;  %v6548_v24 = vld [vmem:[#allocation130_spill] sm:$0xff]  ;;  %v6549_v39 = vld [vmem:[#allocation131_spill] sm:$0xff] }
 0x652   :  { %2970 = vmatpush.bf16.msra.mxu0 %v6182_v22  ;;  %2983 = vmatpush.bf16.msra.mxu1 %v6183_v43  ;;  %v6550_v22 = vld [vmem:[#allocation132_spill] sm:$0xff]  ;;  %v6551_v43 = vld [vmem:[#allocation133_spill] sm:$0xff] }
 0x653   :  { %2996 = vmatpush.bf16.msra.mxu2 %v6184_v61  ;;  %3009 = vmatpush.bf16.msra.mxu3 %v6185_v40  ;;  %v6552_v61 = vld [vmem:[#allocation134_spill] sm:$0xff]  ;;  %v6553_v40 = vld [vmem:[#allocation135_spill] sm:$0xff] }
 0x654   :  { %2923 = vmatmul.bf16.vlgmr.msrb.gmra.mxu0 %v2914_v2  ;;  %2936 = vmatmul.bf16.vlgmr.msrb.gmra.mxu1 %v2914_v2 }
 0x655   :  { %2949 = vmatmul.bf16.vlgmr.msrb.gmra.mxu2 %v2914_v2  ;;  %2962 = vmatmul.bf16.vlgmr.msrb.gmra.mxu3 %v2914_v2 }
 0x656   :  { %2971 = vmatpush.bf16.msra.mxu0 %v6186_v23  ;;  %2984 = vmatpush.bf16.msra.mxu1 %v6187_v17  ;;  %v6554_v23 = vld [vmem:[#allocation136_spill] sm:$0xff]  ;;  %v6555_v17 = vld [vmem:[#allocation137_spill] sm:$0xff] }
 0x657   :  { %2997 = vmatpush.bf16.msra.mxu2 %v6188_v16  ;;  %3010 = vmatpush.bf16.msra.mxu3 %v6189_v21  ;;  %v6556_v16 = vld [vmem:[#allocation138_spill] sm:$0xff]  ;;  %v6557_v21 = vld [vmem:[#allocation139_spill] sm:$0xff] }
 0x65a   :  { %2972 = vmatpush.bf16.msra.mxu0 %v6190_v1  ;;  %2985 = vmatpush.bf16.msra.mxu1 %v6191_v12  ;;  %v6558_v1 = vld [vmem:[#allocation140_spill] sm:$0xff]  ;;  %v6559_v12 = vld [vmem:[#allocation141_spill] sm:$0xff] }
 0x65b   :  { %2998 = vmatpush.bf16.msra.mxu2 %v6192_v32  ;;  %3011 = vmatpush.bf16.msra.mxu3 %v6140_v53  ;;  %v6538_v53 = vld [vmem:[#allocation112_spill] sm:$0xff]  ;;  %v6560_v32 = vld [vmem:[#allocation142_spill] sm:$0xff] }
 0x65e   :  { %2973 = vmatpush.bf16.msra.mxu0 %v6141_v56  ;;  %2986 = vmatpush.bf16.msra.mxu1 %v6193_v38  ;;  %v6542_v56 = vld [vmem:[#allocation117_spill] sm:$0xff]  ;;  %v6561_v38 = vld [vmem:[#allocation143_spill] sm:$0xff] }
 0x65f   :  { %2999 = vmatpush.bf16.msra.mxu2 %v6194_v3  ;;  %3012 = vmatpush.bf16.msra.mxu3 %v6143_v20  ;;  %v6546_v20 = vld [vmem:[#allocation122_spill] sm:$0xff]  ;;  %v6562_v3 = vld [vmem:[#allocation144_spill] sm:$0xff] }
 0x662   :  { %2974 = vmatpush.bf16.msra.mxu0 %v6252_v48  ;;  %2987 = vmatpush.bf16.msra.mxu1 %v6253_v15  ;;  %v6563_v48 = vld [vmem:[#allocation145_spill] sm:$0xff]  ;;  %v6564_v15 = vld [vmem:[#allocation146_spill] sm:$0xff] }
 0x663   :  { %3000 = vmatpush.bf16.msra.mxu2 %v6254_v28  ;;  %3013 = vmatpush.bf16.msra.mxu3 %v6255_v9  ;;  %v6565_v28 = vld [vmem:[#allocation147_spill] sm:$0xff]  ;;  %v6566_v9 = vld [vmem:[#allocation148_spill] sm:$0xff] }
 0x665   :  { %2975 = vmatmul.bf16.vlgmr.msra.gmra.mxu0 %v2914_v2  ;;  %2988 = vmatmul.bf16.vlgmr.msra.gmra.mxu1 %v2914_v2 }
 0x666   :  { %3046 = vmatpush.bf16.msrb.mxu0 %v6536_v8  ;;  %3059 = vmatpush.bf16.msrb.mxu1 %v6537_v34 }
 0x667   :  { %3001 = vmatmul.bf16.vlgmr.msra.gmra.mxu2 %v2914_v2  ;;  %3014 = vmatmul.bf16.vlgmr.msra.gmra.mxu3 %v2914_v2 }
 0x668   :  { %3072 = vmatpush.bf16.msrb.mxu2 %v6538_v53  ;;  %3085 = vmatpush.bf16.msrb.mxu3 %v6539_v52  ;;  %v3119_v52 = vld [vmem:[%s5749_s6 + $0x38] sm:$0xff] }
 0x66a   :  { %3047 = vmatpush.bf16.msrb.mxu0 %v6540_v27  ;;  %3060 = vmatpush.bf16.msrb.mxu1 %v6541_v36  ;;  %v3118_v27 = vld [vmem:[%s5749_s6 + $0x30] sm:$0xff] }
 0x66c   :  { %3073 = vmatpush.bf16.msrb.mxu2 %v6542_v56  ;;  %3086 = vmatpush.bf16.msrb.mxu3 %v6543_v7  ;;  %v3117_v7 = vld [vmem:[%s5749_s6 + $0x28] sm:$0xff] }
 0x66e   :  { %3048 = vmatpush.bf16.msrb.mxu0 %v6544_v62  ;;  %3061 = vmatpush.bf16.msrb.mxu1 %v6545_v35 }
 0x670   :  { %3074 = vmatpush.bf16.msrb.mxu2 %v6546_v20  ;;  %3087 = vmatpush.bf16.msrb.mxu3 %v6547_v0 }
 0x672   :  { %3049 = vmatpush.bf16.msrb.mxu0 %v6548_v24  ;;  %3062 = vmatpush.bf16.msrb.mxu1 %v6549_v39  ;;  %v3115_v39 = vld [vmem:[%s5749_s6 + $0x18] sm:$0xff] }
 0x674   :  { %3075 = vmatpush.bf16.msrb.mxu2 %v6550_v22  ;;  %3088 = vmatpush.bf16.msrb.mxu3 %v6551_v43 }
 0x676   :  { %3050 = vmatpush.bf16.msrb.mxu0 %v6552_v61  ;;  %3063 = vmatpush.bf16.msrb.mxu1 %v6553_v40  ;;  %v3114_v61 = vld [vmem:[%s5749_s6 + $0x10] sm:$0xff] }
 0x678   :  { %3076 = vmatpush.bf16.msrb.mxu2 %v6554_v23  ;;  %3089 = vmatpush.bf16.msrb.mxu3 %v6555_v17  ;;  %v3113_v17 = vld [vmem:[%s5749_s6 + $0x8] sm:$0xff] }
 0x67a   :  { %3051 = vmatpush.bf16.msrb.mxu0 %v6556_v16  ;;  %3064 = vmatpush.bf16.msrb.mxu1 %v6557_v21 }
 0x67c   :  { %3077 = vmatpush.bf16.msrb.mxu2 %v6558_v1  ;;  %3090 = vmatpush.bf16.msrb.mxu3 %v6559_v12  ;;  %v3112_v12 = vld [vmem:[%s5749_s6] sm:$0xff] }
 0x67e   :  { %3052 = vmatpush.bf16.msrb.mxu0 %v6560_v32  ;;  %3065 = vmatpush.bf16.msrb.mxu1 %v6561_v38 }
 0x680   :  { %3078 = vmatpush.bf16.msrb.mxu2 %v6562_v3  ;;  %3091 = vmatpush.bf16.msrb.mxu3 %v6563_v48 }
 0x682   :  { %3053 = vmatpush.bf16.msrb.mxu0 %v6564_v15  ;;  %3066 = vmatpush.bf16.msrb.mxu1 %v6565_v28 }
 0x684   :  { %3079 = vmatpush.bf16.msrb.mxu2 %v6566_v9  ;;  %3092 = vmatpush.bf16.msrb.mxu3 %v6567_v54 }
 0x686   :  { %3132 = vmatpush.msra.mxu0 %v3127_v44 }
 0x688   :  { %3133 = vmatpush.msra.mxu0 %v3126_v19 }
 0x68a   :  { %3134 = vmatpush.msra.mxu0 %v3125_v57 }
 0x68c   :  { %3135 = vmatpush.msra.mxu0 %v3124_v63 }
 0x68e   :  { %3136 = vmatpush.msra.mxu0 %v3123_v14 }
 0x690   :  { %3137 = vmatpush.msra.mxu0 %v3122_v58 }
 0x692   :  { %3138 = vmatpush.msra.mxu0 %v3121_v51 }
 0x694   :  { %3139 = vmatpush.msra.mxu0 %v3120_v49 }
 0x696   :  { %3140 = vmatpush.msra.mxu0 %v3119_v52 }
 0x698   :  { %3141 = vmatpush.msra.mxu0 %v3118_v27 }
 0x69a   :  { %3142 = vmatpush.msra.mxu0 %v3117_v7 }
 0x6c1   :  { %v2842_v26 = vpop.f32.mrf.mxu0  ;;  %v2855_v33 = vpop.f32.mrf.mxu1 }
 0x6c8   :  { %v2868_v55 = vpop.f32.mrf.mxu2  ;;  %v2881_v37 = vpop.f32.mrf.mxu3 }
 0x6c9   :  { %v2844_v45 = vpop.f32.mrf.mxu0  ;;  %v2857_v5 = vpop.f32.mrf.mxu1 }
 0x6d0   :  { %v2870_v4 = vpop.f32.mrf.mxu2  ;;  %v2883_v46 = vpop.f32.mrf.mxu3 }
 0x6d1   :  { %v2924_v18 = vpop.f32.mrf.mxu0  ;;  %v2937_v25 = vpop.f32.mrf.mxu1 }
 0x6d2   :  { %v4027_v25 = vld [vmem:[%s5750_s7] ss:$0 sm:$0xff] }
 0x6d8   :  { %v2950_v31 = vpop.f32.mrf.mxu2  ;;  %v2963_v6 = vpop.f32.mrf.mxu3 }
 0x6d9   :  { %v2926_v50 = vpop.f32.mrf.mxu0  ;;  %v2939_v10 = vpop.f32.mrf.mxu1 }
 0x6e0   :  { %v2952_v30 = vpop.f32.mrf.mxu2  ;;  %v2965_v29 = vpop.f32.mrf.mxu3 }
 0x6e2   :  { %v2976_v41 = vpop.f32.mrf.mxu0  ;;  %v2989_v60 = vpop.f32.mrf.mxu1 }
 0x6e3   :  { %v3019_v2 = vadd.f32 %v2976_v41, %v2842_v26  ;;  %v3020_v8 = vadd.f32 %v2989_v60, %v2855_v33 }
 0x6e5   :  { %v3023_v34 = vadd.f32 %v3019_v2, %v6176_v42  ;;  %v3024_v53 = vadd.f32 %v3020_v8, %v6177_v47  ;;  %v3116_v47 = vld [vmem:[%s5749_s6 + $0x20] sm:$0xff] }
 0x6e6   :  { %3143 = vmatpush.msra.mxu0 %v3116_v47 }
 0x6e7   :  { %v3027_v36 = vmul.f32 0.5, %v3023_v34  ;;  %v3031_v56 = vmul.f32 0.5, %v3024_v53 }
 0x6e8   :  { %3144 = vmatpush.msra.mxu0 %v3115_v39 }
 0x6e9   :  { %4178 = vtanh.f32 %v3027_v36 }
 0x6ea   :  { %v3002_v42 = vpop.f32.mrf.mxu2  ;;  %v3015_v62 = vpop.f32.mrf.mxu3  ;;  %4180 = vtanh.f32 %v3031_v56  ;;  %3145 = vmatpush.msra.mxu0 %v3114_v61 }
 0x6eb   :  { %v3021_v35 = vadd.f32 %v3002_v42, %v2868_v55  ;;  %v3022_v20 = vadd.f32 %v3015_v62, %v2881_v37  ;;  %v2978_v0 = vpop.f32.mrf.mxu0  ;;  %v2991_v24 = vpop.f32.mrf.mxu1 }
 0x6ec   :  { %3146 = vmatpush.msra.mxu0 %v3113_v17 }
 0x6ed   :  { %v3025_v22 = vadd.f32 %v3021_v35, %v4912_v59  ;;  %v3026_v43 = vadd.f32 %v3022_v20, %v4914_v11 }
 0x6ee   :  { %3147 = vmatpush.msra.mxu0 %v3112_v12 }
 0x6ef   :  { %4182 = vtanh.f32 %v3025_v22  ;;  %v3036_v40 = vmul.f32 0.5, %v3026_v43  ;;  %v4179_v23 = vpop.eup %4178 }
 0x6f0   :  { %v4181_v16 = vpop.eup %4180  ;;  %v3029_v21 = vmul.f32 0.5, %v4179_v23 }
 0x6f1   :  { %v3033_v1 = vmul.f32 0.5, %v4181_v16  ;;  %4184 = vtanh.f32 %v3036_v40 }
 0x6f2   :  { %v3004_v59 = vpop.f32.mrf.mxu2  ;;  %v3017_v11 = vpop.f32.mrf.mxu3  ;;  %v3030_v32 = vadd.f32 0.5, %v3029_v21 }
 0x6f3   :  { %v3034_v38 = vadd.f32 0.5, %v3033_v1 }
 0x6f5   :  { %v4183_v3 = vpop.eup %4182  ;;  %v3040_v48 = vmul.f32 %v3034_v38, %v5617_v13 }
 0x6f6   :  { %v3041_v15 = vmul.f32 %v4183_v3, %v3030_v32 }
 0x6f7   :  { %v4185_v28 = vpop.eup %4184 }
 0x6f8   :  { %v3042_v9 = vadd.f32 %v3041_v15, %v3040_v48  ;;  %v3038_v54 = vmul.f32 0.5, %v4185_v28 }
 0x6fa   :  { %4186 = vtanh.f32 %v3042_v9  ;;  %v3039_v26 = vadd.f32 0.5, %v3038_v54 }
 0x700   :  { %v4187_v33 = vpop.eup %4186 }
 0x701   :  { %v3044_v55 = vmul.f32 %v4187_v33, %v3039_v26 }
 0x703   :  { %v3045_v37 = vpack.c.bf16 %v3044_v55, %v3044_v55 }
 0x705   :  { %3054 = vmatmul.bf16.vlgmr.msrb.gmra.mxu0 %v3045_v37  ;;  %3067 = vmatmul.bf16.vlgmr.msrb.gmra.mxu1 %v3045_v37 }
 0x706   :  { %3080 = vmatmul.bf16.vlgmr.msrb.gmra.mxu2 %v3045_v37  ;;  %3093 = vmatmul.bf16.vlgmr.msrb.gmra.mxu3 %v3045_v37 }
 0x715   :  { %3148 = vmatmul.f32.vlgmr.msra.gmra.mxu0 %v3044_v55 }
 0x782   :  { %v3055_v45 = vpop.f32.mrf.mxu0  ;;  %v3068_v5 = vpop.f32.mrf.mxu1 }
 0x789   :  { %v3081_v4 = vpop.f32.mrf.mxu2  ;;  %v3094_v46 = vpop.f32.mrf.mxu3 }
 0x78a   :  { %v3057_v18 = vpop.f32.mrf.mxu0  ;;  %v3070_v13 = vpop.f32.mrf.mxu1 }
 0x791   :  { %v3083_v44 = vpop.f32.mrf.mxu2  ;;  %v3096_v19 = vpop.f32.mrf.mxu3 }
 0x792   :  { %v3149_v31 = vpop.f32.mrf.mxu0 }
 0x793   :  { %v3150_v6 = vadd.f32 %v4027_v25, %v3149_v31 }
 0x795   :  { %3153 = vst.msk [vmem:[#allocation14] sm:$0xff] %vm3152_vm0, %v3150_v6 }
 0x796   :  { %3164 = dma.vmem_to_hbm [thread:$0]  %s3160_s13, 128, %s3162_s16, [#allocation10]  }
 0x797   :  { %4288 = dma.done.wait [#allocation10], 128  }
 0x798   :  { %4289 = vsyncadd [#allocation10], 4294967168 }
 0x799   :  { %3169 = vsyncpa [#allocation9], 1 }
 0x79a   :  { %3170 = vsyncpa [#allocation12], 1 }
 0x79b   :  { %3171 = vsyncpa [#allocation10], 1 }

</bundles_post_ra>
